<compile_context>
chip_gen: v5e
topology: v5e:2x2
jax: 0.10.0
libtpu: 0.0.40
codegen_flags: <defaults>
</compile_context>

<pallas_src>
from functools import partial

import jax
import jax.numpy as jnp
from jax.experimental import pallas as pl
from jax.experimental.pallas import tpu as pltpu


def _round_up(a, b):
    return ((a + b - 1) // b) * b


def _nnue_kernel(x_ref, w1_ref, b1_ref, w2_ref, b2_ref, wo_ref, bo_ref, out_ref):
    F = w1_ref.shape[0]

    x = x_ref[...]                                   # (tile_n, 2F) bf16
    # 128-aligned lane slices: even-row / odd-row perspectives of each position.
    xe = x[:, :F].astype(jnp.bfloat16)               # cast is a no-op for bf16 input
    xo = x[:, F:].astype(jnp.bfloat16)

    w1 = w1_ref[...]                                 # (F, l1) bf16, resident
    b1 = b1_ref[...]                                 # (1, l1) f32

    # l1 applied to both perspectives, f32 accumulation on the MXU.
    he = jnp.dot(xe, w1, preferred_element_type=jnp.float32) + b1
    ho = jnp.dot(xo, w1, preferred_element_type=jnp.float32) + b1

    # view(-1, 2*l1) + clamp: lane concat (both halves 128-aligned) then clip.
    h = jnp.clip(jnp.concatenate([he, ho], axis=-1), 0.0, 1.0)   # (tile_n, 2*l1)

    # Fused l2 matmul on the concatenated-perspective vector.
    h2 = (jnp.dot(h.astype(jnp.bfloat16), w2_ref[...],
                  preferred_element_type=jnp.float32) + b2_ref[...])
    h2 = jnp.clip(h2, 0.0, 1.0)                      # (tile_n, l2)

    # Output layer (l2 -> 1), nnue2score == 1.  Computed as wo_pad(8,l2) @ h2.T so
    # the per-tile result is lane-dense (1, tile_n); rows 1..7 of wo_pad are zero.
    res = jnp.dot(wo_ref[...], h2.T, preferred_element_type=jnp.float32)  # (8, tile_n)
    out_ref[...] = res[0:1, :] + bo_ref[...]


@partial(jax.jit, static_argnames=("tile_n", "vmem_limit_bytes"))
def nnue_forward(x, params, *, tile_n=2048, vmem_limit_bytes=48 * 1024 * 1024):
    """x: (2*N, num_features), bf16 preferred (f32 accepted).  Returns (N, 1) f32."""
    w1_t, b1, w2_t, b2, wo_pad, bo = params
    B, F = x.shape
    assert B % 2 == 0
    N = B // 2
    l1 = w1_t.shape[1]
    l2 = w2_t.shape[1]

    # Free metadata reshape of the contiguous (2N, F) input -> (N, 2F).
    x2 = x.reshape(N, 2 * F)
    if x2.dtype != jnp.bfloat16:
        # Fallback only: ideally the producer emits bf16 so HBM carries half the bytes.
        x2 = x2.astype(jnp.bfloat16)

    # tile_n: multiple of 128 so x blocks stay sublane-aligned and the lane-dense
    # output blocks stay 128-aligned; pad the batch instead of asserting.
    tile_n = max(128, min(int(tile_n), _round_up(N, 128)))
    tile_n = _round_up(tile_n, 128)
    num_tiles = pl.cdiv(N, tile_n)
    n_pad = num_tiles * tile_n
    if n_pad != N:
        x2 = jnp.pad(x2, ((0, n_pad - N), (0, 0)))

    in_specs = [
        # x stream: batch-tiled, double-buffered by Pallas.
        pl.BlockSpec((tile_n, 2 * F), lambda i: (i, 0)),
        # Weights / biases: constant block index -> DMAed once, stay resident in VMEM.
        pl.BlockSpec((F, l1), lambda i: (0, 0)),
        pl.BlockSpec((1, l1), lambda i: (0, 0)),
        pl.BlockSpec((2 * l1, l2), lambda i: (0, 0)),
        pl.BlockSpec((1, l2), lambda i: (0, 0)),
        pl.BlockSpec((8, l2), lambda i: (0, 0)),
        pl.BlockSpec((1, 1), lambda i: (0, 0)),
    ]
    # Lane-dense output: (1, tile_n) block of a (1, n_pad) buffer.
    out_specs = pl.BlockSpec((1, tile_n), lambda i: (0, i))

    out = pl.pallas_call(
        _nnue_kernel,
        out_shape=jax.ShapeDtypeStruct((1, n_pad), jnp.float32),
        grid=(num_tiles,),
        in_specs=in_specs,
        out_specs=out_specs,
        compiler_params=pltpu.CompilerParams(
            dimension_semantics=("parallel",),
            vmem_limit_bytes=vmem_limit_bytes),
    )(x2, w1_t, b1, w2_t, b2, wo_pad, bo)

    # Free metadata slice/reshape back to (N, 1).
    return out[0, :N].reshape(N, 1)


def init_params(key, num_features=768, l1_size=256, l2_size=32):
    """Deterministic init mimicking nn.Linear's U(-1/sqrt(fan_in), 1/sqrt(fan_in))."""
    ks = jax.random.split(key, 6)

    def lin(kw, kb, fan_in, fan_out):
        bound = 1.0 / jnp.sqrt(fan_in)
        w = jax.random.uniform(kw, (fan_out, fan_in), jnp.float32, -bound, bound)
        b = jax.random.uniform(kb, (fan_out,), jnp.float32, -bound, bound)
        return w, b

    w1, b1 = lin(ks[0], ks[1], num_features, l1_size)        # (256, 768), (256,)
    w2, b2 = lin(ks[2], ks[3], l1_size * 2, l2_size)         # (32, 512), (32,)
    wo, bo = lin(ks[4], ks[5], l2_size, 1)                   # (1, 32), (1,)

    # Output weights padded to 8 sublanes (rows 1..7 zero) for the lane-dense epilogue.
    wo_pad = jnp.zeros((8, l2_size), jnp.float32).at[0].set(wo[0])

    # Kernel layout: weights pre-transposed / pre-cast to bf16 (MXU), biases f32 (VPU).
    kernel_params = (
        w1.T.astype(jnp.bfloat16),        # (768, 256)
        b1.reshape(1, -1),                # (1, 256) f32
        w2.T.astype(jnp.bfloat16),        # (512, 32) fused l2 weight
        b2.reshape(1, -1),                # (1, 32) f32
        wo_pad,                           # (8, 32) f32
        bo.reshape(1, 1),                 # (1, 1) f32
    )
    raw_params = (w1, b1, w2, b2, wo, bo)
    return kernel_params, raw_params


def reference_forward(x, raw_params, l1_size=256):
    """Pure-JAX (f32) replica of the PyTorch forward, for validation."""
    w1, b1, w2, b2, wo, bo = raw_params
    h = x @ w1.T + b1
    h = h.reshape(-1, l1_size * 2)
    h = jnp.clip(h, 0.0, 1.0)
    h = jnp.clip(h @ w2.T + b2, 0.0, 1.0)
    return (h @ wo.T + bo) * 1.0          # nnue2score == 1


if __name__ == "__main__":
    num_features, l1_size, l2_size = 768, 256, 32
    n_positions = 320                      # 2 perspective rows each -> 640 input rows
    batch = 2 * n_positions

    key = jax.random.PRNGKey(0)
    kx, kp = jax.random.split(key)
    # Producer emits bf16 (the kernel's MXU path is bf16; f32 would only add HBM bytes).
    x = jax.random.uniform(kx, (batch, num_features), jnp.float32).astype(jnp.bfloat16)

    kernel_params, raw_params = init_params(kp, num_features, l1_size, l2_size)

    # Small tile for the demo -> grid of 3 steps (exercises padding: 320 -> 384).
    out = nnue_forward(x, kernel_params, tile_n=128)
    out = jax.block_until_ready(out)

    ref = reference_forward(x.astype(jnp.float32), raw_params, l1_size)
    assert out.shape == (n_positions, 1)
    max_err = float(jnp.max(jnp.abs(out - ref)))
    # bf16 MXU operands with f32 accumulation: loosened tolerance vs pure f32.
    assert jnp.allclose(out, ref, atol=3e-2, rtol=3e-2), f"max abs err {max_err}"

    print("KERNEL_OK")
</pallas_src>

<mosaic_0001>
module attributes {stable_mosaic.version = 11 : i64} {
  func.func @_nnue_kernel(%arg0: i32, %arg1: memref<128x1536xbf16, #tpu.memory_space<vmem>>, %arg2: memref<768x256xbf16, #tpu.memory_space<vmem>>, %arg3: memref<1x256xf32, #tpu.memory_space<vmem>>, %arg4: memref<512x32xbf16, #tpu.memory_space<vmem>>, %arg5: memref<1x32xf32, #tpu.memory_space<vmem>>, %arg6: memref<8x32xf32, #tpu.memory_space<vmem>>, %arg7: memref<1x1xf32, #tpu.memory_space<vmem>>, %arg8: memref<1x128xf32, #tpu.memory_space<vmem>>) attributes {dimension_semantics = [#tpu.dimension_semantics<parallel>], iteration_bounds = array<i64: 3>, scalar_prefetch = 0 : i64, scratch_operands = 0 : i64, tpu.core_type = #tpu.core_type<tc>, window_params = [{transform_indices = @transform_0, window_bounds = array<i64: 128, 1536>}, {pipeline_mode = #tpu.pipeline_mode<synchronous>, transform_indices = @transform_1, window_bounds = array<i64: 768, 256>}, {pipeline_mode = #tpu.pipeline_mode<synchronous>, transform_indices = @transform_2, window_bounds = array<i64: 1, 256>}, {pipeline_mode = #tpu.pipeline_mode<synchronous>, transform_indices = @transform_3, window_bounds = array<i64: 512, 32>}, {pipeline_mode = #tpu.pipeline_mode<synchronous>, transform_indices = @transform_4, window_bounds = array<i64: 1, 32>}, {pipeline_mode = #tpu.pipeline_mode<synchronous>, transform_indices = @transform_5, window_bounds = array<i64: 8, 32>}, {pipeline_mode = #tpu.pipeline_mode<synchronous>, transform_indices = @transform_6, window_bounds = array<i64: 1, 1>}, {transform_indices = @transform_7, window_bounds = array<i64: 1, 128>}]} {
    %c0 = arith.constant 0 : index
    %c0_0 = arith.constant 0 : index
    %0 = vector.load %arg1[%c0, %c0_0] : memref<128x1536xbf16, #tpu.memory_space<vmem>>, vector<128x1536xbf16>
    %1 = vector.extract_strided_slice %0 {offsets = [0, 0], sizes = [128, 768], strides = [1, 1]} : vector<128x1536xbf16> to vector<128x768xbf16>
    %2 = vector.extract_strided_slice %0 {offsets = [0, 768], sizes = [128, 768], strides = [1, 1]} : vector<128x1536xbf16> to vector<128x768xbf16>
    %c0_1 = arith.constant 0 : index
    %c0_2 = arith.constant 0 : index
    %3 = vector.load %arg2[%c0_1, %c0_2] : memref<768x256xbf16, #tpu.memory_space<vmem>>, vector<768x256xbf16>
    %c0_3 = arith.constant 0 : index
    %c0_4 = arith.constant 0 : index
    %4 = vector.load %arg3[%c0_3, %c0_4] : memref<1x256xf32, #tpu.memory_space<vmem>>, vector<1x256xf32>
    %cst = arith.constant dense<0.000000e+00> : vector<128x256xf32>
    %5 = tpu.matmul %1, %3, %cst {dimension_numbers = #tpu.dot_dimension_numbers<[1], [0], [0], [1], [0, 0, 1, 1], [], []>} : vector<128x768xbf16>, vector<768x256xbf16>, vector<128x256xf32> -> vector<128x256xf32>
    %6 = vector.broadcast %4 : vector<1x256xf32> to vector<128x256xf32>
    %7 = arith.addf %5, %6 : vector<128x256xf32>
    %cst_5 = arith.constant dense<0.000000e+00> : vector<128x256xf32>
    %8 = tpu.matmul %2, %3, %cst_5 {dimension_numbers = #tpu.dot_dimension_numbers<[1], [0], [0], [1], [0, 0, 1, 1], [], []>} : vector<128x768xbf16>, vector<768x256xbf16>, vector<128x256xf32> -> vector<128x256xf32>
    %9 = vector.broadcast %4 : vector<1x256xf32> to vector<128x256xf32>
    %10 = arith.addf %8, %9 : vector<128x256xf32>
    %11 = tpu.concatenate %7, %10 in 1 : vector<128x256xf32>, vector<128x256xf32> -> vector<128x512xf32>
    %cst_6 = arith.constant 0.000000e+00 : f32
    %cst_7 = arith.constant 1.000000e+00 : f32
    %12 = vector.broadcast %cst_6 : f32 to vector<128x512xf32>
    %13 = arith.maximumf %12, %11 : vector<128x512xf32>
    %14 = vector.broadcast %cst_7 : f32 to vector<128x512xf32>
    %15 = arith.minimumf %14, %13 : vector<128x512xf32>
    %16 = arith.truncf %15 : vector<128x512xf32> to vector<128x512xbf16>
    %c0_8 = arith.constant 0 : index
    %c0_9 = arith.constant 0 : index
    %17 = vector.load %arg4[%c0_8, %c0_9] : memref<512x32xbf16, #tpu.memory_space<vmem>>, vector<512x32xbf16>
    %cst_10 = arith.constant dense<0.000000e+00> : vector<128x32xf32>
    %18 = tpu.matmul %16, %17, %cst_10 {dimension_numbers = #tpu.dot_dimension_numbers<[1], [0], [0], [1], [0, 0, 1, 1], [], []>} : vector<128x512xbf16>, vector<512x32xbf16>, vector<128x32xf32> -> vector<128x32xf32>
    %c0_11 = arith.constant 0 : index
    %c0_12 = arith.constant 0 : index
    %19 = vector.load %arg5[%c0_11, %c0_12] : memref<1x32xf32, #tpu.memory_space<vmem>>, vector<1x32xf32>
    %20 = vector.broadcast %19 : vector<1x32xf32> to vector<128x32xf32>
    %21 = arith.addf %18, %20 : vector<128x32xf32>
    %cst_13 = arith.constant 0.000000e+00 : f32
    %cst_14 = arith.constant 1.000000e+00 : f32
    %22 = vector.broadcast %cst_13 : f32 to vector<128x32xf32>
    %23 = arith.maximumf %22, %21 : vector<128x32xf32>
    %24 = vector.broadcast %cst_14 : f32 to vector<128x32xf32>
    %25 = arith.minimumf %24, %23 : vector<128x32xf32>
    %c0_15 = arith.constant 0 : index
    %c0_16 = arith.constant 0 : index
    %26 = vector.load %arg6[%c0_15, %c0_16] : memref<8x32xf32, #tpu.memory_space<vmem>>, vector<8x32xf32>
    %27 = tpu.transpose %25, [1, 0] : vector<128x32xf32> -> vector<32x128xf32>
    %cst_17 = arith.constant dense<0.000000e+00> : vector<8x128xf32>
    %28 = tpu.matmul %26, %27, %cst_17 {dimension_numbers = #tpu.dot_dimension_numbers<[1], [0], [0], [1], [0, 0, 1, 1], [], []>} : vector<8x32xf32>, vector<32x128xf32>, vector<8x128xf32> -> vector<8x128xf32>
    %29 = vector.extract_strided_slice %28 {offsets = [0, 0], sizes = [1, 128], strides = [1, 1]} : vector<8x128xf32> to vector<1x128xf32>
    %c0_18 = arith.constant 0 : index
    %c0_19 = arith.constant 0 : index
    %30 = vector.load %arg7[%c0_18, %c0_19] : memref<1x1xf32, #tpu.memory_space<vmem>>, vector<1x1xf32>
    %31 = vector.broadcast %30 : vector<1x1xf32> to vector<1x128xf32>
    %32 = arith.addf %29, %31 : vector<1x128xf32>
    %c0_20 = arith.constant 0 : index
    %c0_21 = arith.constant 0 : index
    %33 = vector.load %arg8[%c0_20, %c0_21] : memref<1x128xf32, #tpu.memory_space<vmem>>, vector<1x128xf32>
    tpu.vector_store %arg8[%c0_20, %c0_21], %32 {strides = array<i32>} : memref<1x128xf32, #tpu.memory_space<vmem>>, vector<1x128xf32>,
    return
  }
  func.func @transform_0(%arg0: i32) -> (i32, i32) {
    %c0_i32 = arith.constant 0 : i32
    %c0_i32_0 = arith.constant 0 : i32
    return %arg0, %c0_i32 : i32, i32
  }
  func.func @transform_1(%arg0: i32) -> (i32, i32) {
    %c0_i32 = arith.constant 0 : i32
    %c0_i32_0 = arith.constant 0 : i32
    %c0_i32_1 = arith.constant 0 : i32
    return %c0_i32, %c0_i32_0 : i32, i32
  }
  func.func @transform_2(%arg0: i32) -> (i32, i32) {
    %c0_i32 = arith.constant 0 : i32
    %c0_i32_0 = arith.constant 0 : i32
    %c0_i32_1 = arith.constant 0 : i32
    return %c0_i32, %c0_i32_0 : i32, i32
  }
  func.func @transform_3(%arg0: i32) -> (i32, i32) {
    %c0_i32 = arith.constant 0 : i32
    %c0_i32_0 = arith.constant 0 : i32
    %c0_i32_1 = arith.constant 0 : i32
    return %c0_i32, %c0_i32_0 : i32, i32
  }
  func.func @transform_4(%arg0: i32) -> (i32, i32) {
    %c0_i32 = arith.constant 0 : i32
    %c0_i32_0 = arith.constant 0 : i32
    %c0_i32_1 = arith.constant 0 : i32
    return %c0_i32, %c0_i32_0 : i32, i32
  }
  func.func @transform_5(%arg0: i32) -> (i32, i32) {
    %c0_i32 = arith.constant 0 : i32
    %c0_i32_0 = arith.constant 0 : i32
    %c0_i32_1 = arith.constant 0 : i32
    return %c0_i32, %c0_i32_0 : i32, i32
  }
  func.func @transform_6(%arg0: i32) -> (i32, i32) {
    %c0_i32 = arith.constant 0 : i32
    %c0_i32_0 = arith.constant 0 : i32
    %c0_i32_1 = arith.constant 0 : i32
    return %c0_i32, %c0_i32_0 : i32, i32
  }
  func.func @transform_7(%arg0: i32) -> (i32, i32) {
    %c0_i32 = arith.constant 0 : i32
    %c0_i32_0 = arith.constant 0 : i32
    return %c0_i32, %arg0 : i32, i32
  }
}

</mosaic_0001>

<bundles_post_ra>
// kernel: nnue_forward.1
= control target key start
LH: loop header
LB: loop body
LE: loop exit
PB: predicated region body
PF: predicated region fallthrough
CT: control target
= control target key end

     0   :  { %s4603_s26 = smov 0   ;;  %s6825_s0 = inlined_call_operand.vmem [shape: bf16[384,1536], index: 0, kind: input, shape index: {}]   ;;  %s6826_s1 = inlined_call_operand.vmem [shape: bf16[768,256], index: 1, kind: input, shape index: {}]   ;;  %s6827_s2 = inlined_call_operand.vmem [shape: f32[1,256], index: 2, kind: input, shape index: {}]   ;;  %s6828_s3 = inlined_call_operand.vmem [shape: bf16[512,32], index: 3, kind: input, shape index: {}]   ;;  %s6829_s4 = inlined_call_operand.vmem [shape: f32[1,32], index: 4, kind: input, shape index: {}]   ;;  %s6830_s5 = inlined_call_operand.vmem [shape: f32[8,32], index: 5, kind: input, shape index: {}]   ;;  %s6831_s6 = inlined_call_operand.<no memory space> [shape: f32[1,1], index: 6, kind: input, shape index: {}]   ;;  %s6832_s7 = inlined_call_operand.vmem [shape: f32[1,384], index: 7, kind: output, shape index: {}]  }
   0x1   :  { %v12_v0 = vstv %s6831_s6 }
   0x2   :  { %13 = vst [vmem:[#allocation2] sm:$0x1] %v12_v0 }
   0x3 LB: > { %s4609_s27 = sadd.s32 4294967295, %s4557_s26   ;;  %p3397_p0 = scmp.ge.s32.totalorder %s4557_s26, 1  ;;  %s4557_s26 = sphi %s4603_s26, %s19_s26  }
   0x4   : > { %p241_p1 = scmp.lt.s32.totalorder %s4557_s26, 4 }
   0x6   : > { %p242_p2 = pnand %p3397_p0, %p241_p1 }
   0x8   : > { %245 = sbr.rel (%p242_p2) target bundleno = 1289 (0x509), region = 48 }
   0xd   : > { %v3650_v1 = vld [vmem:[%s6826_s1 + $0x70] sm:$0xf]  ;;  %v4426_v2 = vld [vmem:[%s6826_s1 + $0x74] sm:$0xf0]  ;;  %v3642_v12 = vld [vmem:[%s6826_s1 + $0x60] sm:$0xf] }
   0xe   : > { %v3714_v3 = vld [vmem:[%s6826_s1 + $0xf0] sm:$0xf]  ;;  %v4622_v4 = vor.u32 %v4426_v2, %v3650_v1  ;;  %v4442_v5 = vld [vmem:[%s6826_s1 + $0xf4] sm:$0xf0]  ;;  %v4424_v14 = vld [vmem:[%s6826_s1 + $0x64] sm:$0xf0] }
   0xf   : > { %v3778_v6 = vld [vmem:[%s6826_s1 + $0x170] sm:$0xf]  ;;  %v4458_v7 = vld [vmem:[%s6826_s1 + $0x174] sm:$0xf0]  ;;  %v4633_v8 = vor.u32 %v4442_v5, %v3714_v3  ;;  %v3706_v15 = vld [vmem:[%s6826_s1 + $0xe0] sm:$0xf]  ;;  %v4660_v17 = vor.u32 %v4424_v14, %v3642_v12 }
  0x10   : > { %v4635_v9 = vor.u32 %v4458_v7, %v3778_v6  ;;  %v3842_v10 = vld [vmem:[%s6826_s1 + $0x1f0] sm:$0xf]  ;;  %v4474_v11 = vld [vmem:[%s6826_s1 + $0x1f4] sm:$0xf0]  ;;  %1200 = vmatpush.bf16.msra.mxu0 %v4622_v4  ;;  %v4440_v16 = vld [vmem:[%s6826_s1 + $0xe4] sm:$0xf0] }
  0x11   : > { %v4647_v13 = vor.u32 %v4474_v11, %v3842_v10  ;;  %1249 = vmatpush.bf16.msra.mxu1 %v4633_v8  ;;  %v4662_v18 = vor.u32 %v4440_v16, %v3706_v15  ;;  %v3770_v19 = vld [vmem:[%s6826_s1 + $0x160] sm:$0xf]  ;;  %v4456_v20 = vld [vmem:[%s6826_s1 + $0x164] sm:$0xf0]  ;;  %v3634_v24 = vld [vmem:[%s6826_s1 + $0x50] sm:$0xf] }
  0x12   : > { %1298 = vmatpush.bf16.msra.mxu2 %v4635_v9  ;;  %v3834_v21 = vld [vmem:[%s6826_s1 + $0x1e0] sm:$0xf]  ;;  %v4674_v22 = vor.u32 %v4456_v20, %v3770_v19  ;;  %v4472_v23 = vld [vmem:[%s6826_s1 + $0x1e4] sm:$0xf0]  ;;  %v4422_v25 = vld [vmem:[%s6826_s1 + $0x54] sm:$0xf0] }
  0x13   : > { %1347 = vmatpush.bf16.msra.mxu3 %v4647_v13  ;;  %v4685_v26 = vor.u32 %v4472_v23, %v3834_v21  ;;  %v3698_v27 = vld [vmem:[%s6826_s1 + $0xd0] sm:$0xf]  ;;  %v4438_v28 = vld [vmem:[%s6826_s1 + $0xd4] sm:$0xf0]  ;;  %v4697_v30 = vor.u32 %v4422_v25, %v3634_v24  ;;  %v3626_v36 = vld [vmem:[%s6826_s1 + $0x40] sm:$0xf] }
  0x14   : > { %v3762_v29 = vld [vmem:[%s6826_s1 + $0x150] sm:$0xf]  ;;  %1201 = vmatpush.bf16.msra.mxu0 %v4660_v17  ;;  %v4454_v31 = vld [vmem:[%s6826_s1 + $0x154] sm:$0xf0]  ;;  %v4710_v34 = vor.u32 %v4438_v28, %v3698_v27  ;;  %v4420_v37 = vld [vmem:[%s6826_s1 + $0x44] sm:$0xf0] }
  0x15   : > { %v3826_v32 = vld [vmem:[%s6826_s1 + $0x1d0] sm:$0xf]  ;;  %v4470_v33 = vld [vmem:[%s6826_s1 + $0x1d4] sm:$0xf0]  ;;  %1250 = vmatpush.bf16.msra.mxu1 %v4662_v18  ;;  %v4712_v35 = vor.u32 %v4454_v31, %v3762_v29  ;;  %v3690_v38 = vld [vmem:[%s6826_s1 + $0xc0] sm:$0xf]  ;;  %v4742_v45 = vor.u32 %v4420_v37, %v3626_v36 }
  0x16   : > { %1299 = vmatpush.bf16.msra.mxu2 %v4674_v22  ;;  %v4724_v39 = vor.u32 %v4470_v33, %v3826_v32  ;;  %v4436_v40 = vld [vmem:[%s6826_s1 + $0xc4] sm:$0xf0]  ;;  %v3754_v41 = vld [vmem:[%s6826_s1 + $0x140] sm:$0xf]  ;;  %v3618_v48 = vld [vmem:[%s6826_s1 + $0x30] sm:$0xf] }
  0x17   : > { %1348 = vmatpush.bf16.msra.mxu3 %v4685_v26  ;;  %v4452_v42 = vld [vmem:[%s6826_s1 + $0x144] sm:$0xf0]  ;;  %v3818_v43 = vld [vmem:[%s6826_s1 + $0x1c0] sm:$0xf]  ;;  %v4746_v46 = vor.u32 %v4436_v40, %v3690_v38  ;;  %v4418_v49 = vld [vmem:[%s6826_s1 + $0x34] sm:$0xf0] }
  0x18   : > { %v4468_v44 = vld [vmem:[%s6826_s1 + $0x1c4] sm:$0xf0]  ;;  %1202 = vmatpush.bf16.msra.mxu0 %v4697_v30  ;;  %v4748_v47 = vor.u32 %v4452_v42, %v3754_v41  ;;  %v3682_v50 = vld [vmem:[%s6826_s1 + $0xb0] sm:$0xf]  ;;  %v4434_v52 = vld [vmem:[%s6826_s1 + $0xb4] sm:$0xf0]  ;;  %v4778_v57 = vor.u32 %v4418_v49, %v3618_v48 }
  0x19   : > { %1251 = vmatpush.bf16.msra.mxu1 %v4710_v34  ;;  %v4760_v51 = vor.u32 %v4468_v44, %v3818_v43  ;;  %v3746_v53 = vld [vmem:[%s6826_s1 + $0x130] sm:$0xf]  ;;  %v4450_v54 = vld [vmem:[%s6826_s1 + $0x134] sm:$0xf0]  ;;  %v4782_v58 = vor.u32 %v4434_v52, %v3682_v50  ;;  %v3610_v60 = vld [vmem:[%s6826_s1 + $0x20] sm:$0xf] }
  0x1a   : > { %1300 = vmatpush.bf16.msra.mxu2 %v4712_v35  ;;  %v3810_v55 = vld [vmem:[%s6826_s1 + $0x1b0] sm:$0xf]  ;;  %v4466_v56 = vld [vmem:[%s6826_s1 + $0x1b4] sm:$0xf0]  ;;  %v4784_v59 = vor.u32 %v4450_v54, %v3746_v53  ;;  %v4416_v61 = vld [vmem:[%s6826_s1 + $0x24] sm:$0xf0] }
  0x1b   : > { %1349 = vmatpush.bf16.msra.mxu3 %v4724_v39  ;;  %v3674_v62 = vld [vmem:[%s6826_s1 + $0xa0] sm:$0xf]  ;;  %v4796_v63 = vor.u32 %v4466_v56, %v3810_v55  ;;  %v4432_v0 = vld [vmem:[%s6826_s1 + $0xa4] sm:$0xf0]  ;;  %v4814_v6 = vor.u32 %v4416_v61, %v3610_v60  ;;  %v3602_v7 = vld [vmem:[%s6826_s1 + $0x10] sm:$0xf] }
  0x1c   : > { %1203 = vmatpush.bf16.msra.mxu0 %v4742_v45  ;;  %v3738_v1 = vld [vmem:[%s6826_s1 + $0x120] sm:$0xf]  ;;  %v4448_v2 = vld [vmem:[%s6826_s1 + $0x124] sm:$0xf0]  ;;  %v4414_v10 = vld [vmem:[%s6826_s1 + $0x14] sm:$0xf0]  ;;  %v4824_v11 = vor.u32 %v4432_v0, %v3674_v62 }
  0x1d   : > { %1252 = vmatpush.bf16.msra.mxu1 %v4746_v46  ;;  %v3802_v3 = vld [vmem:[%s6826_s1 + $0x1a0] sm:$0xf]  ;;  %v4464_v5 = vld [vmem:[%s6826_s1 + $0x1a4] sm:$0xf0]  ;;  %v4826_v12 = vor.u32 %v4448_v2, %v3738_v1  ;;  %v3666_v14 = vld [vmem:[%s6826_s1 + $0x90] sm:$0xf]  ;;  %v4851_v24 = vor.u32 %v4414_v10, %v3602_v7 }
  0x1e   : > { %1301 = vmatpush.bf16.msra.mxu2 %v4748_v47  ;;  %v4430_v15 = vld [vmem:[%s6826_s1 + $0x94] sm:$0xf0]  ;;  %v3730_v16 = vld [vmem:[%s6826_s1 + $0x110] sm:$0xf]  ;;  %v4838_v19 = vor.u32 %v4464_v5, %v3802_v3  ;;  %s3398_s24 = sshll.u32 %s4609_s27, 4  ;;  %vm3265_vm0 = vcmask 261120  }
  0x1f   : > { %1350 = vmatpush.bf16.msra.mxu3 %v4760_v51  ;;  %v4446_v20 = vld [vmem:[%s6826_s1 + $0x114] sm:$0xf0]  ;;  %v3794_v21 = vld [vmem:[%s6826_s1 + $0x190] sm:$0xf]  ;;  %p273_p3 = scmp.lt.s32.totalorder %s3398_s24, 47  ;;  %v4858_v27 = vor.u32 %v4430_v15, %v3666_v14  ;;  %p279_p4 = scmp.lt.s32.totalorder %s4609_s27, 2 }
  0x20   : > { %1204 = vmatpush.bf16.msra.mxu0 %v4778_v57  ;;  %v4462_v23 = vld [vmem:[%s6826_s1 + $0x194] sm:$0xf0]  ;;  %v3594_v25 = vld [vmem:[%s6826_s1] sm:$0xf]  ;;  %v4860_v28 = vor.u32 %v4446_v20, %v3730_v16  ;;  %v4412_v29 = vld [vmem:[%s6826_s1 + $0x4] sm:$0xf0] }
  0x21   : > { %1253 = vmatpush.bf16.msra.mxu1 %v4782_v58  ;;  %v3658_v31 = vld [vmem:[%s6826_s1 + $0x80] sm:$0xf]  ;;  %s7218_s24 = smov (!%p273_p3, %s3398_s24), 47  ;;  %v4869_v32 = vor.u32 %v4462_v23, %v3794_v21  ;;  %v4428_v33 = vld [vmem:[%s6826_s1 + $0x84] sm:$0xf0]  ;;  %v4887_v41 = vor.u32 %v4412_v29, %v3594_v25  ;;  %s7220_s27 = smov (!%p279_p4, %s4609_s27), 2 }
  0x22   : > { %1302 = vmatpush.bf16.msra.mxu2 %v4784_v59  ;;  %v3722_v36 = vld [vmem:[%s6826_s1 + $0x100] sm:$0xf]  ;;  %v4444_v37 = vld [vmem:[%s6826_s1 + $0x104] sm:$0xf0]  ;;  %s4539_s23 = smul.u32 48, %s7218_s24  ;;  %v4891_v42 = vor.u32 %v4428_v33, %v3658_v31  ;;  %s281_s14 = scalar_lea.vmem %s6832_s7, %s7220_s27 }
  0x23   : > { %1351 = vmatpush.bf16.msra.mxu3 %v4796_v63  ;;  %v3786_v38 = vld [vmem:[%s6826_s1 + $0x180] sm:$0xf]  ;;  %v4460_v40 = vld [vmem:[%s6826_s1 + $0x184] sm:$0xf0]  ;;  %6955 = vst [vmem:[#allocation3_spill] sm:$0xff] %v4887_v41  ;;  %v4893_v43 = vor.u32 %v4444_v37, %v3722_v36 }
  0x24   : > { %1205 = vmatpush.bf16.msra.mxu0 %v4814_v6  ;;  %6956 = vst [vmem:[#allocation4_spill] sm:$0xff] %v4891_v42  ;;  %s4898_s29 = scalar_lea.vmem %s6825_s0, %s4539_s23  ;;  %v4901_v44 = vor.u32 %v4460_v40, %v3786_v38 }
  0x25   : > { %1254 = vmatpush.bf16.msra.mxu1 %v4824_v11  ;;  %v3402_v48 = vld [vmem:[%s4898_s29] sm:$0xf]  ;;  %v4321_v49 = vld [vmem:[%s4898_s29 + $0x2c] sm:$0xf0]  ;;  %v4315_v50 = vld [vmem:[%s4898_s29 + $0x4] sm:$0xf] }
  0x26   : > { %1303 = vmatpush.bf16.msra.mxu2 %v4826_v12  ;;  %6957 = vst [vmem:[#allocation5_spill] sm:$0xff] %v4901_v44  ;;  %v4906_v52 = vor.u32 %v4321_v49, %v3402_v48  ;;  %v3404_v53 = vld [vmem:[%s4898_s29 + $0x30] sm:$0xf0]  ;;  %v3410_v54 = vld [vmem:[%s4898_s29 + $0x8] sm:$0xf] }
  0x27   : > { %1352 = vmatpush.bf16.msra.mxu3 %v4838_v19  ;;  %v4322_v55 = vld [vmem:[%s4898_s29 + $0x34] sm:$0xf0]  ;;  %v4912_v56 = vor.u32 %v4315_v50, %v3404_v53  ;;  %v4316_v61 = vld [vmem:[%s4898_s29 + $0xc] sm:$0xf]  ;;  %v3412_v62 = vld [vmem:[%s4898_s29 + $0x38] sm:$0xf0] }
  0x28   : > { %1206 = vmatpush.bf16.msra.mxu0 %v4851_v24  ;;  %v4914_v60 = vor.u32 %v4322_v55, %v3410_v54  ;;  %v4920_v0 = vor.u32 %v4316_v61, %v3412_v62  ;;  %v3426_v1 = vld [vmem:[%s4898_s29 + $0x60] sm:$0xf]  ;;  %v4333_v2 = vld [vmem:[%s4898_s29 + $0x8c] sm:$0xf0]  ;;  %v4327_v3 = vld [vmem:[%s4898_s29 + $0x64] sm:$0xf] }
  0x29   : > { %1255 = vmatpush.bf16.msra.mxu1 %v4858_v27  ;;  %v3428_v5 = vld [vmem:[%s4898_s29 + $0x90] sm:$0xf0]  ;;  %v3434_v7 = vld [vmem:[%s4898_s29 + $0x68] sm:$0xf]  ;;  %v4334_v10 = vld [vmem:[%s4898_s29 + $0x94] sm:$0xf0]  ;;  %v4935_v16 = vor.u32 %v4333_v2, %v3426_v1 }
  0x2a   : > { %1304 = vmatpush.bf16.msra.mxu2 %v4860_v28  ;;  %6958 = vst [vmem:[#allocation6_spill] sm:$0xff] %v4920_v0  ;;  %v4328_v14 = vld [vmem:[%s4898_s29 + $0x6c] sm:$0xf]  ;;  %v3436_v15 = vld [vmem:[%s4898_s29 + $0x98] sm:$0xf0]  ;;  %v4937_v20 = vor.u32 %v4327_v3, %v3428_v5  ;;  %v4939_v21 = vor.u32 %v4334_v10, %v3434_v7 }
  0x2b   : > { %1353 = vmatpush.bf16.msra.mxu3 %v4869_v32  ;;  %v4941_v23 = vor.u32 %v4328_v14, %v3436_v15  ;;  %v3450_v25 = vld [vmem:[%s4898_s29 + $0xc0] sm:$0xf]  ;;  %v4345_v29 = vld [vmem:[%s4898_s29 + $0xec] sm:$0xf0]  ;;  %v4339_v31 = vld [vmem:[%s4898_s29 + $0xc4] sm:$0xf] }
  0x2c   : > { %1207 = vmatpush.bf16.msra.mxu0 %v4887_v41  ;;  %6959 = vst [vmem:[#allocation7_spill] sm:$0xff] %v4939_v21  ;;  %v3452_v33 = vld [vmem:[%s4898_s29 + $0xf0] sm:$0xf0]  ;;  %v3458_v36 = vld [vmem:[%s4898_s29 + $0xc8] sm:$0xf]  ;;  %v4955_v48 = vor.u32 %v4345_v29, %v3450_v25 }
  0x2d   : > { %1256 = vmatpush.bf16.msra.mxu1 %v4891_v42  ;;  %6960 = vst [vmem:[#allocation8_spill] sm:$0xff] %v4941_v23  ;;  %v4346_v37 = vld [vmem:[%s4898_s29 + $0xf4] sm:$0xf0]  ;;  %v4340_v38 = vld [vmem:[%s4898_s29 + $0xcc] sm:$0xf]  ;;  %v4957_v49 = vor.u32 %v4339_v31, %v3452_v33 }
  0x2e   : > { %1305 = vmatpush.bf16.msra.mxu2 %v4893_v43  ;;  %v3460_v40 = vld [vmem:[%s4898_s29 + $0xf8] sm:$0xf0]  ;;  %v4959_v50 = vor.u32 %v4346_v37, %v3458_v36  ;;  %v4425_v54 = vld [vmem:[%s6826_s1 + $0x74] sm:$0xf]  ;;  %v3906_v61 = vld [vmem:[%s6826_s1 + $0x270] sm:$0xf] }
  0x2f   : > { %1354 = vmatpush.bf16.msra.mxu3 %v4901_v44  ;;  %1208 = vmatmul.bf16.vlgmr.msra.gmra.mxu0 %v4906_v52  ;;  %v4961_v53 = vor.u32 %v4340_v38, %v3460_v40  ;;  %v3652_v55 = vld [vmem:[%s6826_s1 + $0x78] sm:$0xf0]  ;;  %v4490_v1 = vld [vmem:[%s6826_s1 + $0x274] sm:$0xf0]  ;;  %v4441_v2 = vld [vmem:[%s6826_s1 + $0xf4] sm:$0xf] }
  0x30   : > { %1257 = vmatmul.bf16.vlgmr.msra.gmra.mxu1 %v4912_v56  ;;  %6961 = vst [vmem:[#allocation9_spill] sm:$0xff] %v4959_v50  ;;  %v4976_v62 = vor.u32 %v4425_v54, %v3652_v55  ;;  %v3716_v3 = vld [vmem:[%s6826_s1 + $0xf8] sm:$0xf0]  ;;  %v4987_v5 = vor.u32 %v4490_v1, %v3906_v61  ;;  %v3970_v10 = vld [vmem:[%s6826_s1 + $0x2f0] sm:$0xf] }
  0x31   : > { %1306 = vmatmul.bf16.vlgmr.msra.gmra.mxu2 %v4914_v60  ;;  %6962 = vst [vmem:[#allocation10_spill] sm:$0xff] %v4961_v53  ;;  %v4989_v7 = vor.u32 %v4441_v2, %v3716_v3  ;;  %v4506_v14 = vld [vmem:[%s6826_s1 + $0x2f4] sm:$0xf0]  ;;  %v3474_v25 = vld [vmem:[%s4898_s29 + $0x120] sm:$0xf] }
  0x32   : > { %1355 = vmatmul.bf16.vlgmr.msra.gmra.mxu3 %v4920_v0  ;;  %6963 = vst [vmem:[#allocation11_spill] sm:$0xff] %v4976_v62  ;;  %1494 = vmatpush.bf16.msrb.mxu2 %v4976_v62  ;;  %v4998_v15 = vor.u32 %v4506_v14, %v3970_v10  ;;  %v4357_v29 = vld [vmem:[%s4898_s29 + $0x14c] sm:$0xf0]  ;;  %v4351_v31 = vld [vmem:[%s4898_s29 + $0x124] sm:$0xf] }
  0x33   : > { %6964 = vst [vmem:[#allocation12_spill] sm:$0xff] %v4987_v5  ;;  %1396 = vmatpush.bf16.msrb.mxu0 %v4987_v5  ;;  %1543 = vmatpush.bf16.msrb.mxu3 %v4989_v7  ;;  %v3476_v33 = vld [vmem:[%s4898_s29 + $0x150] sm:$0xf0]  ;;  %v3482_v36 = vld [vmem:[%s4898_s29 + $0x128] sm:$0xf]  ;;  %v5011_v54 = vor.u32 %v4357_v29, %v3474_v25 }
  0x34   : > { %6965 = vst [vmem:[#allocation13_spill] sm:$0xff] %v4989_v7  ;;  %1445 = vmatpush.bf16.msrb.mxu1 %v4998_v15  ;;  %v4358_v37 = vld [vmem:[%s4898_s29 + $0x154] sm:$0xf0]  ;;  %v4352_v38 = vld [vmem:[%s4898_s29 + $0x12c] sm:$0xf]  ;;  %v5013_v55 = vor.u32 %v4351_v31, %v3476_v33 }
  0x35   : > { %6966 = vst [vmem:[#allocation14_spill] sm:$0xff] %v4998_v15  ;;  %v3484_v40 = vld [vmem:[%s4898_s29 + $0x158] sm:$0xf0]  ;;  %v5015_v61 = vor.u32 %v4358_v37, %v3482_v36  ;;  %v4423_v2 = vld [vmem:[%s6826_s1 + $0x64] sm:$0xf] }
  0x36   : > { %v5017_v1 = vor.u32 %v4352_v38, %v3484_v40  ;;  %v3644_v3 = vld [vmem:[%s6826_s1 + $0x68] sm:$0xf0]  ;;  %v3898_v10 = vld [vmem:[%s6826_s1 + $0x260] sm:$0xf]  ;;  %v4488_v25 = vld [vmem:[%s6826_s1 + $0x264] sm:$0xf0] }
  0x37   : > { %6967 = vst [vmem:[#allocation15_spill] sm:$0xff] %v5015_v61  ;;  %v5032_v14 = vor.u32 %v4423_v2, %v3644_v3  ;;  %v4439_v29 = vld [vmem:[%s6826_s1 + $0xe4] sm:$0xf]  ;;  %v3708_v31 = vld [vmem:[%s6826_s1 + $0xe8] sm:$0xf0]  ;;  %v5043_v33 = vor.u32 %v4488_v25, %v3898_v10 }
  0x38   : > { %6968 = vst [vmem:[#allocation16_spill] sm:$0xff] %v5017_v1  ;;  %v5045_v36 = vor.u32 %v4439_v29, %v3708_v31  ;;  %v3962_v37 = vld [vmem:[%s6826_s1 + $0x2e0] sm:$0xf]  ;;  %v4504_v38 = vld [vmem:[%s6826_s1 + $0x2e4] sm:$0xf0] }
  0x39   : > { %6969 = vst [vmem:[#allocation17_spill] sm:$0xff] %v5032_v14  ;;  %1495 = vmatpush.bf16.msrb.mxu2 %v5032_v14  ;;  %v5054_v40 = vor.u32 %v4504_v38, %v3962_v37  ;;  %1397 = vmatpush.bf16.msrb.mxu0 %v5043_v33  ;;  %v3498_v2 = vld [vmem:[%s4898_s29 + $0x180] sm:$0xf]  ;;  %v4369_v3 = vld [vmem:[%s4898_s29 + $0x1ac] sm:$0xf0] }
  0x3a   : > { %6970 = vst [vmem:[#allocation18_spill] sm:$0xff] %v5043_v33  ;;  %1544 = vmatpush.bf16.msrb.mxu3 %v5045_v36  ;;  %v4363_v10 = vld [vmem:[%s4898_s29 + $0x184] sm:$0xf]  ;;  %v3500_v25 = vld [vmem:[%s4898_s29 + $0x1b0] sm:$0xf0] }
  0x3b   : > { %6971 = vst [vmem:[#allocation19_spill] sm:$0xff] %v5045_v36  ;;  %1446 = vmatpush.bf16.msrb.mxu1 %v5054_v40  ;;  %v3506_v29 = vld [vmem:[%s4898_s29 + $0x188] sm:$0xf]  ;;  %v4370_v31 = vld [vmem:[%s4898_s29 + $0x1b4] sm:$0xf0] }
  0x3c   : > { %6972 = vst [vmem:[#allocation20_spill] sm:$0xff] %v5054_v40  ;;  %v5071_v37 = vor.u32 %v4370_v31, %v3506_v29  ;;  %v4381_v40 = vld [vmem:[%s4898_s29 + $0x20c] sm:$0xf0]  ;;  %v4375_v36 = vld [vmem:[%s4898_s29 + $0x1e4] sm:$0xf] }
  0x3d   : > { %v3524_v33 = vld [vmem:[%s4898_s29 + $0x210] sm:$0xf0]  ;;  %v3530_v14 = vld [vmem:[%s4898_s29 + $0x1e8] sm:$0xf]  ;;  %v4382_v15 = vld [vmem:[%s4898_s29 + $0x214] sm:$0xf0] }
  0x3e   : > { %6973 = vst [vmem:[#allocation21_spill] sm:$0xff] %v5071_v37  ;;  %v4387_v7 = vld [vmem:[%s4898_s29 + $0x244] sm:$0xf]  ;;  %v3554_v5 = vld [vmem:[%s4898_s29 + $0x248] sm:$0xf] }
  0x3f   : > { %1213 = vmatmul.bf16.gmra.mxu0 %v4935_v16  ;;  %v4394_v62 = vld [vmem:[%s4898_s29 + $0x274] sm:$0xf0]  ;;  %v4388_v41 = vld [vmem:[%s4898_s29 + $0x24c] sm:$0xf]  ;;  %v3556_v0 = vld [vmem:[%s4898_s29 + $0x278] sm:$0xf0] }
  0x40   : > { %1262 = vmatmul.bf16.gmra.mxu1 %v4937_v20 }
  0x41   : > { %1311 = vmatmul.bf16.gmra.mxu2 %v4939_v21  ;;  %v4435_v21 = vld [vmem:[%s6826_s1 + $0xc4] sm:$0xf] }
  0x42   : > { %1360 = vmatmul.bf16.gmra.mxu3 %v4941_v23  ;;  %v4421_v23 = vld [vmem:[%s6826_s1 + $0x54] sm:$0xf] }
  0x4f   : > { %1218 = vmatmul.bf16.gmra.mxu0 %v4955_v48 }
  0x50   : > { %1267 = vmatmul.bf16.gmra.mxu1 %v4957_v49 }
  0x51   : > { %1316 = vmatmul.bf16.gmra.mxu2 %v4959_v50  ;;  %v5069_v50 = vor.u32 %v4363_v10, %v3500_v25  ;;  %v4437_v10 = vld [vmem:[%s6826_s1 + $0xd4] sm:$0xf]  ;;  %v3700_v25 = vld [vmem:[%s6826_s1 + $0xd8] sm:$0xf0] }
  0x52   : > { %1365 = vmatmul.bf16.gmra.mxu3 %v4961_v53  ;;  %v5067_v53 = vor.u32 %v4369_v3, %v3498_v2  ;;  %v3636_v2 = vld [vmem:[%s6826_s1 + $0x58] sm:$0xf0]  ;;  %v4486_v3 = vld [vmem:[%s6826_s1 + $0x254] sm:$0xf0]  ;;  %v5101_v31 = vor.u32 %v4437_v10, %v3700_v25  ;;  %v4500_v10 = vld [vmem:[%s6826_s1 + $0x2c4] sm:$0xf0] }
  0x54   : > { %6977 = vst [vmem:[#allocation25_spill] sm:$0xff] %v5101_v31  ;;  %1545 = vmatpush.bf16.msrb.mxu3 %v5101_v31 }
  0x5f   : > { %1223 = vmatmul.bf16.gmra.mxu0 %v5011_v54 }
  0x60   : > { %1272 = vmatmul.bf16.gmra.mxu1 %v5013_v55 }
  0x61   : > { %1321 = vmatmul.bf16.gmra.mxu2 %v5015_v61  ;;  %v3508_v61 = vld [vmem:[%s4898_s29 + $0x1b8] sm:$0xf0] }
  0x62   : > { %1370 = vmatmul.bf16.gmra.mxu3 %v5017_v1  ;;  %v4364_v1 = vld [vmem:[%s4898_s29 + $0x18c] sm:$0xf] }
  0x63   : > { %v5073_v38 = vor.u32 %v4364_v1, %v3508_v61  ;;  %v3890_v61 = vld [vmem:[%s6826_s1 + $0x250] sm:$0xf]  ;;  %v5088_v1 = vor.u32 %v4421_v23, %v3636_v2  ;;  %v4502_v2 = vld [vmem:[%s6826_s1 + $0x2d4] sm:$0xf0] }
  0x64   : > { %v5099_v29 = vor.u32 %v4486_v3, %v3890_v61  ;;  %v3954_v23 = vld [vmem:[%s6826_s1 + $0x2d0] sm:$0xf]  ;;  %v4484_v61 = vld [vmem:[%s6826_s1 + $0x244] sm:$0xf0]  ;;  %v3946_v3 = vld [vmem:[%s6826_s1 + $0x2c0] sm:$0xf] }
  0x65   : > { %6974 = vst [vmem:[#allocation22_spill] sm:$0xff] %v5073_v38  ;;  %1496 = vmatpush.bf16.msrb.mxu2 %v5088_v1  ;;  %v5138_v31 = vor.u32 %v4500_v10, %v3946_v3  ;;  %v4376_v3 = vld [vmem:[%s4898_s29 + $0x1ec] sm:$0xf]  ;;  %v3532_v10 = vld [vmem:[%s4898_s29 + $0x218] sm:$0xf0] }
  0x66   : > { %6975 = vst [vmem:[#allocation23_spill] sm:$0xff] %v5088_v1  ;;  %1398 = vmatpush.bf16.msrb.mxu0 %v5099_v29  ;;  %v3522_v1 = vld [vmem:[%s4898_s29 + $0x1e0] sm:$0xf] }
  0x67   : > { %6976 = vst [vmem:[#allocation24_spill] sm:$0xff] %v5099_v29 }
  0x68   : > { %6980 = vst [vmem:[#allocation28_spill] sm:$0xff] %v5138_v31 }
  0x6f   : > { %1228 = vmatmul.bf16.gmra.mxu0 %v5067_v53 }
  0x70   : > { %1277 = vmatmul.bf16.gmra.mxu1 %v5069_v50 }
  0x71   : > { %1326 = vmatmul.bf16.gmra.mxu2 %v5071_v37  ;;  %v5113_v37 = vor.u32 %v4502_v2, %v3954_v23  ;;  %v4419_v23 = vld [vmem:[%s6826_s1 + $0x44] sm:$0xf]  ;;  %v3628_v2 = vld [vmem:[%s6826_s1 + $0x48] sm:$0xf0] }
  0x72   : > { %1375 = vmatmul.bf16.gmra.mxu3 %v5073_v38  ;;  %v3882_v38 = vld [vmem:[%s6826_s1 + $0x240] sm:$0xf] }
  0x73   : > { %6978 = vst [vmem:[#allocation26_spill] sm:$0xff] %v5113_v37  ;;  %v5126_v25 = vor.u32 %v4484_v61, %v3882_v38  ;;  %1447 = vmatpush.bf16.msrb.mxu1 %v5113_v37  ;;  %v5140_v38 = vor.u32 %v4419_v23, %v3628_v2  ;;  %v3692_v61 = vld [vmem:[%s6826_s1 + $0xc8] sm:$0xf0]  ;;  %v5159_v23 = vor.u32 %v4381_v40, %v3522_v1  ;;  %v4482_v40 = vld [vmem:[%s6826_s1 + $0x234] sm:$0xf0] }
  0x74   : > { %v5145_v29 = vor.u32 %v4435_v21, %v3692_v61  ;;  %v5161_v21 = vor.u32 %v4375_v36, %v3524_v33  ;;  %v5163_v2 = vor.u32 %v4382_v15, %v3530_v14  ;;  %v5165_v61 = vor.u32 %v4376_v3, %v3532_v10  ;;  %v3938_v15 = vld [vmem:[%s6826_s1 + $0x2b0] sm:$0xf]  ;;  %v4498_v33 = vld [vmem:[%s6826_s1 + $0x2b4] sm:$0xf0]  ;;  %v4417_v36 = vld [vmem:[%s6826_s1 + $0x34] sm:$0xf] }
  0x75   : > { %6979 = vst [vmem:[#allocation27_spill] sm:$0xff] %v5126_v25  ;;  %1497 = vmatpush.bf16.msrb.mxu2 %v5140_v38  ;;  %1399 = vmatpush.bf16.msrb.mxu0 %v5126_v25  ;;  %v3874_v25 = vld [vmem:[%s6826_s1 + $0x230] sm:$0xf]  ;;  %v3620_v1 = vld [vmem:[%s6826_s1 + $0x38] sm:$0xf0]  ;;  %v5191_v3 = vor.u32 %v4498_v33, %v3938_v15 }
  0x76   : > { %6981 = vst [vmem:[#allocation29_spill] sm:$0xff] %v5140_v38  ;;  %1546 = vmatpush.bf16.msrb.mxu3 %v5145_v29  ;;  %v5180_v14 = vor.u32 %v4482_v40, %v3874_v25  ;;  %v5193_v10 = vor.u32 %v4417_v36, %v3620_v1  ;;  %v4433_v25 = vld [vmem:[%s6826_s1 + $0xb4] sm:$0xf]  ;;  %v3684_v40 = vld [vmem:[%s6826_s1 + $0xb8] sm:$0xf0] }
  0x77   : > { %6982 = vst [vmem:[#allocation30_spill] sm:$0xff] %v5145_v29  ;;  %1448 = vmatpush.bf16.msrb.mxu1 %v5138_v31  ;;  %v4480_v15 = vld [vmem:[%s6826_s1 + $0x224] sm:$0xf0]  ;;  %v3930_v33 = vld [vmem:[%s6826_s1 + $0x2a0] sm:$0xf] }
  0x78   : > { %6983 = vst [vmem:[#allocation31_spill] sm:$0xff] %v5163_v2  ;;  %v4496_v36 = vld [vmem:[%s6826_s1 + $0x2a4] sm:$0xf0]  ;;  %v4431_v31 = vld [vmem:[%s6826_s1 + $0xa4] sm:$0xf] }
  0x79   : > { %6984 = vst [vmem:[#allocation32_spill] sm:$0xff] %v5165_v61  ;;  %1400 = vmatpush.bf16.msrb.mxu0 %v5180_v14  ;;  %1498 = vmatpush.bf16.msrb.mxu2 %v5193_v10  ;;  %v3668_v29 = vld [vmem:[%s6826_s1 + $0x98] sm:$0xf0]  ;;  %v3546_v38 = vld [vmem:[%s4898_s29 + $0x240] sm:$0xf] }
  0x7a   : > { %6985 = vst [vmem:[#allocation33_spill] sm:$0xff] %v5180_v14  ;;  %v3612_v14 = vld [vmem:[%s6826_s1 + $0x28] sm:$0xf0]  ;;  %v4393_v37 = vld [vmem:[%s4898_s29 + $0x26c] sm:$0xf0] }
  0x7b   : > { %6986 = vst [vmem:[#allocation34_spill] sm:$0xff] %v5191_v3  ;;  %1449 = vmatpush.bf16.msrb.mxu1 %v5191_v3  ;;  %v5283_v44 = vor.u32 %v4393_v37, %v3546_v38  ;;  %v4492_v37 = vld [vmem:[%s6826_s1 + $0x284] sm:$0xf0]  ;;  %v4411_v38 = vld [vmem:[%s6826_s1 + $0x4] sm:$0xf] }
  0x7c   : > { %6987 = vst [vmem:[#allocation35_spill] sm:$0xff] %v5193_v10 }
  0x7f   : > { %1233 = vmatmul.bf16.gmra.mxu0 %v5159_v23 }
  0x80   : > { %1282 = vmatmul.bf16.gmra.mxu1 %v5161_v21 }
  0x81   : > { %1331 = vmatmul.bf16.gmra.mxu2 %v5163_v2  ;;  %v5205_v2 = vor.u32 %v4433_v25, %v3684_v40  ;;  %v5220_v25 = vor.u32 %v4496_v36, %v3930_v33  ;;  %v4415_v40 = vld [vmem:[%s6826_s1 + $0x24] sm:$0xf]  ;;  %v3858_v33 = vld [vmem:[%s6826_s1 + $0x210] sm:$0xf]  ;;  %v4478_v36 = vld [vmem:[%s6826_s1 + $0x214] sm:$0xf0] }
  0x82   : > { %1380 = vmatmul.bf16.gmra.mxu3 %v5165_v61  ;;  %v3866_v61 = vld [vmem:[%s6826_s1 + $0x220] sm:$0xf]  ;;  %v5255_v10 = vor.u32 %v4478_v36, %v3858_v33 }
  0x83   : > { %6988 = vst [vmem:[#allocation36_spill] sm:$0xff] %v5205_v2  ;;  %v5218_v1 = vor.u32 %v4480_v15, %v3866_v61  ;;  %1547 = vmatpush.bf16.msrb.mxu3 %v5205_v2  ;;  %v5232_v61 = vor.u32 %v4415_v40, %v3612_v14  ;;  %v3676_v15 = vld [vmem:[%s6826_s1 + $0xa8] sm:$0xf0]  ;;  %v3922_v14 = vld [vmem:[%s6826_s1 + $0x290] sm:$0xf]  ;;  %1450 = vmatpush.bf16.msrb.mxu1 %v5220_v25 }
  0x84   : > { %6990 = vst [vmem:[#allocation38_spill] sm:$0xff] %v5220_v25  ;;  %v5243_v3 = vor.u32 %v4431_v31, %v3676_v15  ;;  %v4494_v40 = vld [vmem:[%s6826_s1 + $0x294] sm:$0xf0]  ;;  %v4413_v2 = vld [vmem:[%s6826_s1 + $0x14] sm:$0xf] }
  0x85   : > { %6989 = vst [vmem:[#allocation37_spill] sm:$0xff] %v5218_v1  ;;  %1401 = vmatpush.bf16.msrb.mxu0 %v5218_v1  ;;  %v3604_v31 = vld [vmem:[%s6826_s1 + $0x18] sm:$0xf0]  ;;  %v4429_v15 = vld [vmem:[%s6826_s1 + $0x94] sm:$0xf]  ;;  %1499 = vmatpush.bf16.msrb.mxu2 %v5232_v61  ;;  %v5271_v33 = vor.u32 %v4494_v40, %v3922_v14 }
  0x86   : > { %6991 = vst [vmem:[#allocation39_spill] sm:$0xff] %v5232_v61  ;;  %v5273_v36 = vor.u32 %v4413_v2, %v3604_v31  ;;  %v3548_v1 = vld [vmem:[%s4898_s29 + $0x270] sm:$0xf0]  ;;  %v5279_v42 = vor.u32 %v4429_v15, %v3668_v29  ;;  %v3850_v14 = vld [vmem:[%s6826_s1 + $0x200] sm:$0xf]  ;;  %v5297_v31 = vor.u32 %v4394_v62, %v3554_v5 }
  0x87   : > { %6992 = vst [vmem:[#allocation40_spill] sm:$0xff] %v5243_v3  ;;  %1548 = vmatpush.bf16.msrb.mxu3 %v5243_v3  ;;  %v4476_v2 = vld [vmem:[%s6826_s1 + $0x204] sm:$0xf0]  ;;  %v3914_v40 = vld [vmem:[%s6826_s1 + $0x280] sm:$0xf]  ;;  %v5295_v29 = vor.u32 %v4387_v7, %v3548_v1  ;;  %1451 = vmatpush.bf16.msrb.mxu1 %v5271_v33  ;;  %v5310_v7 = vor.u32 %v4388_v41, %v3556_v0 }
  0x88   : > { %6993 = vst [vmem:[#allocation41_spill] sm:$0xff] %v5255_v10  ;;  %v3596_v15 = vld [vmem:[%s6826_s1 + $0x8] sm:$0xf0]  ;;  %v5313_v62 = vor.u32 %v4476_v2, %v3850_v14  ;;  %v4427_v5 = vld [vmem:[%s6826_s1 + $0x84] sm:$0xf] }
  0x89   : > { %6994 = vst [vmem:[#allocation42_spill] sm:$0xff] %v5271_v33  ;;  %1402 = vmatpush.bf16.msrb.mxu0 %v5255_v10  ;;  %1500 = vmatpush.bf16.msrb.mxu2 %v5273_v36  ;;  %v3660_v1 = vld [vmem:[%s6826_s1 + $0x88] sm:$0xf0]  ;;  %v5321_v33 = vor.u32 %v4492_v37, %v3914_v40  ;;  %v5323_v41 = vor.u32 %v4411_v38, %v3596_v15  ;;  %v3570_v14 = vld [vmem:[%s4898_s29 + $0x2a0] sm:$0xf] }
  0x8a   : > { %6995 = vst [vmem:[#allocation43_spill] sm:$0xff] %v5273_v36  ;;  %v5326_v0 = vor.u32 %v4427_v5, %v3660_v1  ;;  %v4405_v2 = vld [vmem:[%s4898_s29 + $0x2cc] sm:$0xf0]  ;;  %v4399_v40 = vld [vmem:[%s4898_s29 + $0x2a4] sm:$0xf] }
  0x8b   : > { %6996 = vst [vmem:[#allocation44_spill] sm:$0xff] %v5279_v42  ;;  %1549 = vmatpush.bf16.msrb.mxu3 %v5279_v42  ;;  %1452 = vmatpush.bf16.msrb.mxu1 %v5321_v33  ;;  %v3572_v37 = vld [vmem:[%s4898_s29 + $0x2d0] sm:$0xf0]  ;;  %v3578_v38 = vld [vmem:[%s4898_s29 + $0x2a8] sm:$0xf] }
  0x8c   : > { %6997 = vst [vmem:[#allocation45_spill] sm:$0xff] %v5297_v31  ;;  %v4406_v15 = vld [vmem:[%s4898_s29 + $0x2d4] sm:$0xf0]  ;;  %v4400_v5 = vld [vmem:[%s4898_s29 + $0x2ac] sm:$0xf] }
  0x8d   : > { %6998 = vst [vmem:[#allocation46_spill] sm:$0xff] %v5310_v7  ;;  %1403 = vmatpush.bf16.msrb.mxu0 %v5313_v62  ;;  %1501 = vmatpush.bf16.msrb.mxu2 %v5323_v41  ;;  %v3580_v1 = vld [vmem:[%s4898_s29 + $0x2d8] sm:$0xf0]  ;;  %v4329_v25 = vld [vmem:[%s4898_s29 + $0x74] sm:$0xf] }
  0x8e   : > { %6999 = vst [vmem:[#allocation47_spill] sm:$0xff] %v5313_v62  ;;  %v5349_v62 = vor.u32 %v4400_v5, %v3580_v1  ;;  %v3444_v3 = vld [vmem:[%s4898_s29 + $0xa0] sm:$0xf0] }
  0x8f   : > { %7000 = vst [vmem:[#allocation48_spill] sm:$0xff] %v5321_v33  ;;  %1238 = vmatmul.bf16.gmra.mxu0 %v5283_v44  ;;  %1550 = vmatpush.bf16.msrb.mxu3 %v5326_v0  ;;  %v5347_v33 = vor.u32 %v4406_v15, %v3578_v38  ;;  %v3420_v38 = vld [vmem:[%s4898_s29 + $0x40] sm:$0xf0] }
  0x90   : > { %7001 = vst [vmem:[#allocation49_spill] sm:$0xff] %v5323_v41  ;;  %1287 = vmatmul.bf16.gmra.mxu1 %v5295_v29 }
  0x91   : > { %7002 = vst [vmem:[#allocation50_spill] sm:$0xff] %v5326_v0  ;;  %1336 = vmatmul.bf16.gmra.mxu2 %v5297_v31  ;;  %v5345_v31 = vor.u32 %v4399_v40, %v3572_v37  ;;  %v5358_v0 = vld [vmem:[%s6827_s2] sm:$0x3]  ;;  %v4317_v37 = vld [vmem:[%s4898_s29 + $0x14] sm:$0xf] }
  0x92   : > { %1385 = vmatmul.bf16.gmra.mxu3 %v5310_v7  ;;  %v5343_v7 = vor.u32 %v4405_v2, %v3570_v14  ;;  %7003 = vst [vmem:[#allocation51_spill] sm:$0xff] %v5347_v33  ;;  %v3418_v14 = vld [vmem:[%s4898_s29 + $0x10] sm:$0xf]  ;;  %v4323_v2 = vld [vmem:[%s4898_s29 + $0x3c] sm:$0xf0]  ;;  %v5363_v40 = vperm.slane %v5358_v0, 0  ;;  %v5369_v1 = vor.u32 %v4317_v37, %v3420_v38 }
  0x93   : > { %7004 = vst [vmem:[#allocation52_spill] sm:$0xff] %v5349_v62  ;;  %v5367_v15 = vor.u32 %v4323_v2, %v3418_v14 }
  0x94   : > { %7005 = vst [vmem:[#allocation53_spill] sm:$0xff] %v5358_v0 }
  0x95   : > { %7006 = vst [vmem:[#allocation54_spill] sm:$0xff] %v5367_v15 }
  0x96   : > { %7007 = vst [vmem:[#allocation55_spill] sm:$0xff] %v5369_v1 }
  0x9f   : > { %1243 = vmatmul.bf16.gmra.mxu0 %v5343_v7 }
  0xa0   : > { %1292 = vmatmul.bf16.gmra.mxu1 %v5345_v31 }
  0xa1   : > { %1341 = vmatmul.bf16.gmra.mxu2 %v5347_v33 }
  0xa2   : > { %1390 = vmatmul.bf16.gmra.mxu3 %v5349_v62 }
  0xac   : > { %v1209_v5 = vpop.f32.mrf.mxu0 }
  0xad   : > { %v1210_v62 = vadd.f32 %v1209_v5, %v5363_v40  ;;  %v1258_v33 = vpop.f32.mrf.mxu1 }
  0xaf   : > { %v1259_v41 = vadd.f32 %v1258_v33, %v1210_v62  ;;  %1404 = vmatmul.bf16.vlgmr.msrb.gmra.mxu0 %v5367_v15  ;;  %v3442_v33 = vld [vmem:[%s4898_s29 + $0x70] sm:$0xf]  ;;  %v4335_v62 = vld [vmem:[%s4898_s29 + $0x9c] sm:$0xf0]  ;;  %v5385_v15 = vor.u32 %v4329_v25, %v3444_v3 }
  0xb0   : > { %1453 = vmatmul.bf16.vlgmr.msrb.gmra.mxu1 %v5369_v1  ;;  %v5383_v1 = vor.u32 %v4335_v62, %v3442_v33  ;;  %v3466_v33 = vld [vmem:[%s4898_s29 + $0xd0] sm:$0xf]  ;;  %v4347_v62 = vld [vmem:[%s4898_s29 + $0xfc] sm:$0xf0] }
  0xb1   : > { %1502 = vmatmul.bf16.vlgmr.msrb.gmra.mxu2 %v4906_v52  ;;  %7009 = vst [vmem:[#allocation57_spill] sm:$0xff] %v5385_v15 }
  0xb2   : > { %1551 = vmatmul.bf16.vlgmr.msrb.gmra.mxu3 %v4912_v56  ;;  %7008 = vst [vmem:[#allocation56_spill] sm:$0xff] %v5383_v1 }
  0xb4   : > { %v1307_v14 = vpop.f32.mrf.mxu2  ;;  %v1211_v38 = vpop.f32.mrf.mxu0 }
  0xb5   : > { %v1308_v2 = vadd.f32 %v1307_v14, %v1259_v41  ;;  %v1356_v37 = vpop.f32.mrf.mxu3  ;;  %v1212_v10 = vadd.f32 %v1211_v38, %v5363_v40  ;;  %v1260_v5 = vpop.f32.mrf.mxu1 }
  0xb7   : > { %v5377_v42 = vadd.f32 %v1356_v37, %v1308_v2  ;;  %v1261_v36 = vadd.f32 %v1260_v5, %v1212_v10 }
  0xbc   : > { %v1309_v61 = vpop.f32.mrf.mxu2  ;;  %v1214_v56 = vpop.f32.mrf.mxu0 }
  0xbd   : > { %v1310_v52 = vadd.f32 %v1309_v61, %v1261_v36  ;;  %v1358_v0 = vpop.f32.mrf.mxu3  ;;  %v1215_v41 = vadd.f32 %v1214_v56, %v5363_v40  ;;  %v1263_v14 = vpop.f32.mrf.mxu1  ;;  %v3468_v56 = vld [vmem:[%s4898_s29 + $0x100] sm:$0xf0] }
  0xbf   : > { %v5388_v2 = vadd.f32 %v1358_v0, %v1310_v52  ;;  %v1264_v10 = vadd.f32 %v1263_v14, %v1215_v41  ;;  %1409 = vmatmul.bf16.gmra.mxu0 %v5383_v1  ;;  %v4341_v52 = vld [vmem:[%s4898_s29 + $0xd4] sm:$0xf]  ;;  %v5401_v14 = vor.u32 %v4347_v62, %v3466_v33 }
  0xc0   : > { %1458 = vmatmul.bf16.gmra.mxu1 %v5385_v15  ;;  %v5403_v1 = vor.u32 %v4341_v52, %v3468_v56  ;;  %v4457_v56 = vld [vmem:[%s6826_s1 + $0x174] sm:$0xf] }
  0xc1   : > { %1507 = vmatmul.bf16.gmra.mxu2 %v4935_v16  ;;  %7010 = vst [vmem:[#allocation58_spill] sm:$0xff] %v5401_v14 }
  0xc2   : > { %1556 = vmatmul.bf16.gmra.mxu3 %v4937_v20  ;;  %7011 = vst [vmem:[#allocation59_spill] sm:$0xff] %v5403_v1 }
  0xc4   : > { %v1312_v3 = vpop.f32.mrf.mxu2  ;;  %v1216_v36 = vpop.f32.mrf.mxu0 }
  0xc5   : > { %v1313_v25 = vadd.f32 %v1312_v3, %v1264_v10  ;;  %v1361_v61 = vpop.f32.mrf.mxu3  ;;  %v1217_v37 = vadd.f32 %v1216_v36, %v5363_v40  ;;  %v1265_v38 = vpop.f32.mrf.mxu1 }
  0xc7   : > { %v5395_v0 = vadd.f32 %v1361_v61, %v1313_v25  ;;  %v1266_v5 = vadd.f32 %v1265_v38, %v1217_v37  ;;  %v4489_v61 = vld [vmem:[%s6826_s1 + $0x274] sm:$0xf]  ;;  %v3908_v37 = vld [vmem:[%s6826_s1 + $0x278] sm:$0xf0] }
  0xc8   : > { %v5418_v38 = vor.u32 %v4489_v61, %v3908_v37  ;;  %v3844_v61 = vld [vmem:[%s6826_s1 + $0x1f8] sm:$0xf0]  ;;  %v3490_v37 = vld [vmem:[%s4898_s29 + $0x130] sm:$0xf] }
  0xca   : > { %7012 = vst [vmem:[#allocation60_spill] sm:$0xff] %v5418_v38  ;;  %1690 = vmatpush.bf16.msra.mxu2 %v5418_v38 }
  0xcc   : > { %v1314_v41 = vpop.f32.mrf.mxu2  ;;  %v1219_v20 = vpop.f32.mrf.mxu0 }
  0xcd   : > { %v1315_v16 = vadd.f32 %v1314_v41, %v1266_v5  ;;  %v1363_v15 = vpop.f32.mrf.mxu3  ;;  %v1220_v10 = vadd.f32 %v1219_v20, %v5363_v40  ;;  %v1268_v3 = vpop.f32.mrf.mxu1  ;;  %v3780_v41 = vld [vmem:[%s6826_s1 + $0x178] sm:$0xf0] }
  0xcf   : > { %v5406_v36 = vadd.f32 %v1363_v15, %v1315_v16  ;;  %v1269_v25 = vadd.f32 %v1268_v3, %v1220_v10  ;;  %1414 = vmatmul.bf16.gmra.mxu0 %v5401_v14  ;;  %v4505_v16 = vld [vmem:[%s6826_s1 + $0x2f4] sm:$0xf]  ;;  %v5433_v10 = vor.u32 %v4457_v56, %v3780_v41  ;;  %v3972_v3 = vld [vmem:[%s6826_s1 + $0x2f8] sm:$0xf0] }
  0xd0   : > { %1463 = vmatmul.bf16.gmra.mxu1 %v5403_v1 }
  0xd1   : > { %1512 = vmatmul.bf16.gmra.mxu2 %v4955_v48  ;;  %7013 = vst [vmem:[#allocation61_spill] sm:$0xff] %v5433_v10  ;;  %1592 = vmatpush.bf16.msra.mxu0 %v5433_v10 }
  0xd2   : > { %1561 = vmatmul.bf16.gmra.mxu3 %v4957_v49 }
  0xd4   : > { %v1317_v15 = vpop.f32.mrf.mxu2  ;;  %v1221_v62 = vpop.f32.mrf.mxu0 }
  0xd5   : > { %v1318_v5 = vadd.f32 %v1317_v15, %v1269_v25  ;;  %v1366_v33 = vpop.f32.mrf.mxu3  ;;  %v1222_v48 = vadd.f32 %v1221_v62, %v5363_v40  ;;  %v1270_v49 = vpop.f32.mrf.mxu1  ;;  %v4473_v25 = vld [vmem:[%s6826_s1 + $0x1f4] sm:$0xf]  ;;  %v4359_v15 = vld [vmem:[%s4898_s29 + $0x15c] sm:$0xf0] }
  0xd6   : > { %v4353_v62 = vld [vmem:[%s4898_s29 + $0x134] sm:$0xf]  ;;  %v5455_v56 = vor.u32 %v4359_v15, %v3490_v37 }
  0xd7   : > { %v5422_v52 = vadd.f32 %v1366_v33, %v1318_v5  ;;  %v1271_v20 = vadd.f32 %v1270_v49, %v1222_v48  ;;  %v5446_v5 = vor.u32 %v4505_v16, %v3972_v3  ;;  %v5448_v33 = vor.u32 %v4473_v25, %v3844_v61  ;;  %v3492_v48 = vld [vmem:[%s4898_s29 + $0x160] sm:$0xf0] }
  0xd8   : > { %7016 = vst [vmem:[#allocation64_spill] sm:$0xff] %v5455_v56  ;;  %v5457_v14 = vor.u32 %v4353_v62, %v3492_v48 }
  0xd9   : > { %7014 = vst [vmem:[#allocation62_spill] sm:$0xff] %v5446_v5  ;;  %1739 = vmatpush.bf16.msra.mxu3 %v5446_v5  ;;  %1641 = vmatpush.bf16.msra.mxu1 %v5448_v33 }
  0xda   : > { %7015 = vst [vmem:[#allocation63_spill] sm:$0xff] %v5448_v33 }
  0xdb   : > { %7017 = vst [vmem:[#allocation65_spill] sm:$0xff] %v5457_v14 }
  0xdc   : > { %v1319_v49 = vpop.f32.mrf.mxu2  ;;  %v1224_v1 = vpop.f32.mrf.mxu0 }
  0xdd   : > { %v1320_v41 = vadd.f32 %v1319_v49, %v1271_v20  ;;  %v1368_v38 = vpop.f32.mrf.mxu3  ;;  %v1225_v16 = vadd.f32 %v1224_v1, %v5363_v40  ;;  %v1273_v3 = vpop.f32.mrf.mxu1  ;;  %v4487_v20 = vld [vmem:[%s6826_s1 + $0x264] sm:$0xf]  ;;  %v3900_v1 = vld [vmem:[%s6826_s1 + $0x268] sm:$0xf0] }
  0xde   : > { %v5472_v37 = vor.u32 %v4487_v20, %v3900_v1  ;;  %v3964_v1 = vld [vmem:[%s6826_s1 + $0x2e8] sm:$0xf0] }
  0xdf   : > { %v5460_v25 = vadd.f32 %v1368_v38, %v1320_v41  ;;  %v1274_v61 = vadd.f32 %v1273_v3, %v1225_v16  ;;  %1419 = vmatmul.bf16.gmra.mxu0 %v5455_v56  ;;  %v4455_v41 = vld [vmem:[%s6826_s1 + $0x164] sm:$0xf]  ;;  %v3772_v16 = vld [vmem:[%s6826_s1 + $0x168] sm:$0xf0] }
  0xe0   : > { %1468 = vmatmul.bf16.gmra.mxu1 %v5457_v14  ;;  %7018 = vst [vmem:[#allocation66_spill] sm:$0xff] %v5472_v37  ;;  %1691 = vmatpush.bf16.msra.mxu2 %v5472_v37  ;;  %v4503_v3 = vld [vmem:[%s6826_s1 + $0x2e4] sm:$0xf]  ;;  %v5487_v20 = vor.u32 %v4455_v41, %v3772_v16 }
  0xe1   : > { %1517 = vmatmul.bf16.gmra.mxu2 %v5011_v54  ;;  %v5500_v37 = vor.u32 %v4503_v3, %v3964_v1 }
  0xe2   : > { %1566 = vmatmul.bf16.gmra.mxu3 %v5013_v55  ;;  %7019 = vst [vmem:[#allocation67_spill] sm:$0xff] %v5487_v20  ;;  %1593 = vmatpush.bf16.msra.mxu0 %v5487_v20  ;;  %v3884_v20 = vld [vmem:[%s6826_s1 + $0x248] sm:$0xf0] }
  0xe3   : > { %7020 = vst [vmem:[#allocation68_spill] sm:$0xff] %v5500_v37  ;;  %1740 = vmatpush.bf16.msra.mxu3 %v5500_v37  ;;  %v4451_v37 = vld [vmem:[%s6826_s1 + $0x144] sm:$0xf] }
  0xe4   : > { %v1322_v38 = vpop.f32.mrf.mxu2  ;;  %v1226_v48 = vpop.f32.mrf.mxu0 }
  0xe5   : > { %v1323_v15 = vadd.f32 %v1322_v38, %v1274_v61  ;;  %v1371_v62 = vpop.f32.mrf.mxu3  ;;  %v1227_v54 = vadd.f32 %v1226_v48, %v5363_v40  ;;  %v1275_v55 = vpop.f32.mrf.mxu1  ;;  %v4471_v38 = vld [vmem:[%s6826_s1 + $0x1e4] sm:$0xf]  ;;  %v4371_v48 = vld [vmem:[%s4898_s29 + $0x1bc] sm:$0xf0] }
  0xe7   : > { %v5476_v49 = vadd.f32 %v1371_v62, %v1323_v15  ;;  %v1276_v61 = vadd.f32 %v1275_v55, %v1227_v54  ;;  %v3836_v15 = vld [vmem:[%s6826_s1 + $0x1e8] sm:$0xf0]  ;;  %v3514_v62 = vld [vmem:[%s4898_s29 + $0x190] sm:$0xf]  ;;  %v4365_v54 = vld [vmem:[%s4898_s29 + $0x194] sm:$0xf] }
  0xe8   : > { %v5502_v33 = vor.u32 %v4471_v38, %v3836_v15  ;;  %v3516_v55 = vld [vmem:[%s4898_s29 + $0x1c0] sm:$0xf0]  ;;  %v5509_v16 = vor.u32 %v4371_v48, %v3514_v62 }
  0xe9   : > { %v5511_v56 = vor.u32 %v4365_v54, %v3516_v55 }
  0xea   : > { %7021 = vst [vmem:[#allocation69_spill] sm:$0xff] %v5502_v33  ;;  %1642 = vmatpush.bf16.msra.mxu1 %v5502_v33 }
  0xeb   : > { %7022 = vst [vmem:[#allocation70_spill] sm:$0xff] %v5509_v16 }
  0xec   : > { %v1324_v41 = vpop.f32.mrf.mxu2  ;;  %v1229_v14 = vpop.f32.mrf.mxu0  ;;  %7023 = vst [vmem:[#allocation71_spill] sm:$0xff] %v5511_v56 }
  0xed   : > { %v1325_v5 = vadd.f32 %v1324_v41, %v1276_v61  ;;  %v1373_v10 = vpop.f32.mrf.mxu3  ;;  %v1230_v3 = vadd.f32 %v1229_v14, %v5363_v40  ;;  %v1278_v1 = vpop.f32.mrf.mxu1  ;;  %v4485_v61 = vld [vmem:[%s6826_s1 + $0x254] sm:$0xf]  ;;  %v3892_v14 = vld [vmem:[%s6826_s1 + $0x258] sm:$0xf0] }
  0xee   : > { %v5526_v62 = vor.u32 %v4485_v61, %v3892_v14  ;;  %v4453_v41 = vld [vmem:[%s6826_s1 + $0x154] sm:$0xf]  ;;  %v3956_v14 = vld [vmem:[%s6826_s1 + $0x2d8] sm:$0xf0] }
  0xef   : > { %v5514_v38 = vadd.f32 %v1373_v10, %v1325_v5  ;;  %v1279_v15 = vadd.f32 %v1278_v1, %v1230_v3  ;;  %1424 = vmatmul.bf16.gmra.mxu0 %v5509_v16  ;;  %v3764_v3 = vld [vmem:[%s6826_s1 + $0x158] sm:$0xf0]  ;;  %v4501_v1 = vld [vmem:[%s6826_s1 + $0x2d4] sm:$0xf] }
  0xf0   : > { %1473 = vmatmul.bf16.gmra.mxu1 %v5511_v56  ;;  %7024 = vst [vmem:[#allocation72_spill] sm:$0xff] %v5526_v62  ;;  %1692 = vmatpush.bf16.msra.mxu2 %v5526_v62  ;;  %v5541_v61 = vor.u32 %v4453_v41, %v3764_v3  ;;  %v5554_v62 = vor.u32 %v4501_v1, %v3956_v14  ;;  %v3756_v1 = vld [vmem:[%s6826_s1 + $0x148] sm:$0xf0]  ;;  %v4467_v14 = vld [vmem:[%s6826_s1 + $0x1c4] sm:$0xf] }
  0xf1   : > { %1522 = vmatmul.bf16.gmra.mxu2 %v5067_v53 }
  0xf2   : > { %1571 = vmatmul.bf16.gmra.mxu3 %v5069_v50  ;;  %7025 = vst [vmem:[#allocation73_spill] sm:$0xff] %v5541_v61  ;;  %1594 = vmatpush.bf16.msra.mxu0 %v5541_v61 }
  0xf3   : > { %7026 = vst [vmem:[#allocation74_spill] sm:$0xff] %v5554_v62  ;;  %1741 = vmatpush.bf16.msra.mxu3 %v5554_v62 }
  0xf4   : > { %v1327_v10 = vpop.f32.mrf.mxu2  ;;  %v1231_v54 = vpop.f32.mrf.mxu0 }
  0xf5   : > { %v1328_v5 = vadd.f32 %v1327_v10, %v1279_v15  ;;  %v1376_v48 = vpop.f32.mrf.mxu3  ;;  %v1232_v50 = vadd.f32 %v1231_v54, %v5363_v40  ;;  %v1280_v53 = vpop.f32.mrf.mxu1  ;;  %v4469_v10 = vld [vmem:[%s6826_s1 + $0x1d4] sm:$0xf]  ;;  %v4383_v54 = vld [vmem:[%s4898_s29 + $0x21c] sm:$0xf0] }
  0xf7   : > { %v5530_v55 = vadd.f32 %v1376_v48, %v1328_v5  ;;  %v1281_v15 = vadd.f32 %v1280_v53, %v1232_v50  ;;  %v3828_v5 = vld [vmem:[%s6826_s1 + $0x1d8] sm:$0xf0]  ;;  %v3538_v48 = vld [vmem:[%s4898_s29 + $0x1f0] sm:$0xf]  ;;  %v4377_v50 = vld [vmem:[%s4898_s29 + $0x1f4] sm:$0xf] }
  0xf8   : > { %v5556_v33 = vor.u32 %v4469_v10, %v3828_v5  ;;  %v3540_v53 = vld [vmem:[%s4898_s29 + $0x220] sm:$0xf0]  ;;  %v5563_v3 = vor.u32 %v4383_v54, %v3538_v48  ;;  %v3820_v48 = vld [vmem:[%s6826_s1 + $0x1c8] sm:$0xf0] }
  0xf9   : > { %v5574_v61 = vor.u32 %v4377_v50, %v3540_v53  ;;  %v4483_v54 = vld [vmem:[%s6826_s1 + $0x244] sm:$0xf]  ;;  %v5588_v56 = vor.u32 %v4467_v14, %v3820_v48  ;;  %v3948_v53 = vld [vmem:[%s6826_s1 + $0x2c8] sm:$0xf0]  ;;  %v3748_v14 = vld [vmem:[%s6826_s1 + $0x138] sm:$0xf0] }
  0xfa   : > { %7027 = vst [vmem:[#allocation75_spill] sm:$0xff] %v5556_v33  ;;  %1643 = vmatpush.bf16.msra.mxu1 %v5556_v33  ;;  %v5576_v33 = vor.u32 %v4451_v37, %v3756_v1  ;;  %v5590_v50 = vor.u32 %v4483_v54, %v3884_v20  ;;  %v4499_v37 = vld [vmem:[%s6826_s1 + $0x2c4] sm:$0xf]  ;;  %v4449_v20 = vld [vmem:[%s6826_s1 + $0x134] sm:$0xf] }
  0xfb   : > { %7028 = vst [vmem:[#allocation76_spill] sm:$0xff] %v5563_v3  ;;  %v5601_v16 = vor.u32 %v4499_v37, %v3948_v53  ;;  %v3812_v48 = vld [vmem:[%s6826_s1 + $0x1b8] sm:$0xf0]  ;;  %v4481_v54 = vld [vmem:[%s6826_s1 + $0x234] sm:$0xf] }
  0xfc   : > { %v1329_v41 = vpop.f32.mrf.mxu2  ;;  %v1234_v62 = vpop.f32.mrf.mxu0  ;;  %7029 = vst [vmem:[#allocation77_spill] sm:$0xff] %v5574_v61  ;;  %1595 = vmatpush.bf16.msra.mxu0 %v5576_v33  ;;  %1693 = vmatpush.bf16.msra.mxu2 %v5590_v50  ;;  %v3940_v37 = vld [vmem:[%s6826_s1 + $0x2b8] sm:$0xf0] }
  0xfd   : > { %v1330_v10 = vadd.f32 %v1329_v41, %v1281_v15  ;;  %v1378_v5 = vpop.f32.mrf.mxu3  ;;  %7030 = vst [vmem:[#allocation78_spill] sm:$0xff] %v5576_v33  ;;  %v1235_v15 = vadd.f32 %v1234_v62, %v5363_v40  ;;  %v1283_v41 = vpop.f32.mrf.mxu1  ;;  %1742 = vmatpush.bf16.msra.mxu3 %v5601_v16  ;;  %v3932_v33 = vld [vmem:[%s6826_s1 + $0x2a8] sm:$0xf0] }
  0xfe   : > { %7031 = vst [vmem:[#allocation79_spill] sm:$0xff] %v5588_v56  ;;  %1644 = vmatpush.bf16.msra.mxu1 %v5588_v56  ;;  %v3868_v56 = vld [vmem:[%s6826_s1 + $0x228] sm:$0xf0] }
  0xff   : > { %7032 = vst [vmem:[#allocation80_spill] sm:$0xff] %v5590_v50  ;;  %v5598_v1 = vadd.f32 %v1378_v5, %v1330_v10  ;;  %v1284_v62 = vadd.f32 %v1283_v41, %v1235_v15  ;;  %1429 = vmatmul.bf16.gmra.mxu0 %v5563_v3  ;;  %v5613_v10 = vor.u32 %v4449_v20, %v3748_v14  ;;  %v4465_v5 = vld [vmem:[%s6826_s1 + $0x1b4] sm:$0xf]  ;;  %v4447_v14 = vld [vmem:[%s6826_s1 + $0x124] sm:$0xf] }
 0x100   : > { %7033 = vst [vmem:[#allocation81_spill] sm:$0xff] %v5601_v16  ;;  %1478 = vmatmul.bf16.gmra.mxu1 %v5574_v61  ;;  %v5626_v15 = vor.u32 %v4465_v5, %v3812_v48  ;;  %v4497_v41 = vld [vmem:[%s6826_s1 + $0x2b4] sm:$0xf]  ;;  %v3740_v5 = vld [vmem:[%s6826_s1 + $0x128] sm:$0xf0] }
 0x101   : > { %1527 = vmatmul.bf16.gmra.mxu2 %v5159_v23  ;;  %7034 = vst [vmem:[#allocation82_spill] sm:$0xff] %v5613_v10  ;;  %v3876_v23 = vld [vmem:[%s6826_s1 + $0x238] sm:$0xf0]  ;;  %1596 = vmatpush.bf16.msra.mxu0 %v5613_v10  ;;  %v5641_v53 = vor.u32 %v4497_v41, %v3940_v37  ;;  %v4463_v48 = vld [vmem:[%s6826_s1 + $0x1a4] sm:$0xf]  ;;  %v5653_v37 = vor.u32 %v4447_v14, %v3740_v5 }
 0x102   : > { %1576 = vmatmul.bf16.gmra.mxu3 %v5161_v21  ;;  %7035 = vst [vmem:[#allocation83_spill] sm:$0xff] %v5626_v15  ;;  %v5639_v21 = vor.u32 %v4481_v54, %v3876_v23  ;;  %1645 = vmatpush.bf16.msra.mxu1 %v5626_v15  ;;  %v3804_v15 = vld [vmem:[%s6826_s1 + $0x1a8] sm:$0xf0]  ;;  %v4479_v10 = vld [vmem:[%s6826_s1 + $0x224] sm:$0xf] }
 0x103   : > { %7037 = vst [vmem:[#allocation85_spill] sm:$0xff] %v5641_v53  ;;  %v5666_v14 = vor.u32 %v4463_v48, %v3804_v15  ;;  %v5668_v5 = vor.u32 %v4479_v10, %v3868_v56  ;;  %v4495_v16 = vld [vmem:[%s6826_s1 + $0x2a4] sm:$0xf]  ;;  %v3562_v61 = vld [vmem:[%s4898_s29 + $0x250] sm:$0xf]  ;;  %1743 = vmatpush.bf16.msra.mxu3 %v5641_v53 }
 0x104   : > { %7036 = vst [vmem:[#allocation84_spill] sm:$0xff] %v5639_v21  ;;  %v1332_v20 = vpop.f32.mrf.mxu2  ;;  %v1236_v41 = vpop.f32.mrf.mxu0  ;;  %1694 = vmatpush.bf16.msra.mxu2 %v5639_v21  ;;  %v5682_v15 = vor.u32 %v4495_v16, %v3932_v33  ;;  %v4389_v10 = vld [vmem:[%s4898_s29 + $0x254] sm:$0xf]  ;;  %v3796_v33 = vld [vmem:[%s6826_s1 + $0x198] sm:$0xf0] }
 0x105   : > { %v1333_v54 = vadd.f32 %v1332_v20, %v1284_v62  ;;  %v1381_v23 = vpop.f32.mrf.mxu3  ;;  %7038 = vst [vmem:[#allocation86_spill] sm:$0xff] %v5653_v37  ;;  %v1237_v62 = vadd.f32 %v1236_v41, %v5363_v40  ;;  %v1285_v20 = vpop.f32.mrf.mxu1  ;;  %v4395_v41 = vld [vmem:[%s4898_s29 + $0x27c] sm:$0xf0]  ;;  %1597 = vmatpush.bf16.msra.mxu0 %v5653_v37  ;;  %v4445_v48 = vld [vmem:[%s6826_s1 + $0x114] sm:$0xf] }
 0x106   : > { %7039 = vst [vmem:[#allocation87_spill] sm:$0xff] %v5666_v14  ;;  %1646 = vmatpush.bf16.msra.mxu1 %v5666_v14  ;;  %v4477_v16 = vld [vmem:[%s6826_s1 + $0x214] sm:$0xf] }
 0x107   : > { %7040 = vst [vmem:[#allocation88_spill] sm:$0xff] %v5668_v5  ;;  %v5676_v50 = vadd.f32 %v1381_v23, %v1333_v54  ;;  %v1286_v56 = vadd.f32 %v1285_v20, %v1237_v62  ;;  %v3732_v54 = vld [vmem:[%s6826_s1 + $0x118] sm:$0xf0]  ;;  %v4461_v23 = vld [vmem:[%s6826_s1 + $0x194] sm:$0xf]  ;;  %1744 = vmatpush.bf16.msra.mxu3 %v5682_v15 }
 0x108   : > { %7042 = vst [vmem:[#allocation90_spill] sm:$0xff] %v5682_v15  ;;  %v5695_v53 = vor.u32 %v4445_v48, %v3732_v54  ;;  %v3860_v62 = vld [vmem:[%s6826_s1 + $0x218] sm:$0xf0]  ;;  %v3564_v20 = vld [vmem:[%s4898_s29 + $0x280] sm:$0xf0]  ;;  %1695 = vmatpush.bf16.msra.mxu2 %v5668_v5  ;;  %v5708_v14 = vor.u32 %v4461_v23, %v3796_v33  ;;  %v5722_v5 = vor.u32 %v4395_v41, %v3562_v61 }
 0x109   : > { %7041 = vst [vmem:[#allocation89_spill] sm:$0xff] %v5676_v50  ;;  %v5710_v37 = vor.u32 %v4477_v16, %v3860_v62  ;;  %v4493_v48 = vld [vmem:[%s6826_s1 + $0x294] sm:$0xf]  ;;  %v3924_v54 = vld [vmem:[%s6826_s1 + $0x298] sm:$0xf0] }
 0x10a   : > { %7043 = vst [vmem:[#allocation91_spill] sm:$0xff] %v5695_v53  ;;  %1598 = vmatpush.bf16.msra.mxu0 %v5695_v53  ;;  %v5720_v21 = vor.u32 %v4493_v48, %v3924_v54  ;;  %1647 = vmatpush.bf16.msra.mxu1 %v5708_v14  ;;  %v4443_v23 = vld [vmem:[%s6826_s1 + $0x104] sm:$0xf]  ;;  %v3724_v33 = vld [vmem:[%s6826_s1 + $0x108] sm:$0xf0]  ;;  %v5734_v53 = vor.u32 %v4389_v10, %v3564_v20 }
 0x10b   : > { %7044 = vst [vmem:[#allocation92_spill] sm:$0xff] %v5708_v14  ;;  %v4459_v16 = vld [vmem:[%s6826_s1 + $0x184] sm:$0xf]  ;;  %v5736_v61 = vor.u32 %v4443_v23, %v3724_v33  ;;  %v3788_v41 = vld [vmem:[%s6826_s1 + $0x188] sm:$0xf0] }
 0x10c   : > { %v1334_v3 = vpop.f32.mrf.mxu2  ;;  %v1239_v54 = vpop.f32.mrf.mxu0  ;;  %v4475_v14 = vld [vmem:[%s6826_s1 + $0x204] sm:$0xf]  ;;  %v3852_v15 = vld [vmem:[%s6826_s1 + $0x208] sm:$0xf0]  ;;  %1696 = vmatpush.bf16.msra.mxu2 %v5710_v37  ;;  %v5749_v10 = vor.u32 %v4459_v16, %v3788_v41  ;;  %1745 = vmatpush.bf16.msra.mxu3 %v5720_v21 }
 0x10d   : > { %v1335_v62 = vadd.f32 %v1334_v3, %v1286_v56  ;;  %v1383_v48 = vpop.f32.mrf.mxu3  ;;  %v1240_v3 = vadd.f32 %v1239_v54, %v5363_v40  ;;  %v1288_v56 = vpop.f32.mrf.mxu1  ;;  %v5751_v20 = vor.u32 %v4475_v14, %v3852_v15  ;;  %v4491_v23 = vld [vmem:[%s6826_s1 + $0x284] sm:$0xf]  ;;  %v3916_v33 = vld [vmem:[%s6826_s1 + $0x288] sm:$0xf0] }
 0x10e   : > { %1599 = vmatpush.bf16.msra.mxu0 %v5736_v61  ;;  %v5763_v54 = vor.u32 %v4491_v23, %v3916_v33  ;;  %1648 = vmatpush.bf16.msra.mxu1 %v5749_v10 }
 0x10f   : > { %v5759_v50 = vadd.f32 %v1383_v48, %v1335_v62  ;;  %v1289_v16 = vadd.f32 %v1288_v56, %v1240_v3  ;;  %1434 = vmatmul.bf16.gmra.mxu0 %v5722_v5  ;;  %v4401_v3 = vld [vmem:[%s4898_s29 + $0x2b4] sm:$0xf]  ;;  %v3588_v56 = vld [vmem:[%s4898_s29 + $0x2e0] sm:$0xf0] }
 0x110   : > { %1483 = vmatmul.bf16.gmra.mxu1 %v5734_v53  ;;  %1697 = vmatpush.bf16.msra.mxu2 %v5751_v20 }
 0x111   : > { %1532 = vmatmul.bf16.gmra.mxu2 %v5283_v44  ;;  %1746 = vmatpush.bf16.msra.mxu3 %v5763_v54 }
 0x112   : > { %1581 = vmatmul.bf16.gmra.mxu3 %v5295_v29  ;;  %2028 = vmatpush.bf16.msrb.mxu0 %v4622_v4  ;;  %v3586_v4 = vld [vmem:[%s4898_s29 + $0x2b0] sm:$0xf] }
 0x113   : > { %2077 = vmatpush.bf16.msrb.mxu1 %v4633_v8 }
 0x114   : > { %2126 = vmatpush.bf16.msrb.mxu2 %v4635_v9  ;;  %v1337_v14 = vpop.f32.mrf.mxu2  ;;  %v1241_v44 = vpop.f32.mrf.mxu0 }
 0x115   : > { %2175 = vmatpush.bf16.msrb.mxu3 %v4647_v13  ;;  %v1338_v15 = vadd.f32 %v1337_v14, %v1289_v16  ;;  %v1386_v62 = vpop.f32.mrf.mxu3  ;;  %v1242_v29 = vadd.f32 %v1241_v44, %v5363_v40  ;;  %v1290_v48 = vpop.f32.mrf.mxu1  ;;  %v4407_v13 = vld [vmem:[%s4898_s29 + $0x2dc] sm:$0xf0]  ;;  %v5792_v16 = vor.u32 %v4401_v3, %v3588_v56  ;;  %v7051_v44 = vld [vmem:[#allocation4_spill] sm:$0xff] }
 0x116   : > { %2029 = vmatpush.bf16.msrb.mxu0 %v4660_v17  ;;  %v5788_v23 = vor.u32 %v4407_v13, %v3586_v4  ;;  %v7055_v13 = vld [vmem:[#allocation14_spill] sm:$0xff] }
 0x117   : > { %v5777_v41 = vadd.f32 %v1386_v62, %v1338_v15  ;;  %v1291_v9 = vadd.f32 %v1290_v48, %v1242_v29  ;;  %2078 = vmatpush.bf16.msrb.mxu1 %v4662_v18  ;;  %v7049_v62 = vld [vmem:[#allocation55_spill] sm:$0xff]  ;;  %v7053_v29 = vld [vmem:[#allocation12_spill] sm:$0xff] }
 0x118   : > { %2127 = vmatpush.bf16.msrb.mxu2 %v4674_v22 }
 0x119   : > { %2176 = vmatpush.bf16.msrb.mxu3 %v4685_v26 }
 0x11a   : > { %2030 = vmatpush.bf16.msrb.mxu0 %v4697_v30 }
 0x11b   : > { %2079 = vmatpush.bf16.msrb.mxu1 %v4710_v34 }
 0x11c   : > { %2128 = vmatpush.bf16.msrb.mxu2 %v4712_v35  ;;  %v1339_v8 = vpop.f32.mrf.mxu2  ;;  %v1244_v17 = vpop.f32.mrf.mxu0 }
 0x11d   : > { %2177 = vmatpush.bf16.msrb.mxu3 %v4724_v39  ;;  %v1340_v22 = vadd.f32 %v1339_v8, %v1291_v9  ;;  %v1388_v33 = vpop.f32.mrf.mxu3  ;;  %v1245_v18 = vadd.f32 %v1244_v17, %v5363_v40  ;;  %v1293_v26 = vpop.f32.mrf.mxu1 }
 0x11e   : > { %2031 = vmatpush.bf16.msrb.mxu0 %v4742_v45 }
 0x11f   : > { %v5796_v14 = vadd.f32 %v1388_v33, %v1340_v22  ;;  %v1294_v35 = vadd.f32 %v1293_v26, %v1245_v18  ;;  %1439 = vmatmul.bf16.gmra.mxu0 %v5788_v23  ;;  %2080 = vmatpush.bf16.msrb.mxu1 %v4746_v46  ;;  %v7056_v22 = vld [vmem:[#allocation17_spill] sm:$0xff]  ;;  %v7057_v18 = vld [vmem:[#allocation18_spill] sm:$0xff]  ;;  %v7058_v26 = vld [vmem:[#allocation19_spill] sm:$0xff] }
 0x120   : > { %2129 = vmatpush.bf16.msrb.mxu2 %v4748_v47  ;;  %1488 = vmatmul.bf16.gmra.mxu1 %v5792_v16 }
 0x121   : > { %2178 = vmatpush.bf16.msrb.mxu3 %v4760_v51  ;;  %1537 = vmatmul.bf16.gmra.mxu2 %v5343_v7 }
 0x122   : > { %1586 = vmatmul.bf16.gmra.mxu3 %v5345_v31  ;;  %2032 = vmatpush.bf16.msrb.mxu0 %v4778_v57 }
 0x123   : > { %2081 = vmatpush.bf16.msrb.mxu1 %v4782_v58 }
 0x124   : > { %2130 = vmatpush.bf16.msrb.mxu2 %v4784_v59  ;;  %v1342_v30 = vpop.f32.mrf.mxu2  ;;  %v1246_v47 = vpop.f32.mrf.mxu0 }
 0x125   : > { %2179 = vmatpush.bf16.msrb.mxu3 %v4796_v63  ;;  %v1343_v34 = vadd.f32 %v1342_v30, %v1294_v35  ;;  %v1391_v39 = vpop.f32.mrf.mxu3  ;;  %v1247_v51 = vadd.f32 %v1246_v47, %v5363_v40  ;;  %v1295_v15 = vpop.f32.mrf.mxu1  ;;  %v7059_v35 = vld [vmem:[#allocation20_spill] sm:$0xff] }
 0x126   : > { %2033 = vmatpush.bf16.msrb.mxu0 %v4814_v6 }
 0x127   : > { %v5810_v7 = vadd.f32 %v1391_v39, %v1343_v34  ;;  %v1296_v45 = vadd.f32 %v1295_v15, %v1247_v51  ;;  %2082 = vmatpush.bf16.msrb.mxu1 %v4824_v11  ;;  %v7045_v11 = vld [vmem:[#allocation5_spill] sm:$0xff]  ;;  %v7060_v34 = vld [vmem:[#allocation23_spill] sm:$0xff]  ;;  %v7063_v51 = vld [vmem:[#allocation24_spill] sm:$0xff] }
 0x128   : > { %2131 = vmatpush.bf16.msrb.mxu2 %v4826_v12  ;;  %v7064_v15 = vld [vmem:[#allocation25_spill] sm:$0xff] }
 0x129   : > { %2180 = vmatpush.bf16.msrb.mxu3 %v4838_v19  ;;  %v7046_v19 = vld [vmem:[#allocation6_spill] sm:$0xff] }
 0x12a   : > { %2034 = vmatpush.bf16.msrb.mxu0 %v4851_v24  ;;  %v7050_v24 = vld [vmem:[#allocation3_spill] sm:$0xff] }
 0x12b   : > { %2083 = vmatpush.bf16.msrb.mxu1 %v4858_v27  ;;  %v7052_v27 = vld [vmem:[#allocation11_spill] sm:$0xff] }
 0x12c   : > { %2132 = vmatpush.bf16.msrb.mxu2 %v4860_v28  ;;  %v1344_v46 = vpop.f32.mrf.mxu2  ;;  %v1405_v63 = vpop.f32.mrf.mxu0  ;;  %v7047_v28 = vld [vmem:[#allocation54_spill] sm:$0xff] }
 0x12d   : > { %2181 = vmatpush.bf16.msrb.mxu3 %v4869_v32  ;;  %v1345_v59 = vadd.f32 %v1344_v46, %v1296_v45  ;;  %v1393_v57 = vpop.f32.mrf.mxu3  ;;  %v1406_v31 = vadd.f32 %v1405_v63, %v5377_v42  ;;  %v1454_v58 = vpop.f32.mrf.mxu1  ;;  %v7048_v32 = vld [vmem:[#allocation53_spill] sm:$0xff] }
 0x12e   : > { %v5830_v42 = vperm.slane %v7048_v32, 1  ;;  %2035 = vmatpush.bf16.msrb.mxu0 %v7050_v24  ;;  %v7068_v32 = vld [vmem:[#allocation30_spill] sm:$0xff]  ;;  %v7070_v24 = vld [vmem:[#allocation56_spill] sm:$0xff] }
 0x12f   : > { %v5821_v12 = vadd.f32 %v1393_v57, %v1345_v59  ;;  %v1455_v6 = vadd.f32 %v1454_v58, %v1406_v31  ;;  %1600 = vmatmul.bf16.vlgmr.msra.gmra.mxu0 %v4914_v60  ;;  %2084 = vmatpush.bf16.msrb.mxu1 %v7051_v44  ;;  %v7054_v60 = vld [vmem:[#allocation13_spill] sm:$0xff]  ;;  %v7065_v57 = vld [vmem:[#allocation26_spill] sm:$0xff] }
 0x130   : > { %2133 = vmatpush.bf16.msrb.mxu2 %v4893_v43  ;;  %1649 = vmatmul.bf16.vlgmr.msra.gmra.mxu1 %v7046_v19  ;;  %v7071_v44 = vld [vmem:[#allocation57_spill] sm:$0xff] }
 0x131   : > { %2182 = vmatpush.bf16.msrb.mxu3 %v7045_v11  ;;  %1698 = vmatmul.bf16.vlgmr.msra.gmra.mxu2 %v7047_v28  ;;  %v2616_v33 = vmax.f32 %v1455_v6, 0.0  ;;  %v7066_v11 = vld [vmem:[#allocation29_spill] sm:$0xff]  ;;  %v7067_v28 = vld [vmem:[#allocation7_spill] sm:$0xff] }
 0x132   : > { %1747 = vmatmul.bf16.vlgmr.msra.gmra.mxu3 %v7049_v62  ;;  %2224 = vmatpush.bf16.msra.mxu0 %v7053_v29  ;;  %v7069_v62 = vld [vmem:[#allocation8_spill] sm:$0xff] }
 0x133   : > { %2273 = vmatpush.bf16.msra.mxu1 %v7055_v13  ;;  %v5848_v39 = vmin.f32 %v2616_v33, 1.0  ;;  %v7077_v33 = vld [vmem:[#allocation34_spill] sm:$0xff] }
 0x134   : > { %2322 = vmatpush.bf16.msra.mxu2 %v7052_v27  ;;  %v1503_v43 = vpop.f32.mrf.mxu2  ;;  %v1407_v4 = vpop.f32.mrf.mxu0  ;;  %v7072_v27 = vld [vmem:[#allocation27_spill] sm:$0xff] }
 0x135   : > { %2371 = vmatpush.bf16.msra.mxu3 %v7054_v60  ;;  %v1504_v48 = vadd.f32 %v1503_v43, %v5830_v42  ;;  %v1552_v9 = vpop.f32.mrf.mxu3  ;;  %v1408_v3 = vadd.f32 %v1407_v4, %v5388_v2  ;;  %v1456_v56 = vpop.f32.mrf.mxu1  ;;  %7061 = vst [vmem:[#allocation5_spill] sm:$0xff] %v5848_v39  ;;  %v7073_v43 = vld [vmem:[#allocation28_spill] sm:$0xff] }
 0x136   : > { %2225 = vmatpush.bf16.msra.mxu0 %v7057_v18  ;;  %v7075_v60 = vld [vmem:[#allocation36_spill] sm:$0xff] }
 0x137   : > { %v5841_v8 = vadd.f32 %v1552_v9, %v1504_v48  ;;  %v1457_v17 = vadd.f32 %v1456_v56, %v1408_v3  ;;  %2274 = vmatpush.bf16.msra.mxu1 %v7059_v35  ;;  %v7076_v56 = vld [vmem:[#allocation33_spill] sm:$0xff]  ;;  %v7079_v35 = vld [vmem:[#allocation40_spill] sm:$0xff] }
 0x138   : > { %2323 = vmatpush.bf16.msra.mxu2 %v7056_v22 }
 0x139   : > { %2372 = vmatpush.bf16.msra.mxu3 %v7058_v26  ;;  %v2620_v30 = vmax.f32 %v1457_v17, 0.0  ;;  %v7078_v17 = vld [vmem:[#allocation39_spill] sm:$0xff] }
 0x13a   : > { %2226 = vmatpush.bf16.msra.mxu0 %v7063_v51  ;;  %v7082_v51 = vld [vmem:[#allocation43_spill] sm:$0xff] }
 0x13b   : > { %v5850_v47 = vmin.f32 %v2620_v30, 1.0  ;;  %2275 = vmatpush.bf16.msra.mxu1 %v7065_v57 }
 0x13c   : > { %2324 = vmatpush.bf16.msra.mxu2 %v7060_v34  ;;  %v1505_v2 = vpop.f32.mrf.mxu2  ;;  %v1410_v59 = vpop.f32.mrf.mxu0  ;;  %v7080_v34 = vld [vmem:[#allocation37_spill] sm:$0xff] }
 0x13d   : > { %7062 = vst [vmem:[#allocation6_spill] sm:$0xff] %v5850_v47  ;;  %2373 = vmatpush.bf16.msra.mxu3 %v7064_v15  ;;  %v1506_v45 = vadd.f32 %v1505_v2, %v5830_v42  ;;  %v1554_v46 = vpop.f32.mrf.mxu3  ;;  %v1411_v31 = vadd.f32 %v1410_v59, %v5395_v0  ;;  %v1459_v58 = vpop.f32.mrf.mxu1  ;;  %v7074_v0 = vld [vmem:[#allocation35_spill] sm:$0xff]  ;;  %v7081_v2 = vld [vmem:[#allocation38_spill] sm:$0xff] }
 0x13e   : > { %2227 = vmatpush.bf16.msra.mxu0 %v7072_v27  ;;  %v7089_v27 = vld [vmem:[#allocation9_spill] sm:$0xff] }
 0x13f   : > { %v5859_v6 = vadd.f32 %v1554_v46, %v1506_v45  ;;  %v1460_v19 = vadd.f32 %v1459_v58, %v1411_v31  ;;  %1605 = vmatmul.bf16.gmra.mxu0 %v7067_v28  ;;  %2276 = vmatpush.bf16.msra.mxu1 %v7073_v43  ;;  %v7085_v46 = vld [vmem:[#allocation44_spill] sm:$0xff]  ;;  %v7090_v43 = vld [vmem:[#allocation50_spill] sm:$0xff] }
 0x140   : > { %2325 = vmatpush.bf16.msra.mxu2 %v7066_v11  ;;  %1654 = vmatmul.bf16.gmra.mxu1 %v7069_v62  ;;  %v7087_v62 = vld [vmem:[#allocation42_spill] sm:$0xff] }
 0x141   : > { %2374 = vmatpush.bf16.msra.mxu3 %v7068_v32  ;;  %1703 = vmatmul.bf16.gmra.mxu2 %v7070_v24  ;;  %v2624_v18 = vmax.f32 %v1460_v19, 0.0  ;;  %v7086_v19 = vld [vmem:[#allocation41_spill] sm:$0xff] }
 0x142   : > { %1752 = vmatmul.bf16.gmra.mxu3 %v7071_v44  ;;  %2228 = vmatpush.bf16.msra.mxu0 %v7076_v56  ;;  %v7088_v24 = vld [vmem:[#allocation49_spill] sm:$0xff] }
 0x143   : > { %2277 = vmatpush.bf16.msra.mxu1 %v7077_v33 }
 0x144   : > { %2326 = vmatpush.bf16.msra.mxu2 %v7074_v0  ;;  %v1508_v29 = vpop.f32.mrf.mxu2  ;;  %v1412_v4 = vpop.f32.mrf.mxu0  ;;  %v7091_v0 = vld [vmem:[#allocation10_spill] sm:$0xff] }
 0x145   : > { %2375 = vmatpush.bf16.msra.mxu3 %v7075_v60  ;;  %v1509_v48 = vadd.f32 %v1508_v29, %v5830_v42  ;;  %v1557_v9 = vpop.f32.mrf.mxu3  ;;  %v1413_v13 = vadd.f32 %v1412_v4, %v5406_v36  ;;  %v1461_v3 = vpop.f32.mrf.mxu1  ;;  %v5882_v36 = vmin.f32 %v2624_v18, 1.0  ;;  %v7093_v29 = vld [vmem:[#allocation59_spill] sm:$0xff] }
 0x146   : > { %2229 = vmatpush.bf16.msra.mxu0 %v7080_v34  ;;  %v7094_v60 = vld [vmem:[#allocation47_spill] sm:$0xff] }
 0x147   : > { %v5874_v22 = vadd.f32 %v1557_v9, %v1509_v48  ;;  %v1462_v26 = vadd.f32 %v1461_v3, %v1413_v13  ;;  %2278 = vmatpush.bf16.msra.mxu1 %v7081_v2  ;;  %7083 = vst [vmem:[#allocation54_spill] sm:$0xff] %v5882_v36  ;;  %v7095_v48 = vld [vmem:[#allocation48_spill] sm:$0xff] }
 0x148   : > { %2327 = vmatpush.bf16.msra.mxu2 %v7078_v17 }
 0x149   : > { %2376 = vmatpush.bf16.msra.mxu3 %v7079_v35  ;;  %v2628_v30 = vmax.f32 %v1462_v26, 0.0 }
 0x14a   : > { %2230 = vmatpush.bf16.msra.mxu0 %v7086_v19  ;;  %v7099_v19 = vld [vmem:[#allocation16_spill] sm:$0xff] }
 0x14b   : > { %v5884_v15 = vmin.f32 %v2628_v30, 1.0  ;;  %2279 = vmatpush.bf16.msra.mxu1 %v7087_v62  ;;  %v7100_v62 = vld [vmem:[#allocation64_spill] sm:$0xff] }
 0x14c   : > { %2328 = vmatpush.bf16.msra.mxu2 %v7082_v51  ;;  %v1510_v45 = vpop.f32.mrf.mxu2  ;;  %v1415_v31 = vpop.f32.mrf.mxu0 }
 0x14d   : > { %7084 = vst [vmem:[#allocation53_spill] sm:$0xff] %v5884_v15  ;;  %2377 = vmatpush.bf16.msra.mxu3 %v7085_v46  ;;  %v1511_v59 = vadd.f32 %v1510_v45, %v5830_v42  ;;  %v1559_v57 = vpop.f32.mrf.mxu3  ;;  %v1416_v58 = vadd.f32 %v1415_v31, %v5422_v52  ;;  %v1464_v11 = vpop.f32.mrf.mxu1  ;;  %v7092_v52 = vld [vmem:[#allocation58_spill] sm:$0xff] }
 0x14e   : > { %2231 = vmatpush.bf16.msra.mxu0 %v7094_v60 }
 0x14f   : > { %v5892_v32 = vadd.f32 %v1559_v57, %v1511_v59  ;;  %v1465_v44 = vadd.f32 %v1464_v11, %v1416_v58  ;;  %1610 = vmatmul.bf16.gmra.mxu0 %v7089_v27  ;;  %2280 = vmatpush.bf16.msra.mxu1 %v7095_v48  ;;  %v7098_v11 = vld [vmem:[#allocation15_spill] sm:$0xff] }
 0x150   : > { %2329 = vmatpush.bf16.msra.mxu2 %v7088_v24  ;;  %1659 = vmatmul.bf16.gmra.mxu1 %v7091_v0  ;;  %v7101_v24 = vld [vmem:[#allocation65_spill] sm:$0xff] }
 0x151   : > { %2378 = vmatpush.bf16.msra.mxu3 %v7090_v43  ;;  %1708 = vmatmul.bf16.gmra.mxu2 %v7092_v52  ;;  %v2632_v18 = vmax.f32 %v1465_v44, 0.0 }
 0x152   : > { %1757 = vmatmul.bf16.gmra.mxu3 %v7093_v29 }
 0x153   : > { %v5907_v30 = vmin.f32 %v2632_v18, 1.0 }
 0x154   : > { %v1513_v9 = vpop.f32.mrf.mxu2  ;;  %v1417_v3 = vpop.f32.mrf.mxu0 }
 0x155   : > { %v1514_v4 = vadd.f32 %v1513_v9, %v5830_v42  ;;  %v1562_v13 = vpop.f32.mrf.mxu3  ;;  %v1418_v56 = vadd.f32 %v1417_v3, %v5460_v25  ;;  %v1466_v33 = vpop.f32.mrf.mxu1  ;;  %7096 = vst [vmem:[#allocation55_spill] sm:$0xff] %v5907_v30  ;;  %v7134_v25 = vld [vmem:[#allocation73_spill] sm:$0xff] }
 0x157   : > { %v5905_v17 = vadd.f32 %v1562_v13, %v1514_v4  ;;  %v1467_v26 = vadd.f32 %v1466_v33, %v1418_v56 }
 0x159   : > { %v2636_v35 = vmax.f32 %v1467_v26, 0.0 }
 0x15b   : > { %v5909_v34 = vmin.f32 %v2636_v35, 1.0 }
 0x15c   : > { %v1515_v2 = vpop.f32.mrf.mxu2  ;;  %v1420_v46 = vpop.f32.mrf.mxu0 }
 0x15d   : > { %7097 = vst [vmem:[#allocation3_spill] sm:$0xff] %v5909_v34  ;;  %v1516_v51 = vadd.f32 %v1515_v2, %v5830_v42  ;;  %v1564_v45 = vpop.f32.mrf.mxu3  ;;  %v1421_v59 = vadd.f32 %v1420_v46, %v5476_v49  ;;  %v1469_v57 = vpop.f32.mrf.mxu1  ;;  %v7105_v46 = vld [vmem:[#allocation22_spill] sm:$0xff] }
 0x15f   : > { %v5915_v31 = vadd.f32 %v1564_v45, %v1516_v51  ;;  %v1470_v58 = vadd.f32 %v1469_v57, %v1421_v59  ;;  %1615 = vmatmul.bf16.gmra.mxu0 %v7098_v11  ;;  %v7104_v45 = vld [vmem:[#allocation21_spill] sm:$0xff]  ;;  %v7106_v59 = vld [vmem:[#allocation70_spill] sm:$0xff]  ;;  %v7107_v57 = vld [vmem:[#allocation71_spill] sm:$0xff] }
 0x160   : > { %1664 = vmatmul.bf16.gmra.mxu1 %v7099_v19 }
 0x161   : > { %1713 = vmatmul.bf16.gmra.mxu2 %v7100_v62  ;;  %v2640_v60 = vmax.f32 %v1470_v58, 0.0 }
 0x162   : > { %1762 = vmatmul.bf16.gmra.mxu3 %v7101_v24 }
 0x163   : > { %v5925_v4 = vmin.f32 %v2640_v60, 1.0 }
 0x164   : > { %v1518_v44 = vpop.f32.mrf.mxu2  ;;  %v1422_v49 = vpop.f32.mrf.mxu0 }
 0x165   : > { %v1519_v27 = vadd.f32 %v1518_v44, %v5830_v42  ;;  %v1567_v43 = vpop.f32.mrf.mxu3  ;;  %v1423_v0 = vadd.f32 %v1422_v49, %v5514_v38  ;;  %v1471_v52 = vpop.f32.mrf.mxu1  ;;  %7102 = vst [vmem:[#allocation4_spill] sm:$0xff] %v5925_v4  ;;  %v7133_v38 = vld [vmem:[#allocation72_spill] sm:$0xff] }
 0x167   : > { %v5923_v29 = vadd.f32 %v1567_v43, %v1519_v27  ;;  %v1472_v48 = vadd.f32 %v1471_v52, %v1423_v0 }
 0x169   : > { %v2644_v9 = vmax.f32 %v1472_v48, 0.0 }
 0x16b   : > { %v5927_v13 = vmin.f32 %v2644_v9, 1.0 }
 0x16c   : > { %v1520_v3 = vpop.f32.mrf.mxu2  ;;  %v1425_v18 = vpop.f32.mrf.mxu0 }
 0x16d   : > { %7103 = vst [vmem:[#allocation11_spill] sm:$0xff] %v5927_v13  ;;  %v1521_v56 = vadd.f32 %v1520_v3, %v5830_v42  ;;  %v1569_v33 = vpop.f32.mrf.mxu3  ;;  %v1426_v26 = vadd.f32 %v1425_v18, %v5530_v55  ;;  %v1474_v35 = vpop.f32.mrf.mxu1 }
 0x16f   : > { %v5933_v2 = vadd.f32 %v1569_v33, %v1521_v56  ;;  %v1475_v51 = vadd.f32 %v1474_v35, %v1426_v26  ;;  %1620 = vmatmul.bf16.gmra.mxu0 %v7104_v45  ;;  %v7110_v56 = vld [vmem:[#allocation89_spill] sm:$0xff]  ;;  %v7112_v45 = vld [vmem:[#allocation32_spill] sm:$0xff] }
 0x170   : > { %1669 = vmatmul.bf16.gmra.mxu1 %v7105_v46  ;;  %v7113_v46 = vld [vmem:[#allocation76_spill] sm:$0xff] }
 0x171   : > { %1718 = vmatmul.bf16.gmra.mxu2 %v7106_v59  ;;  %v2648_v27 = vmax.f32 %v1475_v51, 0.0  ;;  %v7111_v51 = vld [vmem:[#allocation31_spill] sm:$0xff]  ;;  %v7114_v59 = vld [vmem:[#allocation77_spill] sm:$0xff] }
 0x172   : > { %1767 = vmatmul.bf16.gmra.mxu3 %v7107_v57 }
 0x173   : > { %v5943_v0 = vmin.f32 %v2648_v27, 1.0 }
 0x174   : > { %v1523_v58 = vpop.f32.mrf.mxu2  ;;  %v1427_v55 = vpop.f32.mrf.mxu0 }
 0x175   : > { %v1524_v11 = vadd.f32 %v1523_v58, %v5830_v42  ;;  %v1572_v19 = vpop.f32.mrf.mxu3  ;;  %v1428_v62 = vadd.f32 %v1427_v55, %v5598_v1  ;;  %v1476_v24 = vpop.f32.mrf.mxu1  ;;  %7108 = vst [vmem:[#allocation12_spill] sm:$0xff] %v5943_v0  ;;  %v4337_v1 = vld [vmem:[%s4898_s29 + $0xac] sm:$0xf0] }
 0x177   : > { %v5941_v44 = vadd.f32 %v1572_v19, %v1524_v11  ;;  %v1477_v43 = vadd.f32 %v1476_v24, %v1428_v62 }
 0x179   : > { %v2652_v49 = vmax.f32 %v1477_v43, 0.0 }
 0x17b   : > { %v5945_v52 = vmin.f32 %v2652_v49, 1.0 }
 0x17c   : > { %v1525_v60 = vpop.f32.mrf.mxu2  ;;  %v1430_v3 = vpop.f32.mrf.mxu0 }
 0x17d   : > { %7109 = vst [vmem:[#allocation13_spill] sm:$0xff] %v5945_v52  ;;  %v1526_v48 = vadd.f32 %v1525_v60, %v5830_v42  ;;  %v1574_v9 = vpop.f32.mrf.mxu3  ;;  %v1431_v33 = vadd.f32 %v1430_v3, %v7110_v56  ;;  %v1479_v18 = vpop.f32.mrf.mxu1 }
 0x17f   : > { %v5951_v26 = vadd.f32 %v1574_v9, %v1526_v48  ;;  %v1480_v35 = vadd.f32 %v1479_v18, %v1431_v33  ;;  %1625 = vmatmul.bf16.gmra.mxu0 %v7111_v51 }
 0x180   : > { %1674 = vmatmul.bf16.gmra.mxu1 %v7112_v45 }
 0x181   : > { %1723 = vmatmul.bf16.gmra.mxu2 %v7113_v46  ;;  %v2656_v27 = vmax.f32 %v1480_v35, 0.0  ;;  %v7117_v46 = vld [vmem:[#allocation45_spill] sm:$0xff] }
 0x182   : > { %1772 = vmatmul.bf16.gmra.mxu3 %v7114_v59  ;;  %v7118_v59 = vld [vmem:[#allocation46_spill] sm:$0xff] }
 0x183   : > { %v5961_v60 = vmin.f32 %v2656_v27, 1.0 }
 0x184   : > { %v1528_v57 = vpop.f32.mrf.mxu2  ;;  %v1432_v19 = vpop.f32.mrf.mxu0 }
 0x185   : > { %v1529_v58 = vadd.f32 %v1528_v57, %v5830_v42  ;;  %v1577_v11 = vpop.f32.mrf.mxu3  ;;  %v1433_v55 = vadd.f32 %v1432_v19, %v5759_v50  ;;  %v1481_v62 = vpop.f32.mrf.mxu1  ;;  %7115 = vst [vmem:[#allocation14_spill] sm:$0xff] %v5961_v60 }
 0x187   : > { %v5959_v24 = vadd.f32 %v1577_v11, %v1529_v58  ;;  %v1482_v43 = vadd.f32 %v1481_v62, %v1433_v55 }
 0x189   : > { %v2660_v49 = vmax.f32 %v1482_v43, 0.0 }
 0x18b   : > { %v5963_v48 = vmin.f32 %v2660_v49, 1.0 }
 0x18c   : > { %v1530_v9 = vpop.f32.mrf.mxu2  ;;  %v1435_v33 = vpop.f32.mrf.mxu0 }
 0x18d   : > { %7116 = vst [vmem:[#allocation17_spill] sm:$0xff] %v5963_v48  ;;  %v1531_v3 = vadd.f32 %v1530_v9, %v5830_v42  ;;  %v1579_v56 = vpop.f32.mrf.mxu3  ;;  %v1436_v18 = vadd.f32 %v1435_v33, %v5777_v41  ;;  %v1484_v51 = vpop.f32.mrf.mxu1 }
 0x18f   : > { %v5969_v45 = vadd.f32 %v1579_v56, %v1531_v3  ;;  %v1485_v35 = vadd.f32 %v1484_v51, %v1436_v18  ;;  %1630 = vmatmul.bf16.gmra.mxu0 %v7117_v46 }
 0x190   : > { %1679 = vmatmul.bf16.gmra.mxu1 %v7118_v59  ;;  %v7121_v59 = vld [vmem:[#allocation51_spill] sm:$0xff] }
 0x191   : > { %1728 = vmatmul.bf16.gmra.mxu2 %v5722_v5  ;;  %v2664_v27 = vmax.f32 %v1485_v35, 0.0 }
 0x192   : > { %1777 = vmatmul.bf16.gmra.mxu3 %v5734_v53 }
 0x193   : > { %v5979_v9 = vmin.f32 %v2664_v27, 1.0 }
 0x194   : > { %v1533_v57 = vpop.f32.mrf.mxu2  ;;  %v1437_v41 = vpop.f32.mrf.mxu0 }
 0x195   : > { %v1534_v58 = vadd.f32 %v1533_v57, %v5830_v42  ;;  %v1582_v11 = vpop.f32.mrf.mxu3  ;;  %v1438_v19 = vadd.f32 %v1437_v41, %v5796_v14  ;;  %v1486_v55 = vpop.f32.mrf.mxu1  ;;  %7119 = vst [vmem:[#allocation18_spill] sm:$0xff] %v5979_v9  ;;  %v7122_v57 = vld [vmem:[#allocation52_spill] sm:$0xff] }
 0x197   : > { %v5977_v62 = vadd.f32 %v1582_v11, %v1534_v58  ;;  %v1487_v43 = vadd.f32 %v1486_v55, %v1438_v19 }
 0x199   : > { %v2668_v49 = vmax.f32 %v1487_v43, 0.0 }
 0x19b   : > { %v5981_v3 = vmin.f32 %v2668_v49, 1.0 }
 0x19c   : > { %v1535_v5 = vpop.f32.mrf.mxu2  ;;  %v1440_v33 = vpop.f32.mrf.mxu0 }
 0x19d   : > { %7120 = vst [vmem:[#allocation19_spill] sm:$0xff] %v5981_v3  ;;  %v1536_v53 = vadd.f32 %v1535_v5, %v5830_v42  ;;  %v1584_v56 = vpop.f32.mrf.mxu3  ;;  %v1441_v18 = vadd.f32 %v1440_v33, %v5810_v7  ;;  %v1489_v51 = vpop.f32.mrf.mxu1  ;;  %v3978_v5 = vld [vmem:[%s4898_s29 + $0x18] sm:$0xf]  ;;  %v3986_v33 = vld [vmem:[%s4898_s29 + $0x20] sm:$0xf] }
 0x19f   : > { %v5987_v46 = vadd.f32 %v1584_v56, %v1536_v53  ;;  %v1490_v35 = vadd.f32 %v1489_v51, %v1441_v18  ;;  %1635 = vmatmul.bf16.gmra.mxu0 %v7121_v59  ;;  %v4318_v53 = vld [vmem:[%s4898_s29 + $0x1c] sm:$0xf]  ;;  %v3980_v56 = vld [vmem:[%s4898_s29 + $0x48] sm:$0xf0]  ;;  %v4325_v18 = vld [vmem:[%s4898_s29 + $0x4c] sm:$0xf0] }
 0x1a0   : > { %1684 = vmatmul.bf16.gmra.mxu1 %v7122_v57  ;;  %v4319_v51 = vld [vmem:[%s4898_s29 + $0x24] sm:$0xf]  ;;  %v3988_v59 = vld [vmem:[%s4898_s29 + $0x50] sm:$0xf0] }
 0x1a1   : > { %1733 = vmatmul.bf16.gmra.mxu2 %v5788_v23  ;;  %v2672_v43 = vmax.f32 %v1490_v35, 0.0  ;;  %v4324_v23 = vld [vmem:[%s4898_s29 + $0x44] sm:$0xf0]  ;;  %v6017_v50 = vor.u32 %v4319_v51, %v3988_v59 }
 0x1a2   : > { %1782 = vmatmul.bf16.gmra.mxu3 %v5792_v16 }
 0x1a3   : > { %v6005_v57 = vmin.f32 %v2672_v43, 1.0  ;;  %v4010_v43 = vld [vmem:[%s4898_s29 + $0x80] sm:$0xf] }
 0x1a4   : > { %v1538_v7 = vpop.f32.mrf.mxu2  ;;  %v1442_v41 = vpop.f32.mrf.mxu0  ;;  %v6052_v28 = vor.u32 %v4337_v1, %v4010_v43 }
 0x1a5   : > { %v1539_v58 = vadd.f32 %v1538_v7, %v5830_v42  ;;  %v1587_v11 = vpop.f32.mrf.mxu3  ;;  %v1443_v19 = vadd.f32 %v1442_v41, %v5821_v12  ;;  %v1491_v55 = vpop.f32.mrf.mxu1  ;;  %7123 = vst [vmem:[#allocation20_spill] sm:$0xff] %v6005_v57  ;;  %v6009_v12 = vor.u32 %v4324_v23, %v3978_v5  ;;  %v6012_v41 = vor.u32 %v4318_v53, %v3980_v56  ;;  %v7127_v23 = vld [vmem:[#allocation62_spill] sm:$0xff]  ;;  %v7128_v56 = vld [vmem:[#allocation63_spill] sm:$0xff] }
 0x1a7   : > { %v5995_v27 = vadd.f32 %v1587_v11, %v1539_v58  ;;  %v1492_v49 = vadd.f32 %v1491_v55, %v1443_v19  ;;  %v6014_v19 = vor.u32 %v4325_v18, %v3986_v33 }
 0x1a9   : > { %v2676_v16 = vmax.f32 %v1492_v49, 0.0 }
 0x1ab   : > { %v6007_v7 = vmin.f32 %v2676_v16, 1.0 }
 0x1ac   : > { %v1540_v14 = vpop.f32.mrf.mxu2  ;;  %v1601_v11 = vpop.f32.mrf.mxu0 }
 0x1ad   : > { %7124 = vst [vmem:[#allocation23_spill] sm:$0xff] %v6007_v7  ;;  %v1541_v58 = vadd.f32 %v1540_v14, %v5830_v42  ;;  %v1589_v35 = vpop.f32.mrf.mxu3  ;;  %v1602_v55 = vadd.f32 %v1601_v11, %v5841_v8  ;;  %v1650_v49 = vpop.f32.mrf.mxu1  ;;  %v7125_v14 = vld [vmem:[#allocation60_spill] sm:$0xff]  ;;  %v7126_v8 = vld [vmem:[#allocation61_spill] sm:$0xff] }
 0x1af   : > { %v6021_v16 = vadd.f32 %v1589_v35, %v1541_v58  ;;  %v1651_v5 = vadd.f32 %v1650_v49, %v1602_v55  ;;  %2036 = vmatmul.bf16.vlgmr.msrb.gmra.mxu0 %v6009_v12  ;;  %v7129_v35 = vld [vmem:[#allocation66_spill] sm:$0xff]  ;;  %v7130_v55 = vld [vmem:[#allocation67_spill] sm:$0xff]  ;;  %v7131_v49 = vld [vmem:[#allocation68_spill] sm:$0xff] }
 0x1b0   : > { %2085 = vmatmul.bf16.vlgmr.msrb.gmra.mxu1 %v6012_v41  ;;  %2420 = vmatpush.bf16.msrb.mxu0 %v7126_v8  ;;  %v7132_v8 = vld [vmem:[#allocation69_spill] sm:$0xff] }
 0x1b1   : > { %2134 = vmatmul.bf16.vlgmr.msrb.gmra.mxu2 %v6014_v19  ;;  %2469 = vmatpush.bf16.msrb.mxu1 %v7128_v56  ;;  %v4004_v56 = vld [vmem:[%s4898_s29 + $0xa8] sm:$0xf0] }
 0x1b2   : > { %2183 = vmatmul.bf16.vlgmr.msrb.gmra.mxu3 %v6017_v50  ;;  %2518 = vmatpush.bf16.msrb.mxu2 %v7125_v14 }
 0x1b3   : > { %2567 = vmatpush.bf16.msrb.mxu3 %v7127_v23  ;;  %v4002_v23 = vld [vmem:[%s4898_s29 + $0x78] sm:$0xf] }
 0x1b4   : > { %v1699_v53 = vpop.f32.mrf.mxu2  ;;  %v1603_v51 = vpop.f32.mrf.mxu0  ;;  %2421 = vmatpush.bf16.msrb.mxu0 %v7130_v55 }
 0x1b5   : > { %v1700_v33 = vadd.f32 %v1699_v53, %v1651_v5  ;;  %v1748_v18 = vpop.f32.mrf.mxu3  ;;  %v1604_v59 = vadd.f32 %v1603_v51, %v5859_v6  ;;  %v1652_v58 = vpop.f32.mrf.mxu1  ;;  %2470 = vmatpush.bf16.msrb.mxu1 %v7132_v8  ;;  %v4336_v5 = vld [vmem:[%s4898_s29 + $0xa4] sm:$0xf0]  ;;  %v4330_v53 = vld [vmem:[%s4898_s29 + $0x7c] sm:$0xf]  ;;  %v4331_v6 = vld [vmem:[%s4898_s29 + $0x84] sm:$0xf] }
 0x1b6   : > { %2519 = vmatpush.bf16.msrb.mxu2 %v7129_v35  ;;  %v4012_v51 = vld [vmem:[%s4898_s29 + $0xb0] sm:$0xf0]  ;;  %v6047_v35 = vor.u32 %v4336_v5, %v4002_v23  ;;  %v6050_v8 = vor.u32 %v4330_v53, %v4004_v56  ;;  %v7138_v23 = vld [vmem:[#allocation78_spill] sm:$0xff]  ;;  %v7140_v53 = vld [vmem:[#allocation79_spill] sm:$0xff] }
 0x1b7   : > { %v1749_v11 = vadd.f32 %v1748_v18, %v1700_v33  ;;  %2568 = vmatpush.bf16.msrb.mxu3 %v7131_v49  ;;  %v1653_v14 = vadd.f32 %v1652_v58, %v1604_v59  ;;  %v7135_v33 = vld [vmem:[#allocation74_spill] sm:$0xff]  ;;  %v7136_v59 = vld [vmem:[#allocation75_spill] sm:$0xff]  ;;  %v6055_v57 = vor.u32 %v4331_v6, %v4012_v51  ;;  %v7139_v5 = vld [vmem:[#allocation81_spill] sm:$0xff] }
 0x1b8   : > { %2422 = vmatpush.bf16.msrb.mxu0 %v7134_v25  ;;  %v7137_v25 = vld [vmem:[#allocation80_spill] sm:$0xff]  ;;  %v7144_v56 = vld [vmem:[#allocation82_spill] sm:$0xff] }
 0x1b9   : > { %2471 = vmatpush.bf16.msrb.mxu1 %v7136_v59 }
 0x1ba   : > { %2520 = vmatpush.bf16.msrb.mxu2 %v7133_v38 }
 0x1bb   : > { %2569 = vmatpush.bf16.msrb.mxu3 %v7135_v33  ;;  %v2617_v33 = vmax.f32 %v1749_v11, 0.0 }
 0x1bc   : > { %v1701_v18 = vpop.f32.mrf.mxu2  ;;  %v1606_v49 = vpop.f32.mrf.mxu0  ;;  %2423 = vmatpush.bf16.msrb.mxu0 %v7138_v23  ;;  %v7149_v23 = vld [vmem:[#allocation90_spill] sm:$0xff] }
 0x1bd   : > { %v1702_v58 = vadd.f32 %v1701_v18, %v1653_v14  ;;  %v1750_v55 = vpop.f32.mrf.mxu3  ;;  %v1607_v38 = vadd.f32 %v1606_v49, %v5874_v22  ;;  %v1655_v63 = vpop.f32.mrf.mxu1  ;;  %2472 = vmatpush.bf16.msrb.mxu1 %v7140_v53  ;;  %v7141_v22 = vld [vmem:[#allocation84_spill] sm:$0xff]  ;;  %v6066_v43 = vmin.f32 %v2617_v33, 1.0  ;;  %v7148_v33 = vld [vmem:[#allocation86_spill] sm:$0xff]  ;;  %v7150_v53 = vld [vmem:[#allocation87_spill] sm:$0xff] }
 0x1be   : > { %2521 = vmatpush.bf16.msrb.mxu2 %v7137_v25 }
 0x1bf   : > { %v1751_v7 = vadd.f32 %v1750_v55, %v1702_v58  ;;  %2570 = vmatpush.bf16.msrb.mxu3 %v7139_v5  ;;  %v1656_v14 = vadd.f32 %v1655_v63, %v1607_v38  ;;  %2041 = vmatmul.bf16.gmra.mxu0 %v6047_v35  ;;  %7142 = vst [vmem:[#allocation24_spill] sm:$0xff] %v6066_v43  ;;  %v7145_v63 = vld [vmem:[#allocation85_spill] sm:$0xff]  ;;  %v7147_v38 = vld [vmem:[#allocation88_spill] sm:$0xff] }
 0x1c0   : > { %2090 = vmatmul.bf16.gmra.mxu1 %v6050_v8  ;;  %2424 = vmatpush.bf16.msrb.mxu0 %v7144_v56  ;;  %v4028_v56 = vld [vmem:[%s4898_s29 + $0x108] sm:$0xf0] }
 0x1c1   : > { %v2621_v1 = vmax.f32 %v1751_v7, 0.0  ;;  %2139 = vmatmul.bf16.gmra.mxu2 %v6052_v28  ;;  %v7146_v7 = vld [vmem:[#allocation83_spill] sm:$0xff] }
 0x1c2   : > { %2188 = vmatmul.bf16.gmra.mxu3 %v6055_v57  ;;  %2522 = vmatpush.bf16.msrb.mxu2 %v7141_v22  ;;  %v4342_v22 = vld [vmem:[%s4898_s29 + $0xdc] sm:$0xf] }
 0x1c3   : > { %v6068_v11 = vmin.f32 %v2621_v1, 1.0  ;;  %2571 = vmatpush.bf16.msrb.mxu3 %v7145_v63  ;;  %2473 = vmatpush.bf16.msrb.mxu1 %v7146_v7  ;;  %v4026_v1 = vld [vmem:[%s4898_s29 + $0xd8] sm:$0xf]  ;;  %v4034_v63 = vld [vmem:[%s4898_s29 + $0xe0] sm:$0xf] }
 0x1c4   : > { %v1704_v6 = vpop.f32.mrf.mxu2  ;;  %v1608_v58 = vpop.f32.mrf.mxu0  ;;  %2425 = vmatpush.bf16.msrb.mxu0 %v7148_v33  ;;  %v4036_v7 = vld [vmem:[%s4898_s29 + $0x110] sm:$0xf0] }
 0x1c5   : > { %7143 = vst [vmem:[#allocation25_spill] sm:$0xff] %v6068_v11  ;;  %v1705_v18 = vadd.f32 %v1704_v6, %v1656_v14  ;;  %v1753_v59 = vpop.f32.mrf.mxu3  ;;  %v1609_v55 = vadd.f32 %v1608_v58, %v5892_v32  ;;  %v1657_v49 = vpop.f32.mrf.mxu1  ;;  %v4348_v14 = vld [vmem:[%s4898_s29 + $0x104] sm:$0xf0]  ;;  %v4349_v6 = vld [vmem:[%s4898_s29 + $0x10c] sm:$0xf0] }
 0x1c6   : > { %2523 = vmatpush.bf16.msrb.mxu2 %v7147_v38  ;;  %v4343_v32 = vld [vmem:[%s4898_s29 + $0xe4] sm:$0xf] }
 0x1c7   : > { %v1754_v25 = vadd.f32 %v1753_v59, %v1705_v18  ;;  %2572 = vmatpush.bf16.msrb.mxu3 %v7149_v23  ;;  %v1658_v5 = vadd.f32 %v1657_v49, %v1609_v55  ;;  %2474 = vmatpush.bf16.msrb.mxu1 %v7150_v53  ;;  %v7151_v58 = vld [vmem:[#allocation91_spill] sm:$0xff]  ;;  %v6091_v59 = vor.u32 %v4348_v14, %v4026_v1  ;;  %v7152_v55 = vld [vmem:[#allocation92_spill] sm:$0xff] }
 0x1c8   : > { %2426 = vmatpush.bf16.msrb.mxu0 %v7151_v58  ;;  %v6094_v23 = vor.u32 %v4342_v22, %v4028_v56  ;;  %v6096_v53 = vor.u32 %v4349_v6, %v4034_v63  ;;  %v6099_v9 = vor.u32 %v4343_v32, %v4036_v7  ;;  %v4050_v6 = vld [vmem:[%s4898_s29 + $0x138] sm:$0xf]  ;;  %v4360_v32 = vld [vmem:[%s4898_s29 + $0x164] sm:$0xf0]  ;;  %v4354_v7 = vld [vmem:[%s4898_s29 + $0x13c] sm:$0xf] }
 0x1ca   : > { %2524 = vmatpush.bf16.msrb.mxu2 %v5710_v37 }
 0x1cb   : > { %2573 = vmatpush.bf16.msrb.mxu3 %v5720_v21  ;;  %2475 = vmatpush.bf16.msrb.mxu1 %v7152_v55  ;;  %v2625_v21 = vmax.f32 %v1754_v25, 0.0  ;;  %v4058_v55 = vld [vmem:[%s4898_s29 + $0x140] sm:$0xf] }
 0x1cc   : > { %v1706_v18 = vpop.f32.mrf.mxu2  ;;  %v1611_v33 = vpop.f32.mrf.mxu0  ;;  %2427 = vmatpush.bf16.msrb.mxu0 %v5736_v61 }
 0x1cd   : > { %v1707_v49 = vadd.f32 %v1706_v18, %v1658_v5  ;;  %v1755_v38 = vpop.f32.mrf.mxu3  ;;  %v1612_v37 = vadd.f32 %v1611_v33, %v5905_v17  ;;  %v1660_v51 = vpop.f32.mrf.mxu1  ;;  %v6109_v61 = vmin.f32 %v2625_v21, 1.0  ;;  %v4052_v18 = vld [vmem:[%s4898_s29 + $0x168] sm:$0xf0]  ;;  %v4060_v33 = vld [vmem:[%s4898_s29 + $0x170] sm:$0xf0]  ;;  %v6124_v21 = vor.u32 %v4360_v32, %v4050_v6 }
 0x1ce   : > { %2525 = vmatpush.bf16.msrb.mxu2 %v5751_v20 }
 0x1cf   : > { %v1756_v58 = vadd.f32 %v1755_v38, %v1707_v49  ;;  %2574 = vmatpush.bf16.msrb.mxu3 %v5763_v54  ;;  %v1661_v5 = vadd.f32 %v1660_v51, %v1612_v37  ;;  %2046 = vmatmul.bf16.gmra.mxu0 %v6091_v59  ;;  %7153 = vst [vmem:[#allocation26_spill] sm:$0xff] %v6109_v61  ;;  %v4361_v49 = vld [vmem:[%s4898_s29 + $0x16c] sm:$0xf0]  ;;  %v4355_v38 = vld [vmem:[%s4898_s29 + $0x144] sm:$0xf] }
 0x1d0   : > { %2476 = vmatpush.bf16.msrb.mxu1 %v5749_v10 }
 0x1d1   : > { %v2629_v1 = vmax.f32 %v1756_v58, 0.0  ;;  %2095 = vmatmul.bf16.gmra.mxu1 %v6094_v23  ;;  %2144 = vmatmul.bf16.gmra.mxu2 %v6096_v53 }
 0x1d2   : > { %2193 = vmatmul.bf16.gmra.mxu3 %v6099_v9 }
 0x1d3   : > { %v6111_v20 = vmin.f32 %v2629_v1, 1.0 }
 0x1d4   : > { %v1709_v54 = vpop.f32.mrf.mxu2  ;;  %v1613_v51 = vpop.f32.mrf.mxu0 }
 0x1d5   : > { %7154 = vst [vmem:[#allocation29_spill] sm:$0xff] %v6111_v20  ;;  %v1710_v10 = vadd.f32 %v1709_v54, %v1661_v5  ;;  %v1758_v17 = vpop.f32.mrf.mxu3  ;;  %v1614_v14 = vadd.f32 %v1613_v51, %v5915_v31  ;;  %v1662_v22 = vpop.f32.mrf.mxu1  ;;  %v6126_v54 = vor.u32 %v4354_v7, %v4052_v18  ;;  %v6128_v31 = vor.u32 %v4361_v49, %v4058_v55 }
 0x1d6   : > { %v6131_v51 = vor.u32 %v4355_v38, %v4060_v33 }
 0x1d7   : > { %v1759_v56 = vadd.f32 %v1758_v17, %v1710_v10  ;;  %v1663_v63 = vadd.f32 %v1662_v22, %v1614_v14 }
 0x1d9   : > { %v2633_v14 = vmax.f32 %v1759_v56, 0.0 }
 0x1dc   : > { %v1711_v37 = vpop.f32.mrf.mxu2  ;;  %v1616_v1 = vpop.f32.mrf.mxu0 }
 0x1dd   : > { %v1712_v58 = vadd.f32 %v1711_v37, %v1663_v63  ;;  %v1760_v5 = vpop.f32.mrf.mxu3  ;;  %v1617_v10 = vadd.f32 %v1616_v1, %v5923_v29  ;;  %v1665_v17 = vpop.f32.mrf.mxu1  ;;  %v6137_v29 = vmin.f32 %v2633_v14, 1.0  ;;  %v4366_v1 = vld [vmem:[%s4898_s29 + $0x19c] sm:$0xf]  ;;  %v4373_v14 = vld [vmem:[%s4898_s29 + $0x1cc] sm:$0xf0] }
 0x1df   : > { %v1761_v22 = vadd.f32 %v1760_v5, %v1712_v58  ;;  %v1666_v25 = vadd.f32 %v1665_v17, %v1617_v10  ;;  %2051 = vmatmul.bf16.gmra.mxu0 %v6124_v21  ;;  %7155 = vst [vmem:[#allocation7_spill] sm:$0xff] %v6137_v29  ;;  %v4074_v58 = vld [vmem:[%s4898_s29 + $0x198] sm:$0xf]  ;;  %v4372_v5 = vld [vmem:[%s4898_s29 + $0x1c4] sm:$0xf0] }
 0x1e0   : > { %v4076_v10 = vld [vmem:[%s4898_s29 + $0x1c8] sm:$0xf0]  ;;  %v4082_v17 = vld [vmem:[%s4898_s29 + $0x1a0] sm:$0xf] }
 0x1e1   : > { %v2637_v6 = vmax.f32 %v1761_v22, 0.0  ;;  %2100 = vmatmul.bf16.gmra.mxu1 %v6126_v54  ;;  %2149 = vmatmul.bf16.gmra.mxu2 %v6128_v31  ;;  %v4367_v22 = vld [vmem:[%s4898_s29 + $0x1a4] sm:$0xf]  ;;  %v6154_v55 = vor.u32 %v4366_v1, %v4076_v10 }
 0x1e2   : > { %2198 = vmatmul.bf16.gmra.mxu3 %v6131_v51 }
 0x1e3   : > { %v6139_v56 = vmin.f32 %v2637_v6, 1.0  ;;  %v4084_v6 = vld [vmem:[%s4898_s29 + $0x1d0] sm:$0xf0] }
 0x1e4   : > { %v1714_v63 = vpop.f32.mrf.mxu2  ;;  %v1618_v18 = vpop.f32.mrf.mxu0 }
 0x1e5   : > { %7156 = vst [vmem:[#allocation30_spill] sm:$0xff] %v6139_v56  ;;  %v1715_v32 = vadd.f32 %v1714_v63, %v1666_v25  ;;  %v1763_v7 = vpop.f32.mrf.mxu3  ;;  %v1619_v49 = vadd.f32 %v1618_v18, %v5933_v2  ;;  %v1667_v38 = vpop.f32.mrf.mxu1  ;;  %v6152_v25 = vor.u32 %v4372_v5, %v4074_v58  ;;  %v6156_v2 = vor.u32 %v4373_v14, %v4082_v17 }
 0x1e6   : > { %v6159_v18 = vor.u32 %v4367_v22, %v4084_v6  ;;  %v4098_v22 = vld [vmem:[%s4898_s29 + $0x1f8] sm:$0xf]  ;;  %v4384_v6 = vld [vmem:[%s4898_s29 + $0x224] sm:$0xf0] }
 0x1e7   : > { %v1764_v33 = vadd.f32 %v1763_v7, %v1715_v32  ;;  %v1668_v37 = vadd.f32 %v1667_v38, %v1619_v49 }
 0x1e9   : > { %v2641_v49 = vmax.f32 %v1764_v33, 0.0 }
 0x1ec   : > { %v1716_v3 = vpop.f32.mrf.mxu2  ;;  %v1621_v48 = vpop.f32.mrf.mxu0 }
 0x1ed   : > { %v1717_v63 = vadd.f32 %v1716_v3, %v1668_v37  ;;  %v1765_v60 = vpop.f32.mrf.mxu3  ;;  %v1622_v32 = vadd.f32 %v1621_v48, %v5941_v44  ;;  %v1670_v7 = vpop.f32.mrf.mxu1  ;;  %v6165_v44 = vmin.f32 %v2641_v49, 1.0  ;;  %v4385_v49 = vld [vmem:[%s4898_s29 + $0x22c] sm:$0xf0] }
 0x1ef   : > { %v1766_v38 = vadd.f32 %v1765_v60, %v1717_v63  ;;  %v1671_v0 = vadd.f32 %v1670_v7, %v1622_v32  ;;  %2056 = vmatmul.bf16.gmra.mxu0 %v6152_v25  ;;  %7157 = vst [vmem:[#allocation8_spill] sm:$0xff] %v6165_v44  ;;  %v4378_v63 = vld [vmem:[%s4898_s29 + $0x1fc] sm:$0xf]  ;;  %v4100_v32 = vld [vmem:[%s4898_s29 + $0x228] sm:$0xf0] }
 0x1f0   : > { %v4106_v7 = vld [vmem:[%s4898_s29 + $0x200] sm:$0xf]  ;;  %v6182_v5 = vor.u32 %v4378_v63, %v4100_v32 }
 0x1f1   : > { %v2645_v58 = vmax.f32 %v1766_v38, 0.0  ;;  %2105 = vmatmul.bf16.gmra.mxu1 %v6154_v55  ;;  %2154 = vmatmul.bf16.gmra.mxu2 %v6156_v2  ;;  %v4379_v38 = vld [vmem:[%s4898_s29 + $0x204] sm:$0xf] }
 0x1f2   : > { %2203 = vmatmul.bf16.gmra.mxu3 %v6159_v18 }
 0x1f3   : > { %v6167_v48 = vmin.f32 %v2645_v58, 1.0  ;;  %v4108_v58 = vld [vmem:[%s4898_s29 + $0x230] sm:$0xf0] }
 0x1f4   : > { %v1719_v60 = vpop.f32.mrf.mxu2  ;;  %v1623_v37 = vpop.f32.mrf.mxu0 }
 0x1f5   : > { %7158 = vst [vmem:[#allocation56_spill] sm:$0xff] %v6167_v48  ;;  %v1720_v3 = vadd.f32 %v1719_v60, %v1671_v0  ;;  %v1768_v33 = vpop.f32.mrf.mxu3  ;;  %v1624_v1 = vadd.f32 %v1623_v37, %v5951_v26  ;;  %v1672_v10 = vpop.f32.mrf.mxu1  ;;  %v6180_v0 = vor.u32 %v4384_v6, %v4098_v22  ;;  %v6184_v26 = vor.u32 %v4385_v49, %v4106_v7 }
 0x1f6   : > { %v6187_v37 = vor.u32 %v4379_v38, %v4108_v58  ;;  %v4122_v38 = vld [vmem:[%s4898_s29 + $0x258] sm:$0xf]  ;;  %v4396_v58 = vld [vmem:[%s4898_s29 + $0x284] sm:$0xf0] }
 0x1f7   : > { %v1769_v17 = vadd.f32 %v1768_v33, %v1720_v3  ;;  %v1673_v14 = vadd.f32 %v1672_v10, %v1624_v1 }
 0x1f9   : > { %v2649_v1 = vmax.f32 %v1769_v17, 0.0 }
 0x1fc   : > { %v1721_v52 = vpop.f32.mrf.mxu2  ;;  %v1626_v13 = vpop.f32.mrf.mxu0 }
 0x1fd   : > { %v1722_v60 = vadd.f32 %v1721_v52, %v1673_v14  ;;  %v1770_v4 = vpop.f32.mrf.mxu3  ;;  %v1627_v3 = vadd.f32 %v1626_v13, %v5959_v24  ;;  %v1675_v33 = vpop.f32.mrf.mxu1  ;;  %v6193_v13 = vmin.f32 %v2649_v1, 1.0  ;;  %v4397_v1 = vld [vmem:[%s4898_s29 + $0x28c] sm:$0xf0] }
 0x1ff   : > { %v1771_v10 = vadd.f32 %v1770_v4, %v1722_v60  ;;  %v1676_v44 = vadd.f32 %v1675_v33, %v1627_v3  ;;  %2061 = vmatmul.bf16.gmra.mxu0 %v6180_v0  ;;  %7159 = vst [vmem:[#allocation57_spill] sm:$0xff] %v6193_v13  ;;  %v4390_v60 = vld [vmem:[%s4898_s29 + $0x25c] sm:$0xf]  ;;  %v4124_v3 = vld [vmem:[%s4898_s29 + $0x288] sm:$0xf0] }
 0x200   : > { %v4130_v33 = vld [vmem:[%s4898_s29 + $0x260] sm:$0xf]  ;;  %v6210_v6 = vor.u32 %v4390_v60, %v4124_v3 }
 0x201   : > { %v2653_v22 = vmax.f32 %v1771_v10, 0.0  ;;  %2110 = vmatmul.bf16.gmra.mxu1 %v6182_v5  ;;  %2159 = vmatmul.bf16.gmra.mxu2 %v6184_v26  ;;  %v4391_v10 = vld [vmem:[%s4898_s29 + $0x264] sm:$0xf] }
 0x202   : > { %2208 = vmatmul.bf16.gmra.mxu3 %v6187_v37 }
 0x203   : > { %v6195_v52 = vmin.f32 %v2653_v22, 1.0  ;;  %v4132_v22 = vld [vmem:[%s4898_s29 + $0x290] sm:$0xf0] }
 0x204   : > { %v1724_v4 = vpop.f32.mrf.mxu2  ;;  %v1628_v14 = vpop.f32.mrf.mxu0 }
 0x205   : > { %7160 = vst [vmem:[#allocation27_spill] sm:$0xff] %v6195_v52  ;;  %v1725_v24 = vadd.f32 %v1724_v4, %v1676_v44  ;;  %v1773_v17 = vpop.f32.mrf.mxu3  ;;  %v1629_v63 = vadd.f32 %v1628_v14, %v5969_v45  ;;  %v1677_v32 = vpop.f32.mrf.mxu1  ;;  %v6208_v44 = vor.u32 %v4396_v58, %v4122_v38  ;;  %v6212_v45 = vor.u32 %v4397_v1, %v4130_v33 }
 0x206   : > { %v6215_v14 = vor.u32 %v4391_v10, %v4132_v22  ;;  %v4146_v10 = vld [vmem:[%s4898_s29 + $0x2b8] sm:$0xf]  ;;  %v4408_v22 = vld [vmem:[%s4898_s29 + $0x2e4] sm:$0xf0] }
 0x207   : > { %v1774_v7 = vadd.f32 %v1773_v17, %v1725_v24  ;;  %v1678_v49 = vadd.f32 %v1677_v32, %v1629_v63 }
 0x209   : > { %v2657_v63 = vmax.f32 %v1774_v7, 0.0 }
 0x20c   : > { %v1726_v48 = vpop.f32.mrf.mxu2  ;;  %v1631_v56 = vpop.f32.mrf.mxu0 }
 0x20d   : > { %v1727_v4 = vadd.f32 %v1726_v48, %v1678_v49  ;;  %v1775_v29 = vpop.f32.mrf.mxu3  ;;  %v1632_v24 = vadd.f32 %v1631_v56, %v5977_v62  ;;  %v1680_v17 = vpop.f32.mrf.mxu1  ;;  %v6221_v62 = vmin.f32 %v2657_v63, 1.0  ;;  %v4409_v63 = vld [vmem:[%s4898_s29 + $0x2ec] sm:$0xf0] }
 0x20f   : > { %v1776_v32 = vadd.f32 %v1775_v29, %v1727_v4  ;;  %v1681_v13 = vadd.f32 %v1680_v17, %v1632_v24  ;;  %2066 = vmatmul.bf16.gmra.mxu0 %v6208_v44  ;;  %7161 = vst [vmem:[#allocation28_spill] sm:$0xff] %v6221_v62  ;;  %v4402_v4 = vld [vmem:[%s4898_s29 + $0x2bc] sm:$0xf]  ;;  %v4148_v24 = vld [vmem:[%s4898_s29 + $0x2e8] sm:$0xf0] }
 0x210   : > { %v4154_v17 = vld [vmem:[%s4898_s29 + $0x2c0] sm:$0xf]  ;;  %v6238_v58 = vor.u32 %v4402_v4, %v4148_v24 }
 0x211   : > { %v2661_v38 = vmax.f32 %v1776_v32, 0.0  ;;  %2115 = vmatmul.bf16.gmra.mxu1 %v6210_v6  ;;  %2164 = vmatmul.bf16.gmra.mxu2 %v6212_v45  ;;  %v4403_v32 = vld [vmem:[%s4898_s29 + $0x2c4] sm:$0xf] }
 0x212   : > { %2213 = vmatmul.bf16.gmra.mxu3 %v6215_v14 }
 0x213   : > { %v6223_v56 = vmin.f32 %v2661_v38, 1.0  ;;  %v4156_v38 = vld [vmem:[%s4898_s29 + $0x2f0] sm:$0xf0] }
 0x214   : > { %v1729_v29 = vpop.f32.mrf.mxu2  ;;  %v1633_v49 = vpop.f32.mrf.mxu0 }
 0x215   : > { %7162 = vst [vmem:[#allocation35_spill] sm:$0xff] %v6223_v56  ;;  %v1730_v48 = vadd.f32 %v1729_v29, %v1681_v13  ;;  %v1778_v7 = vpop.f32.mrf.mxu3  ;;  %v1634_v60 = vadd.f32 %v1633_v49, %v5987_v46  ;;  %v1682_v3 = vpop.f32.mrf.mxu1  ;;  %v6236_v13 = vor.u32 %v4408_v22, %v4146_v10  ;;  %v6240_v46 = vor.u32 %v4409_v63, %v4154_v17 }
 0x216   : > { %v6243_v49 = vor.u32 %v4403_v32, %v4156_v38  ;;  %v3994_v32 = vld [vmem:[%s4898_s29 + $0x28] sm:$0xf]  ;;  %v4326_v38 = vld [vmem:[%s4898_s29 + $0x54] sm:$0xf0] }
 0x217   : > { %v1779_v33 = vadd.f32 %v1778_v7, %v1730_v48  ;;  %v1683_v1 = vadd.f32 %v1682_v3, %v1634_v60 }
 0x218   : > { %7163 = vst [vmem:[#allocation36_spill] sm:$0xff] %v6243_v49 }
 0x219   : > { %v2665_v60 = vmax.f32 %v1779_v33, 0.0 }
 0x21c   : > { %v1731_v52 = vpop.f32.mrf.mxu2  ;;  %v1636_v34 = vpop.f32.mrf.mxu0 }
 0x21d   : > { %v1732_v29 = vadd.f32 %v1731_v52, %v1683_v1  ;;  %v1780_v30 = vpop.f32.mrf.mxu3  ;;  %v1637_v48 = vadd.f32 %v1636_v34, %v5995_v27  ;;  %v1685_v7 = vpop.f32.mrf.mxu1  ;;  %v6249_v34 = vmin.f32 %v2665_v60, 1.0  ;;  %v6260_v60 = vor.u32 %v4326_v38, %v3994_v32 }
 0x21f   : > { %v1781_v3 = vadd.f32 %v1780_v30, %v1732_v29  ;;  %v1686_v62 = vadd.f32 %v1685_v7, %v1637_v48  ;;  %2071 = vmatmul.bf16.gmra.mxu0 %v6236_v13  ;;  %7164 = vst [vmem:[#allocation33_spill] sm:$0xff] %v6249_v34  ;;  %v4320_v29 = vld [vmem:[%s4898_s29 + $0x2c] sm:$0xf]  ;;  %v3996_v48 = vld [vmem:[%s4898_s29 + $0x58] sm:$0xf0] }
 0x221   : > { %v2669_v10 = vmax.f32 %v1781_v3, 0.0  ;;  %2120 = vmatmul.bf16.gmra.mxu1 %v6238_v58  ;;  %2169 = vmatmul.bf16.gmra.mxu2 %v6240_v46 }
 0x222   : > { %2218 = vmatmul.bf16.gmra.mxu3 %v6243_v49 }
 0x223   : > { %v6251_v27 = vmin.f32 %v2669_v10, 1.0 }
 0x224   : > { %v1734_v52 = vpop.f32.mrf.mxu2  ;;  %v1638_v1 = vpop.f32.mrf.mxu0 }
 0x225   : > { %7165 = vst [vmem:[#allocation34_spill] sm:$0xff] %v6251_v27  ;;  %v1735_v30 = vadd.f32 %v1734_v52, %v1686_v62  ;;  %v1783_v33 = vpop.f32.mrf.mxu3  ;;  %v1639_v4 = vadd.f32 %v1638_v1, %v6021_v16  ;;  %v1687_v24 = vpop.f32.mrf.mxu1  ;;  %v6262_v52 = vor.u32 %v4320_v29, %v3996_v48  ;;  %v4018_v48 = vld [vmem:[%s4898_s29 + $0x88] sm:$0xf] }
 0x227   : > { %v1784_v17 = vadd.f32 %v1783_v33, %v1735_v30  ;;  %v1688_v63 = vadd.f32 %v1687_v24, %v1639_v4 }
 0x229   : > { %v2673_v34 = vmax.f32 %v1784_v17, 0.0 }
 0x22b   : > { %v6269_v33 = vmin.f32 %v2673_v34, 1.0  ;;  %v4020_v34 = vld [vmem:[%s4898_s29 + $0xb8] sm:$0xf0] }
 0x22c   : > { %v1736_v7 = vpop.f32.mrf.mxu2  ;;  %v2037_v62 = vpop.f32.mrf.mxu0 }
 0x22d   : > { %v1737_v3 = vadd.f32 %v1736_v7, %v1688_v63  ;;  %v1785_v10 = vpop.f32.mrf.mxu3  ;;  %v2038_v56 = vadd.f32 %v2037_v62, %v5363_v40  ;;  %v2086_v22 = vpop.f32.mrf.mxu1  ;;  %7166 = vst [vmem:[#allocation39_spill] sm:$0xff] %v6269_v33  ;;  %v4338_v7 = vld [vmem:[%s4898_s29 + $0xb4] sm:$0xf0] }
 0x22f   : > { %v1786_v16 = vadd.f32 %v1785_v10, %v1737_v3  ;;  %v2087_v1 = vadd.f32 %v2086_v22, %v2038_v56  ;;  %2232 = vmatmul.bf16.vlgmr.msra.gmra.mxu0 %v6260_v60  ;;  %v6282_v10 = vor.u32 %v4338_v7, %v4018_v48 }
 0x231   : > { %v2677_v30 = vmax.f32 %v1786_v16, 0.0  ;;  %2281 = vmatmul.bf16.vlgmr.msra.gmra.mxu1 %v6262_v52  ;;  %2330 = vmatmul.bf16.vlgmr.msra.gmra.mxu2 %v6009_v12 }
 0x232   : > { %2379 = vmatmul.bf16.vlgmr.msra.gmra.mxu3 %v6012_v41  ;;  %v4332_v41 = vld [vmem:[%s4898_s29 + $0x8c] sm:$0xf] }
 0x233   : > { %v6271_v4 = vmin.f32 %v2677_v30, 1.0  ;;  %v6284_v30 = vor.u32 %v4332_v41, %v4020_v34 }
 0x234   : > { %v2135_v24 = vpop.f32.mrf.mxu2  ;;  %v2039_v22 = vpop.f32.mrf.mxu0 }
 0x235   : > { %7167 = vst [vmem:[#allocation40_spill] sm:$0xff] %v6271_v4  ;;  %v2136_v17 = vadd.f32 %v2135_v24, %v2087_v1  ;;  %v2184_v56 = vpop.f32.mrf.mxu3  ;;  %v2040_v32 = vadd.f32 %v2039_v22, %v5363_v40  ;;  %v2088_v38 = vpop.f32.mrf.mxu1 }
 0x237   : > { %v6276_v29 = vadd.f32 %v2184_v56, %v2136_v17  ;;  %v2089_v12 = vadd.f32 %v2088_v38, %v2040_v32 }
 0x23c   : > { %v2137_v3 = vpop.f32.mrf.mxu2  ;;  %v2042_v1 = vpop.f32.mrf.mxu0 }
 0x23d   : > { %v2138_v62 = vadd.f32 %v2137_v3, %v2089_v12  ;;  %v2186_v16 = vpop.f32.mrf.mxu3  ;;  %v2043_v24 = vadd.f32 %v2042_v1, %v5363_v40  ;;  %v2091_v22 = vpop.f32.mrf.mxu1  ;;  %v4344_v1 = vld [vmem:[%s4898_s29 + $0xec] sm:$0xf] }
 0x23f   : > { %v6287_v17 = vadd.f32 %v2186_v16, %v2138_v62  ;;  %v2092_v56 = vadd.f32 %v2091_v22, %v2043_v24  ;;  %2237 = vmatmul.bf16.gmra.mxu0 %v6282_v10  ;;  %v4042_v62 = vld [vmem:[%s4898_s29 + $0xe8] sm:$0xf]  ;;  %v4350_v16 = vld [vmem:[%s4898_s29 + $0x114] sm:$0xf0]  ;;  %v4044_v24 = vld [vmem:[%s4898_s29 + $0x118] sm:$0xf0] }
 0x240   : > { %v6300_v63 = vor.u32 %v4350_v16, %v4042_v62  ;;  %v6302_v4 = vor.u32 %v4344_v1, %v4044_v24  ;;  %v4066_v24 = vld [vmem:[%s4898_s29 + $0x148] sm:$0xf] }
 0x241   : > { %2286 = vmatmul.bf16.gmra.mxu1 %v6284_v30  ;;  %2335 = vmatmul.bf16.gmra.mxu2 %v6047_v35 }
 0x242   : > { %2384 = vmatmul.bf16.gmra.mxu3 %v6050_v8 }
 0x244   : > { %v2140_v32 = vpop.f32.mrf.mxu2  ;;  %v2044_v48 = vpop.f32.mrf.mxu0 }
 0x245   : > { %v2141_v38 = vadd.f32 %v2140_v32, %v2092_v56  ;;  %v2189_v12 = vpop.f32.mrf.mxu3  ;;  %v2045_v7 = vadd.f32 %v2044_v48, %v5363_v40  ;;  %v2093_v41 = vpop.f32.mrf.mxu1 }
 0x247   : > { %v6294_v34 = vadd.f32 %v2189_v12, %v2141_v38  ;;  %v2094_v3 = vadd.f32 %v2093_v41, %v2045_v7 }
 0x24c   : > { %v2142_v22 = vpop.f32.mrf.mxu2  ;;  %v2047_v8 = vpop.f32.mrf.mxu0 }
 0x24d   : > { %v2143_v35 = vadd.f32 %v2142_v22, %v2094_v3  ;;  %v2191_v33 = vpop.f32.mrf.mxu3  ;;  %v2048_v56 = vadd.f32 %v2047_v8, %v5363_v40  ;;  %v4362_v22 = vld [vmem:[%s4898_s29 + $0x174] sm:$0xf0]  ;;  %v4068_v8 = vld [vmem:[%s4898_s29 + $0x178] sm:$0xf0] }
 0x24e   : > { %v2096_v32 = vpop.f32.mrf.mxu1 }
 0x24f   : > { %v6305_v38 = vadd.f32 %v2191_v33, %v2143_v35  ;;  %v2097_v12 = vadd.f32 %v2096_v32, %v2048_v56  ;;  %2242 = vmatmul.bf16.gmra.mxu0 %v6300_v63  ;;  %v4356_v35 = vld [vmem:[%s4898_s29 + $0x14c] sm:$0xf]  ;;  %v6318_v32 = vor.u32 %v4362_v22, %v4066_v24 }
 0x250   : > { %v6320_v61 = vor.u32 %v4356_v35, %v4068_v8  ;;  %v4090_v8 = vld [vmem:[%s4898_s29 + $0x1a8] sm:$0xf] }
 0x251   : > { %2291 = vmatmul.bf16.gmra.mxu1 %v6302_v4  ;;  %2340 = vmatmul.bf16.gmra.mxu2 %v6091_v59 }
 0x252   : > { %2389 = vmatmul.bf16.gmra.mxu3 %v6094_v23 }
 0x254   : > { %v2145_v48 = vpop.f32.mrf.mxu2  ;;  %v2049_v3 = vpop.f32.mrf.mxu0 }
 0x255   : > { %v2146_v7 = vadd.f32 %v2145_v48, %v2097_v12  ;;  %v2194_v41 = vpop.f32.mrf.mxu3  ;;  %v2050_v62 = vadd.f32 %v2049_v3, %v5363_v40 }
 0x256   : > { %v2098_v16 = vpop.f32.mrf.mxu1 }
 0x257   : > { %v6312_v33 = vadd.f32 %v2194_v41, %v2146_v7  ;;  %v2099_v1 = vadd.f32 %v2098_v16, %v2050_v62 }
 0x25c   : > { %v2147_v56 = vpop.f32.mrf.mxu2  ;;  %v2052_v23 = vpop.f32.mrf.mxu0 }
 0x25d   : > { %v2148_v59 = vadd.f32 %v2147_v56, %v2099_v1  ;;  %v2196_v27 = vpop.f32.mrf.mxu3  ;;  %v2053_v12 = vadd.f32 %v2052_v23, %v5363_v40  ;;  %v4374_v56 = vld [vmem:[%s4898_s29 + $0x1d4] sm:$0xf0]  ;;  %v4092_v23 = vld [vmem:[%s4898_s29 + $0x1d8] sm:$0xf0] }
 0x25e   : > { %v2101_v48 = vpop.f32.mrf.mxu1 }
 0x25f   : > { %v6323_v7 = vadd.f32 %v2196_v27, %v2148_v59  ;;  %v2102_v41 = vadd.f32 %v2101_v48, %v2053_v12  ;;  %2247 = vmatmul.bf16.gmra.mxu0 %v6318_v32  ;;  %v4368_v59 = vld [vmem:[%s4898_s29 + $0x1ac] sm:$0xf]  ;;  %v6336_v48 = vor.u32 %v4374_v56, %v4090_v8 }
 0x260   : > { %v6338_v36 = vor.u32 %v4368_v59, %v4092_v23  ;;  %v4114_v23 = vld [vmem:[%s4898_s29 + $0x208] sm:$0xf] }
 0x261   : > { %2296 = vmatmul.bf16.gmra.mxu1 %v6320_v61  ;;  %2345 = vmatmul.bf16.gmra.mxu2 %v6124_v21 }
 0x262   : > { %2394 = vmatmul.bf16.gmra.mxu3 %v6126_v54 }
 0x264   : > { %v2150_v3 = vpop.f32.mrf.mxu2  ;;  %v2054_v1 = vpop.f32.mrf.mxu0 }
 0x265   : > { %v2151_v62 = vadd.f32 %v2150_v3, %v2102_v41  ;;  %v2199_v16 = vpop.f32.mrf.mxu3  ;;  %v2055_v24 = vadd.f32 %v2054_v1, %v5363_v40 }
 0x266   : > { %v2103_v22 = vpop.f32.mrf.mxu1 }
 0x267   : > { %v6330_v27 = vadd.f32 %v2199_v16, %v2151_v62  ;;  %v2104_v35 = vadd.f32 %v2103_v22, %v2055_v24 }
 0x26c   : > { %v2152_v12 = vpop.f32.mrf.mxu2  ;;  %v2057_v54 = vpop.f32.mrf.mxu0 }
 0x26d   : > { %v2153_v21 = vadd.f32 %v2152_v12, %v2104_v35  ;;  %v2201_v20 = vpop.f32.mrf.mxu3  ;;  %v2058_v41 = vadd.f32 %v2057_v54, %v5363_v40  ;;  %v4386_v12 = vld [vmem:[%s4898_s29 + $0x234] sm:$0xf0]  ;;  %v4116_v54 = vld [vmem:[%s4898_s29 + $0x238] sm:$0xf0] }
 0x26e   : > { %v2106_v3 = vpop.f32.mrf.mxu1 }
 0x26f   : > { %v6341_v62 = vadd.f32 %v2201_v20, %v2153_v21  ;;  %v2107_v16 = vadd.f32 %v2106_v3, %v2058_v41  ;;  %2252 = vmatmul.bf16.gmra.mxu0 %v6336_v48  ;;  %v4380_v21 = vld [vmem:[%s4898_s29 + $0x20c] sm:$0xf]  ;;  %v6354_v3 = vor.u32 %v4386_v12, %v4114_v23 }
 0x270   : > { %v6356_v43 = vor.u32 %v4380_v21, %v4116_v54  ;;  %v4138_v54 = vld [vmem:[%s4898_s29 + $0x268] sm:$0xf] }
 0x271   : > { %2301 = vmatmul.bf16.gmra.mxu1 %v6338_v36  ;;  %2350 = vmatmul.bf16.gmra.mxu2 %v6152_v25 }
 0x272   : > { %2399 = vmatmul.bf16.gmra.mxu3 %v6154_v55 }
 0x274   : > { %v2155_v1 = vpop.f32.mrf.mxu2  ;;  %v2059_v35 = vpop.f32.mrf.mxu0 }
 0x275   : > { %v2156_v24 = vadd.f32 %v2155_v1, %v2107_v16  ;;  %v2204_v22 = vpop.f32.mrf.mxu3  ;;  %v2060_v8 = vadd.f32 %v2059_v35, %v5363_v40 }
 0x276   : > { %v2108_v56 = vpop.f32.mrf.mxu1 }
 0x277   : > { %v6348_v20 = vadd.f32 %v2204_v22, %v2156_v24  ;;  %v2109_v59 = vadd.f32 %v2108_v56, %v2060_v8 }
 0x27c   : > { %v2157_v41 = vpop.f32.mrf.mxu2  ;;  %v2062_v55 = vpop.f32.mrf.mxu0 }
 0x27d   : > { %v2158_v25 = vadd.f32 %v2157_v41, %v2109_v59  ;;  %v2206_v15 = vpop.f32.mrf.mxu3  ;;  %v2063_v16 = vadd.f32 %v2062_v55, %v5363_v40  ;;  %v4398_v41 = vld [vmem:[%s4898_s29 + $0x294] sm:$0xf0]  ;;  %v4140_v55 = vld [vmem:[%s4898_s29 + $0x298] sm:$0xf0] }
 0x27e   : > { %v2111_v1 = vpop.f32.mrf.mxu1 }
 0x27f   : > { %v6359_v24 = vadd.f32 %v2206_v15, %v2158_v25  ;;  %v2112_v22 = vadd.f32 %v2111_v1, %v2063_v16  ;;  %2257 = vmatmul.bf16.gmra.mxu0 %v6354_v3  ;;  %v4392_v25 = vld [vmem:[%s4898_s29 + $0x26c] sm:$0xf]  ;;  %v6372_v1 = vor.u32 %v4398_v41, %v4138_v54 }
 0x280   : > { %v6374_v39 = vor.u32 %v4392_v25, %v4140_v55  ;;  %v4162_v55 = vld [vmem:[%s4898_s29 + $0x2c8] sm:$0xf] }
 0x281   : > { %2306 = vmatmul.bf16.gmra.mxu1 %v6356_v43  ;;  %2355 = vmatmul.bf16.gmra.mxu2 %v6180_v0 }
 0x282   : > { %2404 = vmatmul.bf16.gmra.mxu3 %v6182_v5 }
 0x284   : > { %v2160_v35 = vpop.f32.mrf.mxu2  ;;  %v2064_v59 = vpop.f32.mrf.mxu0 }
 0x285   : > { %v2161_v8 = vadd.f32 %v2160_v35, %v2112_v22  ;;  %v2209_v56 = vpop.f32.mrf.mxu3  ;;  %v2065_v23 = vadd.f32 %v2064_v59, %v5363_v40 }
 0x286   : > { %v2113_v12 = vpop.f32.mrf.mxu1 }
 0x287   : > { %v6366_v15 = vadd.f32 %v2209_v56, %v2161_v8  ;;  %v2114_v21 = vadd.f32 %v2113_v12, %v2065_v23 }
 0x28c   : > { %v2162_v16 = vpop.f32.mrf.mxu2  ;;  %v2067_v5 = vpop.f32.mrf.mxu0 }
 0x28d   : > { %v2163_v0 = vadd.f32 %v2162_v16, %v2114_v21  ;;  %v2211_v11 = vpop.f32.mrf.mxu3  ;;  %v2068_v22 = vadd.f32 %v2067_v5, %v5363_v40  ;;  %v4410_v16 = vld [vmem:[%s4898_s29 + $0x2f4] sm:$0xf0]  ;;  %v4164_v5 = vld [vmem:[%s4898_s29 + $0x2f8] sm:$0xf0] }
 0x28e   : > { %v2116_v35 = vpop.f32.mrf.mxu1 }
 0x28f   : > { %v6377_v8 = vadd.f32 %v2211_v11, %v2163_v0  ;;  %v2117_v56 = vadd.f32 %v2116_v35, %v2068_v22  ;;  %2262 = vmatmul.bf16.gmra.mxu0 %v6372_v1  ;;  %v4404_v0 = vld [vmem:[%s4898_s29 + $0x2cc] sm:$0xf]  ;;  %v6390_v35 = vor.u32 %v4410_v16, %v4162_v55 }
 0x290   : > { %v6392_v49 = vor.u32 %v4404_v0, %v4164_v5 }
 0x291   : > { %2311 = vmatmul.bf16.gmra.mxu1 %v6374_v39  ;;  %2360 = vmatmul.bf16.gmra.mxu2 %v6208_v44 }
 0x292   : > { %2409 = vmatmul.bf16.gmra.mxu3 %v6210_v6 }
 0x294   : > { %v2165_v59 = vpop.f32.mrf.mxu2  ;;  %v2069_v21 = vpop.f32.mrf.mxu0 }
 0x295   : > { %v2166_v23 = vadd.f32 %v2165_v59, %v2117_v56  ;;  %v2214_v12 = vpop.f32.mrf.mxu3  ;;  %v2070_v54 = vadd.f32 %v2069_v21, %v5363_v40 }
 0x296   : > { %v2118_v41 = vpop.f32.mrf.mxu1 }
 0x297   : > { %v6384_v11 = vadd.f32 %v2214_v12, %v2166_v23  ;;  %v2119_v25 = vadd.f32 %v2118_v41, %v2070_v54 }
 0x29c   : > { %v2167_v22 = vpop.f32.mrf.mxu2  ;;  %v2072_v6 = vpop.f32.mrf.mxu0 }
 0x29d   : > { %v2168_v44 = vadd.f32 %v2167_v22, %v2119_v25  ;;  %v2216_v47 = vpop.f32.mrf.mxu3  ;;  %v2073_v56 = vadd.f32 %v2072_v6, %v5363_v40 }
 0x29e   : > { %v2121_v59 = vpop.f32.mrf.mxu1 }
 0x29f   : > { %v6395_v21 = vadd.f32 %v2216_v47, %v2168_v44  ;;  %v2122_v23 = vadd.f32 %v2121_v59, %v2073_v56  ;;  %2267 = vmatmul.bf16.gmra.mxu0 %v6390_v35 }
 0x2a1   : > { %2316 = vmatmul.bf16.gmra.mxu1 %v6392_v49  ;;  %2365 = vmatmul.bf16.gmra.mxu2 %v6236_v13 }
 0x2a2   : > { %2414 = vmatmul.bf16.gmra.mxu3 %v6238_v58 }
 0x2a4   : > { %v2170_v12 = vpop.f32.mrf.mxu2  ;;  %v2074_v25 = vpop.f32.mrf.mxu0 }
 0x2a5   : > { %v2171_v54 = vadd.f32 %v2170_v12, %v2122_v23  ;;  %v2219_v41 = vpop.f32.mrf.mxu3  ;;  %v2075_v55 = vadd.f32 %v2074_v25, %v5363_v40 }
 0x2a6   : > { %v2123_v16 = vpop.f32.mrf.mxu1 }
 0x2a7   : > { %v6402_v0 = vadd.f32 %v2219_v41, %v2171_v54  ;;  %v2124_v47 = vadd.f32 %v2123_v16, %v2075_v55 }
 0x2ac   : > { %v2172_v5 = vpop.f32.mrf.mxu2  ;;  %v2233_v6 = vpop.f32.mrf.mxu0 }
 0x2ad   : > { %v2173_v22 = vadd.f32 %v2172_v5, %v2124_v47  ;;  %v2221_v44 = vpop.f32.mrf.mxu3  ;;  %v2234_v56 = vadd.f32 %v2233_v6, %v6276_v29 }
 0x2ae   : > { %v2282_v59 = vpop.f32.mrf.mxu1 }
 0x2af   : > { %v6405_v13 = vadd.f32 %v2221_v44, %v2173_v22  ;;  %v2283_v58 = vadd.f32 %v2282_v59, %v2234_v56  ;;  %2428 = vmatmul.bf16.vlgmr.msrb.gmra.mxu0 %v6014_v19 }
 0x2b1   : > { %2477 = vmatmul.bf16.vlgmr.msrb.gmra.mxu1 %v6017_v50  ;;  %2526 = vmatmul.bf16.vlgmr.msrb.gmra.mxu2 %v6260_v60  ;;  %v2618_v55 = vmax.f32 %v2283_v58, 0.0 }
 0x2b2   : > { %2575 = vmatmul.bf16.vlgmr.msrb.gmra.mxu3 %v6262_v52 }
 0x2b3   : > { %v6415_v19 = vmin.f32 %v2618_v55, 1.0 }
 0x2b4   : > { %v2331_v40 = vpop.f32.mrf.mxu2  ;;  %v2235_v54 = vpop.f32.mrf.mxu0 }
 0x2b5   : > { %v2332_v23 = vadd.f32 %v2331_v40, %v5830_v42  ;;  %v2380_v12 = vpop.f32.mrf.mxu3  ;;  %v2236_v41 = vadd.f32 %v2235_v54, %v6287_v17 }
 0x2b6   : > { %v2284_v29 = vpop.f32.mrf.mxu1 }
 0x2b7   : > { %v6413_v25 = vadd.f32 %v2380_v12, %v2332_v23  ;;  %v2285_v16 = vadd.f32 %v2284_v29, %v2236_v41 }
 0x2b9   : > { %v2622_v47 = vmax.f32 %v2285_v16, 0.0 }
 0x2bb   : > { %v6417_v50 = vmin.f32 %v2622_v47, 1.0 }
 0x2bc   : > { %v2333_v60 = vpop.f32.mrf.mxu2  ;;  %v2238_v22 = vpop.f32.mrf.mxu0 }
 0x2bd   : > { %v2334_v52 = vadd.f32 %v2333_v60, %v5830_v42  ;;  %v2382_v5 = vpop.f32.mrf.mxu3  ;;  %v2746_v44 = vpack.c.bf16 %v6417_v50, %v6415_v19  ;;  %v2239_v17 = vadd.f32 %v2238_v22, %v6294_v34  ;;  %v7176_v19 = vld [vmem:[#allocation54_spill] sm:$0xff] }
 0x2be   : > { %v2287_v6 = vpop.f32.mrf.mxu1 }
 0x2bf   : > { %v6423_v56 = vadd.f32 %v2382_v5, %v2334_v52  ;;  %v2288_v59 = vadd.f32 %v2287_v6, %v2239_v17  ;;  %2433 = vmatmul.bf16.gmra.mxu0 %v6052_v28 }
 0x2c1   : > { %2482 = vmatmul.bf16.gmra.mxu1 %v6055_v57  ;;  %2531 = vmatmul.bf16.gmra.mxu2 %v6282_v10  ;;  %v2626_v29 = vmax.f32 %v2288_v59, 0.0 }
 0x2c2   : > { %2580 = vmatmul.bf16.gmra.mxu3 %v6284_v30 }
 0x2c3   : > { %v6433_v28 = vmin.f32 %v2626_v29, 1.0 }
 0x2c4   : > { %v2336_v58 = vpop.f32.mrf.mxu2  ;;  %v2240_v12 = vpop.f32.mrf.mxu0 }
 0x2c5   : > { %v2337_v40 = vadd.f32 %v2336_v58, %v5830_v42  ;;  %v2385_v23 = vpop.f32.mrf.mxu3  ;;  %v2241_v54 = vadd.f32 %v2240_v12, %v6305_v38 }
 0x2c6   : > { %v2289_v34 = vpop.f32.mrf.mxu1 }
 0x2c7   : > { %v6431_v41 = vadd.f32 %v2385_v23, %v2337_v40  ;;  %v2290_v55 = vadd.f32 %v2289_v34, %v2241_v54 }
 0x2c9   : > { %v2630_v16 = vmax.f32 %v2290_v55, 0.0 }
 0x2cb   : > { %v6435_v57 = vmin.f32 %v2630_v16, 1.0 }
 0x2cc   : > { %v2338_v10 = vpop.f32.mrf.mxu2  ;;  %v2243_v60 = vpop.f32.mrf.mxu0 }
 0x2cd   : > { %v2339_v30 = vadd.f32 %v2338_v10, %v5830_v42  ;;  %v2387_v47 = vpop.f32.mrf.mxu3  ;;  %v2244_v52 = vadd.f32 %v2243_v60, %v6312_v33  ;;  %v2750_v38 = vpack.c.bf16 %v6435_v57, %v6433_v28 }
 0x2ce   : > { %v2292_v5 = vpop.f32.mrf.mxu1 }
 0x2cf   : > { %v6441_v22 = vadd.f32 %v2387_v47, %v2339_v30  ;;  %v2293_v17 = vadd.f32 %v2292_v5, %v2244_v52  ;;  %2438 = vmatmul.bf16.gmra.mxu0 %v6096_v53 }
 0x2d1   : > { %2487 = vmatmul.bf16.gmra.mxu1 %v6099_v9  ;;  %2536 = vmatmul.bf16.gmra.mxu2 %v6300_v63  ;;  %v2634_v54 = vmax.f32 %v2293_v17, 0.0 }
 0x2d2   : > { %2585 = vmatmul.bf16.gmra.mxu3 %v6302_v4 }
 0x2d3   : > { %v6451_v53 = vmin.f32 %v2634_v54, 1.0  ;;  %v4514_v54 = vld [vmem:[%s6828_s3 + $0x38] sm:$0xff] }
 0x2d4   : > { %v2341_v6 = vpop.f32.mrf.mxu2  ;;  %v2245_v33 = vpop.f32.mrf.mxu0  ;;  %3036 = vmatpush.bf16.msra.mxu0 %v4514_v54 }
 0x2d5   : > { %v2342_v59 = vadd.f32 %v2341_v6, %v5830_v42  ;;  %v2390_v58 = vpop.f32.mrf.mxu3  ;;  %v2246_v40 = vadd.f32 %v2245_v33, %v6323_v7 }
 0x2d6   : > { %v2294_v23 = vpop.f32.mrf.mxu1 }
 0x2d7   : > { %v6449_v12 = vadd.f32 %v2390_v58, %v2342_v59  ;;  %v2295_v34 = vadd.f32 %v2294_v23, %v2246_v40 }
 0x2d9   : > { %v2638_v29 = vmax.f32 %v2295_v34, 0.0 }
 0x2db   : > { %v6453_v9 = vmin.f32 %v2638_v29, 1.0 }
 0x2dc   : > { %v2343_v63 = vpop.f32.mrf.mxu2  ;;  %v2248_v16 = vpop.f32.mrf.mxu0 }
 0x2dd   : > { %v2344_v4 = vadd.f32 %v2343_v63, %v5830_v42  ;;  %v2392_v55 = vpop.f32.mrf.mxu3  ;;  %v2249_v10 = vadd.f32 %v2248_v16, %v6330_v27  ;;  %v2754_v7 = vpack.c.bf16 %v6453_v9, %v6451_v53 }
 0x2de   : > { %v2297_v30 = vpop.f32.mrf.mxu1 }
 0x2df   : > { %v6459_v47 = vadd.f32 %v2392_v55, %v2344_v4  ;;  %v2298_v60 = vadd.f32 %v2297_v30, %v2249_v10  ;;  %2443 = vmatmul.bf16.gmra.mxu0 %v6128_v31  ;;  %v4522_v4 = vld [vmem:[%s6828_s3 + $0x78] sm:$0xff] }
 0x2e0   : > { %3085 = vmatpush.bf16.msra.mxu1 %v4522_v4  ;;  %v4511_v4 = vld [vmem:[%s6828_s3 + $0x20] sm:$0xff] }
 0x2e1   : > { %2492 = vmatmul.bf16.gmra.mxu1 %v6131_v51  ;;  %2541 = vmatmul.bf16.gmra.mxu2 %v6318_v32  ;;  %v2642_v33 = vmax.f32 %v2298_v60, 0.0 }
 0x2e2   : > { %2590 = vmatmul.bf16.gmra.mxu3 %v6320_v61  ;;  %v4530_v61 = vld [vmem:[%s6828_s3 + $0xb8] sm:$0xff] }
 0x2e3   : > { %v6469_v31 = vmin.f32 %v2642_v33, 1.0  ;;  %3134 = vmatpush.bf16.msra.mxu2 %v4530_v61 }
 0x2e4   : > { %v2346_v52 = vpop.f32.mrf.mxu2  ;;  %v2250_v27 = vpop.f32.mrf.mxu0 }
 0x2e5   : > { %v2347_v5 = vadd.f32 %v2346_v52, %v5830_v42  ;;  %v2395_v17 = vpop.f32.mrf.mxu3  ;;  %v2251_v6 = vadd.f32 %v2250_v27, %v6341_v62  ;;  %v4538_v62 = vld [vmem:[%s6828_s3 + $0xf8] sm:$0xff]  ;;  %v4513_v27 = vld [vmem:[%s6828_s3 + $0x30] sm:$0xff] }
 0x2e6   : > { %v2299_v59 = vpop.f32.mrf.mxu1  ;;  %3183 = vmatpush.bf16.msra.mxu3 %v4538_v62  ;;  %3037 = vmatpush.bf16.msra.mxu0 %v4513_v27  ;;  %v4526_v27 = vld [vmem:[%s6828_s3 + $0x98] sm:$0xff] }
 0x2e7   : > { %v6467_v58 = vadd.f32 %v2395_v17, %v2347_v5  ;;  %v2300_v40 = vadd.f32 %v2299_v59, %v2251_v6  ;;  %v4521_v6 = vld [vmem:[%s6828_s3 + $0x70] sm:$0xff] }
 0x2e8   : > { %3086 = vmatpush.bf16.msra.mxu1 %v4521_v6 }
 0x2e9   : > { %v2646_v23 = vmax.f32 %v2300_v40, 0.0  ;;  %v4512_v40 = vld [vmem:[%s6828_s3 + $0x28] sm:$0xff] }
 0x2ea   : > { %3038 = vmatpush.bf16.msra.mxu0 %v4512_v40 }
 0x2eb   : > { %v6471_v51 = vmin.f32 %v2646_v23, 1.0  ;;  %v4520_v23 = vld [vmem:[%s6828_s3 + $0x68] sm:$0xff] }
 0x2ec   : > { %v2348_v32 = vpop.f32.mrf.mxu2  ;;  %v2253_v63 = vpop.f32.mrf.mxu0  ;;  %3087 = vmatpush.bf16.msra.mxu1 %v4520_v23 }
 0x2ed   : > { %v2349_v34 = vadd.f32 %v2348_v32, %v5830_v42  ;;  %v2397_v29 = vpop.f32.mrf.mxu3  ;;  %v2254_v55 = vadd.f32 %v2253_v63, %v6348_v20  ;;  %v2758_v10 = vpack.c.bf16 %v6471_v51, %v6469_v31 }
 0x2ee   : > { %v2302_v16 = vpop.f32.mrf.mxu1  ;;  %3039 = vmatpush.bf16.msra.mxu0 %v4511_v4 }
 0x2ef   : > { %v6489_v30 = vadd.f32 %v2397_v29, %v2349_v34  ;;  %v2303_v60 = vadd.f32 %v2302_v16, %v2254_v55  ;;  %2448 = vmatmul.bf16.gmra.mxu0 %v6156_v2  ;;  %v4529_v2 = vld [vmem:[%s6828_s3 + $0xb0] sm:$0xff]  ;;  %v4519_v55 = vld [vmem:[%s6828_s3 + $0x60] sm:$0xff] }
 0x2f0   : > { %3135 = vmatpush.bf16.msra.mxu2 %v4529_v2  ;;  %v4537_v34 = vld [vmem:[%s6828_s3 + $0xf0] sm:$0xff]  ;;  %v4527_v16 = vld [vmem:[%s6828_s3 + $0xa0] sm:$0xff]  ;;  %3088 = vmatpush.bf16.msra.mxu1 %v4519_v55 }
 0x2f1   : > { %2497 = vmatmul.bf16.gmra.mxu1 %v6159_v18  ;;  %2546 = vmatmul.bf16.gmra.mxu2 %v6336_v48  ;;  %v2650_v59 = vmax.f32 %v2303_v60, 0.0  ;;  %v4509_v2 = vld [vmem:[%s6828_s3 + $0x10] sm:$0xff] }
 0x2f2   : > { %2595 = vmatmul.bf16.gmra.mxu3 %v6338_v36 }
 0x2f3   : > { %v6517_v61 = vmin.f32 %v2650_v59, 1.0  ;;  %3184 = vmatpush.bf16.msra.mxu3 %v4537_v34 }
 0x2f4   : > { %v2351_v20 = vpop.f32.mrf.mxu2  ;;  %v2255_v17 = vpop.f32.mrf.mxu0 }
 0x2f5   : > { %v2352_v52 = vadd.f32 %v2351_v20, %v5830_v42  ;;  %v2400_v5 = vpop.f32.mrf.mxu3  ;;  %v2256_v18 = vadd.f32 %v2255_v17, %v6359_v24  ;;  %v4528_v24 = vld [vmem:[%s6828_s3 + $0xa8] sm:$0xff]  ;;  %v4510_v17 = vld [vmem:[%s6828_s3 + $0x18] sm:$0xff] }
 0x2f6   : > { %v2304_v36 = vpop.f32.mrf.mxu1  ;;  %3136 = vmatpush.bf16.msra.mxu2 %v4528_v24  ;;  %3040 = vmatpush.bf16.msra.mxu0 %v4510_v17  ;;  %v4508_v24 = vld [vmem:[%s6828_s3 + $0x8] sm:$0xff]  ;;  %v4515_v17 = vld [vmem:[%s6828_s3 + $0x40] sm:$0xff] }
 0x2f7   : > { %v6506_v48 = vadd.f32 %v2400_v5, %v2352_v52  ;;  %v2305_v33 = vadd.f32 %v2304_v36, %v2256_v18  ;;  %v4517_v18 = vld [vmem:[%s6828_s3 + $0x50] sm:$0xff] }
 0x2f9   : > { %v2654_v32 = vmax.f32 %v2305_v33, 0.0 }
 0x2fa   : > { %3137 = vmatpush.bf16.msra.mxu2 %v4527_v16  ;;  %3041 = vmatpush.bf16.msra.mxu0 %v4509_v2  ;;  %v4536_v16 = vld [vmem:[%s6828_s3 + $0xe8] sm:$0xff] }
 0x2fb   : > { %v6519_v54 = vmin.f32 %v2654_v32, 1.0  ;;  %v4516_v32 = vld [vmem:[%s6828_s3 + $0x48] sm:$0xff]  ;;  %3185 = vmatpush.bf16.msra.mxu3 %v4536_v16 }
 0x2fc   : > { %v6521_v62 = vpop.f32.mrf.mxu2  ;;  %v2258_v63 = vpop.f32.mrf.mxu0 }
 0x2fd   : > { %v6526_v29 = vpop.f32.mrf.mxu3  ;;  %v2259_v60 = vadd.f32 %v2258_v63, %v6366_v15  ;;  %v2762_v52 = vpack.c.bf16 %v6519_v54, %v6517_v61  ;;  %v4518_v15 = vld [vmem:[%s6828_s3 + $0x58] sm:$0xff] }
 0x2fe   : > { %v2307_v20 = vpop.f32.mrf.mxu1  ;;  %3089 = vmatpush.bf16.msra.mxu1 %v4518_v15  ;;  %3138 = vmatpush.bf16.msra.mxu2 %v4526_v27  ;;  %v4523_v15 = vld [vmem:[%s6828_s3 + $0x80] sm:$0xff] }
 0x2ff   : > { %v2308_v5 = vadd.f32 %v2307_v20, %v2259_v60  ;;  %2453 = vmatmul.bf16.gmra.mxu0 %v6184_v26 }
 0x300   : > { %3042 = vmatpush.bf16.msra.mxu0 %v4508_v24 }
 0x301   : > { %2502 = vmatmul.bf16.gmra.mxu1 %v6187_v37  ;;  %2551 = vmatmul.bf16.gmra.mxu2 %v6354_v3  ;;  %v2658_v40 = vmax.f32 %v2308_v5, 0.0  ;;  %v4507_v5 = vld [vmem:[%s6828_s3] sm:$0xff] }
 0x302   : > { %2600 = vmatmul.bf16.gmra.mxu3 %v6356_v43  ;;  %v4525_v43 = vld [vmem:[%s6828_s3 + $0x90] sm:$0xff]  ;;  %3090 = vmatpush.bf16.msra.mxu1 %v4517_v18 }
 0x303   : > { %3139 = vmatpush.bf16.msra.mxu2 %v4525_v43  ;;  %v6575_v63 = vmin.f32 %v2658_v40, 1.0 }
 0x304   : > { %v2356_v26 = vpop.f32.mrf.mxu2  ;;  %v2260_v6 = vpop.f32.mrf.mxu0  ;;  %3043 = vmatpush.bf16.msra.mxu0 %v4507_v5 }
 0x305   : > { %v2357_v37 = vadd.f32 %v2356_v26, %v5830_v42  ;;  %v2405_v3 = vpop.f32.mrf.mxu3  ;;  %v2261_v36 = vadd.f32 %v2260_v6, %v6377_v8  ;;  %v4524_v8 = vld [vmem:[%s6828_s3 + $0x88] sm:$0xff] }
 0x306   : > { %v2309_v59 = vpop.f32.mrf.mxu1  ;;  %3091 = vmatpush.bf16.msra.mxu1 %v4516_v32 }
 0x307   : > { %v6564_v33 = vadd.f32 %v2405_v3, %v2357_v37  ;;  %v2310_v23 = vadd.f32 %v2309_v59, %v2261_v36  ;;  %3140 = vmatpush.bf16.msra.mxu2 %v4524_v8 }
 0x309   : > { %v2662_v34 = vmax.f32 %v2310_v23, 0.0  ;;  %v4533_v23 = vld [vmem:[%s6828_s3 + $0xd0] sm:$0xff] }
 0x30a   : > { %3092 = vmatpush.bf16.msra.mxu1 %v4515_v17  ;;  %v4532_v17 = vld [vmem:[%s6828_s3 + $0xc8] sm:$0xff] }
 0x30b   : > { %v6577_v4 = vmin.f32 %v2662_v34, 1.0  ;;  %3141 = vmatpush.bf16.msra.mxu2 %v4523_v15 }
 0x30c   : > { %v6579_v55 = vpop.f32.mrf.mxu2  ;;  %v2263_v20 = vpop.f32.mrf.mxu0 }
 0x30d   : > { %v6584_v60 = vpop.f32.mrf.mxu3  ;;  %v2264_v27 = vadd.f32 %v2263_v20, %v6384_v11  ;;  %v2766_v37 = vpack.c.bf16 %v6577_v4, %v6575_v63  ;;  %v4535_v11 = vld [vmem:[%s6828_s3 + $0xe0] sm:$0xff] }
 0x30e   : > { %v2312_v26 = vpop.f32.mrf.mxu1  ;;  %3186 = vmatpush.bf16.msra.mxu3 %v4535_v11 }
 0x30f   : > { %v2313_v3 = vadd.f32 %v2312_v26, %v2264_v27  ;;  %2458 = vmatmul.bf16.gmra.mxu0 %v6212_v45  ;;  %v7168_v27 = vld [vmem:[#allocation36_spill] sm:$0xff] }
 0x311   : > { %2507 = vmatmul.bf16.gmra.mxu1 %v6215_v14  ;;  %2556 = vmatmul.bf16.gmra.mxu2 %v6372_v1  ;;  %v4534_v14 = vld [vmem:[%s6828_s3 + $0xd8] sm:$0xff] }
 0x312   : > { %2605 = vmatmul.bf16.gmra.mxu3 %v6374_v39  ;;  %v2666_v39 = vmax.f32 %v2313_v3, 0.0 }
 0x313   : > { %3187 = vmatpush.bf16.msra.mxu3 %v4534_v14 }
 0x314   : > { %v2361_v6 = vpop.f32.mrf.mxu2  ;;  %v2265_v43 = vpop.f32.mrf.mxu0  ;;  %v6615_v24 = vmin.f32 %v2666_v39, 1.0 }
 0x315   : > { %v2362_v2 = vadd.f32 %v2361_v6, %v5830_v42  ;;  %v2410_v18 = vpop.f32.mrf.mxu3  ;;  %v2266_v36 = vadd.f32 %v2265_v43, %v6395_v21 }
 0x316   : > { %v2314_v45 = vpop.f32.mrf.mxu1 }
 0x317   : > { %v6607_v59 = vadd.f32 %v2410_v18, %v2362_v2  ;;  %v2315_v1 = vadd.f32 %v2314_v45, %v2266_v36  ;;  %3188 = vmatpush.bf16.msra.mxu3 %v4533_v23  ;;  %v7169_v23 = vld [vmem:[#allocation6_spill] sm:$0xff] }
 0x319   : > { %v2670_v40 = vmax.f32 %v2315_v1, 0.0 }
 0x31b   : > { %v6617_v32 = vmin.f32 %v2670_v40, 1.0  ;;  %3189 = vmatpush.bf16.msra.mxu3 %v4532_v17  ;;  %v7172_v17 = vld [vmem:[#allocation25_spill] sm:$0xff] }
 0x31c   : > { %v6619_v21 = vpop.f32.mrf.mxu2  ;;  %v2268_v34 = vpop.f32.mrf.mxu0 }
 0x31d   : > { %v6621_v8 = vpop.f32.mrf.mxu3  ;;  %v2269_v16 = vadd.f32 %v2268_v34, %v6402_v0  ;;  %v2770_v5 = vpack.c.bf16 %v6617_v32, %v6615_v24  ;;  %v4531_v0 = vld [vmem:[%s6828_s3 + $0xc0] sm:$0xff]  ;;  %v7170_v34 = vld [vmem:[#allocation5_spill] sm:$0xff] }
 0x31e   : > { %v2317_v20 = vpop.f32.mrf.mxu1 }
 0x31f   : > { %v2318_v15 = vadd.f32 %v2317_v20, %v2269_v16  ;;  %2463 = vmatmul.bf16.gmra.mxu0 %v6240_v46  ;;  %3190 = vmatpush.bf16.msra.mxu3 %v4531_v0  ;;  %v7171_v16 = vpack.c.bf16 %v7169_v23, %v7170_v34 }
 0x321   : > { %2512 = vmatmul.bf16.gmra.mxu1 %v7168_v27  ;;  %2561 = vmatmul.bf16.gmra.mxu2 %v6390_v35  ;;  %v2674_v43 = vmax.f32 %v2318_v15, 0.0  ;;  %v7173_v15 = vld [vmem:[#allocation24_spill] sm:$0xff] }
 0x322   : > { %2610 = vmatmul.bf16.gmra.mxu3 %v6392_v49  ;;  %v7174_v27 = vpack.c.bf16 %v7172_v17, %v7173_v15  ;;  %v7175_v15 = vld [vmem:[#allocation53_spill] sm:$0xff] }
 0x323   : > { %v6640_v49 = vmin.f32 %v2674_v43, 1.0  ;;  %v7177_v50 = vpack.c.bf16 %v7175_v15, %v7176_v19  ;;  %v7182_v19 = vld [vmem:[#allocation55_spill] sm:$0xff] }
 0x324   : > { %v2366_v26 = vpop.f32.mrf.mxu2  ;;  %v2270_v6 = vpop.f32.mrf.mxu0 }
 0x325   : > { %v2367_v3 = vadd.f32 %v2366_v26, %v5830_v42  ;;  %v2415_v11 = vpop.f32.mrf.mxu3  ;;  %v2271_v2 = vadd.f32 %v2270_v6, %v6405_v13 }
 0x326   : > { %v2319_v18 = vpop.f32.mrf.mxu1 }
 0x327   : > { %v6638_v46 = vadd.f32 %v2415_v11, %v2367_v3  ;;  %v2320_v35 = vadd.f32 %v2319_v18, %v2271_v2 }
 0x329   : > { %v2678_v36 = vmax.f32 %v2320_v35, 0.0 }
 0x32b   : > { %v6642_v45 = vmin.f32 %v2678_v36, 1.0 }
 0x32c   : > { %v6644_v14 = vpop.f32.mrf.mxu2  ;;  %v2429_v1 = vpop.f32.mrf.mxu0 }
 0x32d   : > { %v6646_v39 = vpop.f32.mrf.mxu3  ;;  %v2774_v13 = vpack.c.bf16 %v6642_v45, %v6640_v49  ;;  %v2430_v20 = vadd.f32 %v2429_v1, %v6413_v25 }
 0x32e   : > { %v2478_v40 = vpop.f32.mrf.mxu1 }
 0x32f   : > { %3044 = vmatmul.bf16.vlgmr.msra.gmra.mxu0 %v7171_v16  ;;  %v2479_v26 = vadd.f32 %v2478_v40, %v2430_v20  ;;  %v7178_v20 = vld [vmem:[#allocation29_spill] sm:$0xff] }
 0x331   : > { %3093 = vmatmul.bf16.vlgmr.msra.gmra.mxu1 %v7174_v27  ;;  %3142 = vmatmul.bf16.vlgmr.msra.gmra.mxu2 %v2746_v44  ;;  %v7179_v27 = vld [vmem:[#allocation26_spill] sm:$0xff] }
 0x334   : > { %v2527_v0 = vpop.f32.mrf.mxu2  ;;  %v2431_v11 = vpop.f32.mrf.mxu0 }
 0x335   : > { %v2576_v3 = vpop.f32.mrf.mxu3  ;;  %v2528_v2 = vadd.f32 %v2527_v0, %v2479_v26  ;;  %v2432_v18 = vadd.f32 %v2431_v11, %v6423_v56  ;;  %v7180_v0 = vpack.c.bf16 %v7178_v20, %v7179_v27  ;;  %v7185_v20 = vld [vmem:[#allocation7_spill] sm:$0xff] }
 0x336   : > { %v2480_v6 = vpop.f32.mrf.mxu1 }
 0x337   : > { %v2577_v43 = vadd.f32 %v2576_v3, %v2528_v2  ;;  %v2481_v35 = vadd.f32 %v2480_v6, %v2432_v18 }
 0x339   : > { %v2619_v16 = vmax.f32 %v2577_v43, 0.0 }
 0x33b   : > { %v2683_v56 = vmin.f32 %v2619_v16, 1.0  ;;  %v7181_v16 = vld [vmem:[#allocation3_spill] sm:$0xff] }
 0x33c   : > { %v2529_v36 = vpop.f32.mrf.mxu2  ;;  %v2434_v23 = vpop.f32.mrf.mxu0 }
 0x33d   : > { %v2530_v25 = vadd.f32 %v2529_v36, %v2481_v35  ;;  %v2578_v1 = vpop.f32.mrf.mxu3  ;;  %v2435_v40 = vadd.f32 %v2434_v23, %v6431_v41 }
 0x33e   : > { %v2483_v34 = vpop.f32.mrf.mxu1 }
 0x33f   : > { %v2579_v17 = vadd.f32 %v2578_v1, %v2530_v25  ;;  %3049 = vmatmul.bf16.gmra.mxu0 %v7177_v50  ;;  %v2484_v6 = vadd.f32 %v2483_v34, %v2435_v40  ;;  %v7183_v50 = vpack.c.bf16 %v7181_v16, %v7182_v19  ;;  %v7184_v40 = vld [vmem:[#allocation30_spill] sm:$0xff]  ;;  %v7191_v16 = vld [vmem:[#allocation8_spill] sm:$0xff] }
 0x341   : > { %v2623_v44 = vmax.f32 %v2579_v17, 0.0  ;;  %3098 = vmatmul.bf16.gmra.mxu1 %v7180_v0  ;;  %3147 = vmatmul.bf16.gmra.mxu2 %v2750_v38 }
 0x343   : > { %v2687_v26 = vmin.f32 %v2623_v44, 1.0 }
 0x344   : > { %v2532_v3 = vpop.f32.mrf.mxu2  ;;  %v2436_v18 = vpop.f32.mrf.mxu0 }
 0x345   : > { %v2747_v11 = vpack.c.bf16 %v2687_v26, %v2683_v56  ;;  %v2581_v2 = vpop.f32.mrf.mxu3  ;;  %v2533_v35 = vadd.f32 %v2532_v3, %v2484_v6  ;;  %v2437_v36 = vadd.f32 %v2436_v18, %v6441_v22  ;;  %v7186_v22 = vpack.c.bf16 %v7184_v40, %v7185_v20 }
 0x346   : > { %v2485_v43 = vpop.f32.mrf.mxu1 }
 0x347   : > { %3191 = vmatmul.bf16.vlgmr.msra.gmra.mxu3 %v2747_v11  ;;  %v2582_v41 = vadd.f32 %v2581_v2, %v2533_v35  ;;  %v2486_v25 = vadd.f32 %v2485_v43, %v2437_v36 }
 0x349   : > { %v2627_v57 = vmax.f32 %v2582_v41, 0.0 }
 0x34b   : > { %v2691_v27 = vmin.f32 %v2627_v57, 1.0 }
 0x34c   : > { %v2534_v1 = vpop.f32.mrf.mxu2  ;;  %v2439_v15 = vpop.f32.mrf.mxu0 }
 0x34d   : > { %v2535_v23 = vadd.f32 %v2534_v1, %v2486_v25  ;;  %v2583_v17 = vpop.f32.mrf.mxu3  ;;  %v2440_v44 = vadd.f32 %v2439_v15, %v6449_v12 }
 0x34e   : > { %v2488_v28 = vpop.f32.mrf.mxu1 }
 0x34f   : > { %v2584_v38 = vadd.f32 %v2583_v17, %v2535_v23  ;;  %3054 = vmatmul.bf16.gmra.mxu0 %v7183_v50  ;;  %v2489_v26 = vadd.f32 %v2488_v28, %v2440_v44  ;;  %v7187_v23 = vld [vmem:[#allocation11_spill] sm:$0xff]  ;;  %v7188_v17 = vld [vmem:[#allocation4_spill] sm:$0xff] }
 0x350   : > { %v7189_v15 = vpack.c.bf16 %v7187_v23, %v7188_v17 }
 0x351   : > { %v2631_v34 = vmax.f32 %v2584_v38, 0.0  ;;  %3103 = vmatmul.bf16.gmra.mxu1 %v7186_v22  ;;  %3152 = vmatmul.bf16.gmra.mxu2 %v2754_v7  ;;  %v7190_v38 = vld [vmem:[#allocation56_spill] sm:$0xff] }
 0x353   : > { %v2695_v0 = vmin.f32 %v2631_v34, 1.0 }
 0x354   : > { %v2537_v56 = vpop.f32.mrf.mxu2  ;;  %v2441_v11 = vpop.f32.mrf.mxu0 }
 0x355   : > { %v2586_v3 = vpop.f32.mrf.mxu3  ;;  %v2751_v6 = vpack.c.bf16 %v2695_v0, %v2691_v27  ;;  %v2538_v18 = vadd.f32 %v2537_v56, %v2489_v26  ;;  %v2442_v43 = vadd.f32 %v2441_v11, %v6459_v47  ;;  %v7192_v47 = vpack.c.bf16 %v7190_v38, %v7191_v16 }
 0x356   : > { %v2490_v2 = vpop.f32.mrf.mxu1 }
 0x357   : > { %3196 = vmatmul.bf16.gmra.mxu3 %v2751_v6  ;;  %v2587_v12 = vadd.f32 %v2586_v3, %v2538_v18  ;;  %v2491_v35 = vadd.f32 %v2490_v2, %v2442_v43  ;;  %v7193_v18 = vld [vmem:[#allocation13_spill] sm:$0xff]  ;;  %v7194_v43 = vld [vmem:[#allocation12_spill] sm:$0xff] }
 0x359   : > { %v2635_v9 = vmax.f32 %v2587_v12, 0.0  ;;  %v7195_v12 = vpack.c.bf16 %v7193_v18, %v7194_v43 }
 0x35b   : > { %v2699_v19 = vmin.f32 %v2635_v9, 1.0 }
 0x35c   : > { %v2539_v36 = vpop.f32.mrf.mxu2  ;;  %v2444_v1 = vpop.f32.mrf.mxu0 }
 0x35d   : > { %v2540_v41 = vadd.f32 %v2539_v36, %v2491_v35  ;;  %v2588_v25 = vpop.f32.mrf.mxu3  ;;  %v2445_v57 = vadd.f32 %v2444_v1, %v6467_v58  ;;  %v2354_v35 = vadd.f32 %v6521_v62, %v5830_v42 }
 0x35e   : > { %v2493_v53 = vpop.f32.mrf.mxu1 }
 0x35f   : > { %v2589_v7 = vadd.f32 %v2588_v25, %v2540_v41  ;;  %3059 = vmatmul.bf16.gmra.mxu0 %v7189_v15  ;;  %v2494_v44 = vadd.f32 %v2493_v53, %v2445_v57  ;;  %v7196_v41 = vld [vmem:[#allocation27_spill] sm:$0xff]  ;;  %v7197_v25 = vld [vmem:[#allocation57_spill] sm:$0xff]  ;;  %v2403_v23 = vadd.f32 %v6526_v29, %v2354_v35 }
 0x360   : > { %v7198_v1 = vpack.c.bf16 %v7196_v41, %v7197_v25 }
 0x361   : > { %v2639_v28 = vmax.f32 %v2589_v7, 0.0  ;;  %3108 = vmatmul.bf16.gmra.mxu1 %v7192_v47  ;;  %3157 = vmatmul.bf16.gmra.mxu2 %v2758_v10 }
 0x363   : > { %v2703_v50 = vmin.f32 %v2639_v28, 1.0 }
 0x364   : > { %v2542_v34 = vpop.f32.mrf.mxu2  ;;  %v2446_v20 = vpop.f32.mrf.mxu0 }
 0x365   : > { %v2591_v40 = vpop.f32.mrf.mxu3  ;;  %v2755_v22 = vpack.c.bf16 %v2703_v50, %v2699_v19  ;;  %v2543_v0 = vadd.f32 %v2542_v34, %v2494_v44  ;;  %v2447_v56 = vadd.f32 %v2446_v20, %v6489_v30  ;;  %v7200_v20 = vld [vmem:[#allocation14_spill] sm:$0xff] }
 0x366   : > { %v2495_v27 = vpop.f32.mrf.mxu1 }
 0x367   : > { %3201 = vmatmul.bf16.gmra.mxu3 %v2755_v22  ;;  %v2592_v58 = vadd.f32 %v2591_v40, %v2543_v0  ;;  %v2496_v26 = vadd.f32 %v2495_v27, %v2447_v56  ;;  %v7199_v40 = vld [vmem:[#allocation17_spill] sm:$0xff]  ;;  %v2359_v22 = vadd.f32 %v6579_v55, %v5830_v42  ;;  %v7202_v56 = vld [vmem:[#allocation35_spill] sm:$0xff] }
 0x368   : > { %v7201_v29 = vpack.c.bf16 %v7199_v40, %v7200_v20 }
 0x369   : > { %v2643_v51 = vmax.f32 %v2592_v58, 0.0  ;;  %v7203_v58 = vld [vmem:[#allocation28_spill] sm:$0xff] }
 0x36b   : > { %v2707_v53 = vmin.f32 %v2643_v51, 1.0 }
 0x36c   : > { %v2544_v3 = vpop.f32.mrf.mxu2  ;;  %v2449_v2 = vpop.f32.mrf.mxu0 }
 0x36d   : > { %v2545_v11 = vadd.f32 %v2544_v3, %v2496_v26  ;;  %v2593_v6 = vpop.f32.mrf.mxu3  ;;  %v2450_v30 = vadd.f32 %v2449_v2, %v6506_v48  ;;  %v7204_v26 = vpack.c.bf16 %v7202_v56, %v7203_v58  ;;  %v2408_v2 = vadd.f32 %v6584_v60, %v2359_v22  ;;  %v7212_v22 = vld [vmem:[#allocation20_spill] sm:$0xff] }
 0x36e   : > { %v2498_v31 = vpop.f32.mrf.mxu1  ;;  %v7214_v58 = vld [vmem:[#allocation40_spill] sm:$0xff] }
 0x36f   : > { %v2594_v10 = vadd.f32 %v2593_v6, %v2545_v11  ;;  %3064 = vmatmul.bf16.gmra.mxu0 %v7195_v12  ;;  %v2499_v17 = vadd.f32 %v2498_v31, %v2450_v30 }
 0x371   : > { %v2647_v36 = vmax.f32 %v2594_v10, 0.0  ;;  %3113 = vmatmul.bf16.gmra.mxu1 %v7198_v1  ;;  %3162 = vmatmul.bf16.gmra.mxu2 %v2762_v52  ;;  %v7205_v1 = vld [vmem:[#allocation19_spill] sm:$0xff] }
 0x373   : > { %v2711_v9 = vmin.f32 %v2647_v36, 1.0 }
 0x374   : > { %v2547_v7 = vpop.f32.mrf.mxu2  ;;  %v2451_v28 = vpop.f32.mrf.mxu0 }
 0x375   : > { %v2596_v15 = vpop.f32.mrf.mxu3  ;;  %v2759_v62 = vpack.c.bf16 %v2711_v9, %v2707_v53  ;;  %v2548_v38 = vadd.f32 %v2547_v7, %v2499_v17  ;;  %v2452_v48 = vadd.f32 %v2451_v28, %v2403_v23  ;;  %v7206_v53 = vld [vmem:[#allocation18_spill] sm:$0xff]  ;;  %v2364_v9 = vadd.f32 %v6619_v21, %v5830_v42 }
 0x376   : > { %v2500_v57 = vpop.f32.mrf.mxu1  ;;  %v7207_v60 = vpack.c.bf16 %v7205_v1, %v7206_v53  ;;  %v7208_v17 = vld [vmem:[#allocation34_spill] sm:$0xff] }
 0x377   : > { %3206 = vmatmul.bf16.gmra.mxu3 %v2759_v62  ;;  %v2597_v16 = vadd.f32 %v2596_v15, %v2548_v38  ;;  %v2501_v47 = vadd.f32 %v2500_v57, %v2452_v48  ;;  %v7209_v15 = vld [vmem:[#allocation33_spill] sm:$0xff]  ;;  %v2413_v48 = vadd.f32 %v6621_v8, %v2364_v9 }
 0x378   : > { %v7210_v28 = vpack.c.bf16 %v7208_v17, %v7209_v15 }
 0x379   : > { %v2651_v52 = vmax.f32 %v2597_v16, 0.0 }
 0x37b   : > { %v2715_v3 = vmin.f32 %v2651_v52, 1.0 }
 0x37c   : > { %v2549_v19 = vpop.f32.mrf.mxu2  ;;  %v2454_v61 = vpop.f32.mrf.mxu0 }
 0x37d   : > { %v2550_v50 = vadd.f32 %v2549_v19, %v2501_v47  ;;  %v2598_v34 = vpop.f32.mrf.mxu3  ;;  %v2455_v0 = vadd.f32 %v2454_v61, %v6564_v33 }
 0x37e   : > { %v2503_v54 = vpop.f32.mrf.mxu1 }
 0x37f   : > { %v2599_v44 = vadd.f32 %v2598_v34, %v2550_v50  ;;  %3069 = vmatmul.bf16.gmra.mxu0 %v7201_v29  ;;  %v2504_v51 = vadd.f32 %v2503_v54, %v2455_v0  ;;  %v7211_v29 = vld [vmem:[#allocation23_spill] sm:$0xff] }
 0x380   : > { %v7213_v8 = vpack.c.bf16 %v7211_v29, %v7212_v22 }
 0x381   : > { %v2655_v27 = vmax.f32 %v2599_v44, 0.0  ;;  %3118 = vmatmul.bf16.gmra.mxu1 %v7204_v26  ;;  %3167 = vmatmul.bf16.gmra.mxu2 %v2766_v37  ;;  %v7215_v26 = vld [vmem:[#allocation39_spill] sm:$0xff] }
 0x383   : > { %v2719_v11 = vmin.f32 %v2655_v27, 1.0  ;;  %v2369_v27 = vadd.f32 %v6644_v14, %v5830_v42 }
 0x384   : > { %v2552_v6 = vpop.f32.mrf.mxu2  ;;  %v2456_v55 = vpop.f32.mrf.mxu0 }
 0x385   : > { %v2763_v31 = vpack.c.bf16 %v2719_v11, %v2715_v3  ;;  %v2601_v10 = vpop.f32.mrf.mxu3  ;;  %v2553_v43 = vadd.f32 %v2552_v6, %v2504_v51  ;;  %v2457_v33 = vadd.f32 %v2456_v55, %v2408_v2  ;;  %v7216_v3 = vpack.c.bf16 %v7214_v58, %v7215_v26 }
 0x386   : > { %v2505_v18 = vpop.f32.mrf.mxu1 }
 0x387   : > { %3211 = vmatmul.bf16.gmra.mxu3 %v2763_v31  ;;  %v2602_v12 = vadd.f32 %v2601_v10, %v2553_v43  ;;  %v2506_v35 = vadd.f32 %v2505_v18, %v2457_v33  ;;  %v2418_v31 = vadd.f32 %v6646_v39, %v2369_v27  ;;  %v6749_v43 = vld [vmem:[%s6829_s4] ss:$0 sm:$0xff] }
 0x389   : > { %v2659_v37 = vmax.f32 %v2602_v12, 0.0 }
 0x38b   : > { %v2723_v62 = vmin.f32 %v2659_v37, 1.0 }
 0x38c   : > { %v2554_v36 = vpop.f32.mrf.mxu2  ;;  %v2459_v63 = vpop.f32.mrf.mxu0 }
 0x38d   : > { %v2555_v30 = vadd.f32 %v2554_v36, %v2506_v35  ;;  %v2603_v41 = vpop.f32.mrf.mxu3  ;;  %v2460_v23 = vadd.f32 %v2459_v63, %v6607_v59 }
 0x38e   : > { %v2508_v4 = vpop.f32.mrf.mxu1 }
 0x38f   : > { %v2604_v25 = vadd.f32 %v2603_v41, %v2555_v30  ;;  %3074 = vmatmul.bf16.gmra.mxu0 %v7207_v60  ;;  %v2509_v47 = vadd.f32 %v2508_v4, %v2460_v23 }
 0x391   : > { %v2663_v7 = vmax.f32 %v2604_v25, 0.0  ;;  %3123 = vmatmul.bf16.gmra.mxu1 %v7210_v28  ;;  %3172 = vmatmul.bf16.gmra.mxu2 %v2770_v5 }
 0x393   : > { %v2727_v57 = vmin.f32 %v2663_v7, 1.0 }
 0x394   : > { %v2557_v38 = vpop.f32.mrf.mxu2  ;;  %v2461_v21 = vpop.f32.mrf.mxu0 }
 0x395   : > { %v2767_v16 = vpack.c.bf16 %v2727_v57, %v2723_v62  ;;  %v2606_v19 = vpop.f32.mrf.mxu3  ;;  %v2558_v34 = vadd.f32 %v2557_v38, %v2509_v47  ;;  %v2462_v59 = vadd.f32 %v2461_v21, %v2413_v48 }
 0x396   : > { %v2510_v50 = vpop.f32.mrf.mxu1 }
 0x397   : > { %3216 = vmatmul.bf16.gmra.mxu3 %v2767_v16  ;;  %v2607_v61 = vadd.f32 %v2606_v19, %v2558_v34  ;;  %v2511_v54 = vadd.f32 %v2510_v50, %v2462_v59 }
 0x399   : > { %v2667_v5 = vmax.f32 %v2607_v61, 0.0 }
 0x39b   : > { %v2731_v11 = vmin.f32 %v2667_v5, 1.0 }
 0x39c   : > { %v2559_v52 = vpop.f32.mrf.mxu2  ;;  %v2464_v24 = vpop.f32.mrf.mxu0 }
 0x39d   : > { %v2560_v44 = vadd.f32 %v2559_v52, %v2511_v54  ;;  %v2608_v40 = vpop.f32.mrf.mxu3  ;;  %v2465_v56 = vadd.f32 %v2464_v24, %v6638_v46 }
 0x39e   : > { %v2513_v32 = vpop.f32.mrf.mxu1 }
 0x39f   : > { %v2609_v20 = vadd.f32 %v2608_v40, %v2560_v44  ;;  %3079 = vmatmul.bf16.gmra.mxu0 %v7213_v8  ;;  %v2514_v10 = vadd.f32 %v2513_v32, %v2465_v56 }
 0x3a1   : > { %v2671_v0 = vmax.f32 %v2609_v20, 0.0  ;;  %3128 = vmatmul.bf16.gmra.mxu1 %v7216_v3  ;;  %3177 = vmatmul.bf16.gmra.mxu2 %v2774_v13 }
 0x3a3   : > { %v2735_v6 = vmin.f32 %v2671_v0, 1.0 }
 0x3a4   : > { %v2562_v2 = vpop.f32.mrf.mxu2  ;;  %v2466_v42 = vpop.f32.mrf.mxu0 }
 0x3a5   : > { %v2771_v51 = vpack.c.bf16 %v2735_v6, %v2731_v11  ;;  %v2611_v55 = vpop.f32.mrf.mxu3  ;;  %v2563_v18 = vadd.f32 %v2562_v2, %v2514_v10  ;;  %v2467_v46 = vadd.f32 %v2466_v42, %v2418_v31 }
 0x3a6   : > { %v2515_v14 = vpop.f32.mrf.mxu1 }
 0x3a7   : > { %3221 = vmatmul.bf16.gmra.mxu3 %v2771_v51  ;;  %v2612_v49 = vadd.f32 %v2611_v55, %v2563_v18  ;;  %v2516_v45 = vadd.f32 %v2515_v14, %v2467_v46 }
 0x3a9   : > { %v2675_v30 = vmax.f32 %v2612_v49, 0.0 }
 0x3ab   : > { %v2739_v37 = vmin.f32 %v2675_v30, 1.0 }
 0x3ac   : > { %v2564_v13 = vpop.f32.mrf.mxu2  ;;  %v3045_v12 = vpop.f32.mrf.mxu0 }
 0x3ad   : > { %v2565_v33 = vadd.f32 %v2564_v13, %v2516_v45  ;;  %v2613_v35 = vpop.f32.mrf.mxu3  ;;  %v3046_v39 = vadd.f32 %v6749_v43, %v3045_v12 }
 0x3ae   : > { %v3094_v36 = vpop.f32.mrf.mxu1 }
 0x3af   : > { %v2614_v41 = vadd.f32 %v2613_v35, %v2565_v33  ;;  %v3095_v63 = vadd.f32 %v3094_v36, %v3046_v39 }
 0x3b1   : > { %v2679_v4 = vmax.f32 %v2614_v41, 0.0 }
 0x3b3   : > { %v2743_v25 = vmin.f32 %v2679_v4, 1.0 }
 0x3b4   : > { %v3143_v1 = vpop.f32.mrf.mxu2  ;;  %v3047_v9 = vpop.f32.mrf.mxu0 }
 0x3b5   : > { %v2775_v53 = vpack.c.bf16 %v2743_v25, %v2739_v37  ;;  %v3144_v60 = vadd.f32 %v3143_v1, %v3095_v63  ;;  %v3048_v7 = vadd.f32 %v6749_v43, %v3047_v9 }
 0x3b6   : > { %v3096_v23 = vpop.f32.mrf.mxu1 }
 0x3b7   : > { %3226 = vmatmul.bf16.gmra.mxu3 %v2775_v53  ;;  %v3097_v17 = vadd.f32 %v3096_v23, %v3048_v7 }
 0x3bc   : > { %v3145_v15 = vpop.f32.mrf.mxu2  ;;  %v3050_v62 = vpop.f32.mrf.mxu0 }
 0x3bd   : > { %v3146_v28 = vadd.f32 %v3145_v15, %v3097_v17  ;;  %v3051_v57 = vadd.f32 %v6749_v43, %v3050_v62 }
 0x3be   : > { %v3099_v38 = vpop.f32.mrf.mxu1 }
 0x3bf   : > { %v3100_v48 = vadd.f32 %v3099_v38, %v3051_v57 }
 0x3c4   : > { %v3148_v16 = vpop.f32.mrf.mxu2  ;;  %v3052_v19 = vpop.f32.mrf.mxu0 }
 0x3c5   : > { %v3149_v47 = vadd.f32 %v3148_v16, %v3100_v48  ;;  %v3053_v21 = vadd.f32 %v6749_v43, %v3052_v19 }
 0x3c6   : > { %v3101_v50 = vpop.f32.mrf.mxu1 }
 0x3c7   : > { %v3102_v34 = vadd.f32 %v3101_v50, %v3053_v21 }
 0x3ca   : > { %v3192_v59 = vpop.f32.mrf.mxu3 }
 0x3cb   : > { %v6755_v61 = vadd.f32 %v3192_v59, %v3144_v60 }
 0x3cc   : > { %v3150_v54 = vpop.f32.mrf.mxu2  ;;  %v3055_v44 = vpop.f32.mrf.mxu0 }
 0x3cd   : > { %v3151_v52 = vadd.f32 %v3150_v54, %v3102_v34  ;;  %v3056_v40 = vadd.f32 %v6749_v43, %v3055_v44 }
 0x3ce   : > { %v3104_v24 = vpop.f32.mrf.mxu1 }
 0x3cf   : > { %v3105_v32 = vadd.f32 %v3104_v24, %v3056_v40 }
 0x3d2   : > { %v3194_v5 = vpop.f32.mrf.mxu3 }
 0x3d3   : > { %v6758_v20 = vadd.f32 %v3194_v5, %v3146_v28 }
 0x3d4   : > { %v3153_v29 = vpop.f32.mrf.mxu2  ;;  %v3057_v8 = vpop.f32.mrf.mxu0 }
 0x3d5   : > { %v3154_v22 = vadd.f32 %v3153_v29, %v3105_v32  ;;  %v3058_v27 = vadd.f32 %v6749_v43, %v3057_v8 }
 0x3d6   : > { %v3106_v0 = vpop.f32.mrf.mxu1 }
 0x3d7   : > { %v3107_v56 = vadd.f32 %v3106_v0, %v3058_v27 }
 0x3da   : > { %v3197_v58 = vpop.f32.mrf.mxu3 }
 0x3db   : > { %v6761_v26 = vadd.f32 %v3197_v58, %v3149_v47 }
 0x3dc   : > { %v3155_v3 = vpop.f32.mrf.mxu2  ;;  %v3060_v6 = vpop.f32.mrf.mxu0 }
 0x3dd   : > { %v3156_v11 = vadd.f32 %v3155_v3, %v3107_v56  ;;  %v3061_v2 = vadd.f32 %v6749_v43, %v3060_v6 }
 0x3de   : > { %v3109_v31 = vpop.f32.mrf.mxu1 }
 0x3df   : > { %v3110_v51 = vadd.f32 %v3109_v31, %v3061_v2 }
 0x3e2   : > { %v3199_v10 = vpop.f32.mrf.mxu3 }
 0x3e3   : > { %v6764_v55 = vadd.f32 %v3199_v10, %v3151_v52 }
 0x3e4   : > { %v3158_v42 = vpop.f32.mrf.mxu2  ;;  %v3062_v18 = vpop.f32.mrf.mxu0 }
 0x3e5   : > { %v3159_v14 = vadd.f32 %v3158_v42, %v3110_v51  ;;  %v3063_v46 = vadd.f32 %v6749_v43, %v3062_v18 }
 0x3e6   : > { %v3111_v49 = vpop.f32.mrf.mxu1 }
 0x3e7   : > { %v3112_v45 = vadd.f32 %v3111_v49, %v3063_v46 }
 0x3ea   : > { %v3202_v13 = vpop.f32.mrf.mxu3 }
 0x3eb   : > { %v6767_v33 = vadd.f32 %v3202_v13, %v3154_v22 }
 0x3ec   : > { %v3160_v12 = vpop.f32.mrf.mxu2  ;;  %v3065_v39 = vpop.f32.mrf.mxu0 }
 0x3ed   : > { %v3161_v35 = vadd.f32 %v3160_v12, %v3112_v45  ;;  %v3066_v36 = vadd.f32 %v6749_v43, %v3065_v39 }
 0x3ee   : > { %v3114_v30 = vpop.f32.mrf.mxu1 }
 0x3ef   : > { %v3115_v41 = vadd.f32 %v3114_v30, %v3066_v36 }
 0x3f2   : > { %v3204_v63 = vpop.f32.mrf.mxu3 }
 0x3f3   : > { %v6770_v4 = vadd.f32 %v3204_v63, %v3156_v11 }
 0x3f4   : > { %v3163_v37 = vpop.f32.mrf.mxu2  ;;  %v3067_v1 = vpop.f32.mrf.mxu0 }
 0x3f5   : > { %v3164_v25 = vadd.f32 %v3163_v37, %v3115_v41  ;;  %v3068_v53 = vadd.f32 %v6749_v43, %v3067_v1 }
 0x3f6   : > { %v3116_v60 = vpop.f32.mrf.mxu1 }
 0x3f7   : > { %v3117_v9 = vadd.f32 %v3116_v60, %v3068_v53 }
 0x3fa   : > { %v3207_v7 = vpop.f32.mrf.mxu3 }
 0x3fb   : > { %v6773_v23 = vadd.f32 %v3207_v7, %v3159_v14 }
 0x3fc   : > { %v3165_v17 = vpop.f32.mrf.mxu2  ;;  %v3070_v57 = vpop.f32.mrf.mxu0 }
 0x3fd   : > { %v3166_v15 = vadd.f32 %v3165_v17, %v3117_v9  ;;  %v3071_v1 = vadd.f32 %v6749_v43, %v3070_v57 }
 0x3fe   : > { %v3119_v48 = vpop.f32.mrf.mxu1 }
 0x402   : > { %v3209_v28 = vpop.f32.mrf.mxu3 }
 0x403   : > { %v6775_v62 = vadd.f32 %v3209_v28, %v3161_v35 }
 0x404   : > { %v3168_v47 = vpop.f32.mrf.mxu2  ;;  %v3072_v19 = vpop.f32.mrf.mxu0 }
 0x405   : > { %v3073_v36 = vadd.f32 %v6749_v43, %v3072_v19 }
 0x406   : > { %v3121_v34 = vpop.f32.mrf.mxu1 }
 0x407   : > { %v3122_v53 = vadd.f32 %v3121_v34, %v3073_v36 }
 0x40a   : > { %v3212_v38 = vpop.f32.mrf.mxu3 }
 0x40b   : > { %v6777_v16 = vadd.f32 %v3212_v38, %v3164_v25 }
 0x40c   : > { %v3170_v59 = vpop.f32.mrf.mxu2  ;;  %v3075_v54 = vpop.f32.mrf.mxu0 }
 0x40d   : > { %v3076_v49 = vadd.f32 %v6749_v43, %v3075_v54  ;;  %v3171_v17 = vadd.f32 %v3170_v59, %v3122_v53 }
 0x40e   : > { %v3124_v44 = vpop.f32.mrf.mxu1 }
 0x40f   : > { %v3125_v30 = vadd.f32 %v3124_v44, %v3076_v49 }
 0x412   : > { %v3214_v21 = vpop.f32.mrf.mxu3 }
 0x413   : > { %v6779_v50 = vadd.f32 %v3214_v21, %v3166_v15  ;;  %v3120_v15 = vadd.f32 %v3119_v48, %v3071_v1  ;;  %v3240_v48 = vmax.f32 %v6777_v16, 0.0 }
 0x414   : > { %v3173_v40 = vpop.f32.mrf.mxu2  ;;  %v3077_v32 = vpop.f32.mrf.mxu0 }
 0x415   : > { %v3078_v51 = vadd.f32 %v6749_v43, %v3077_v32  ;;  %v3174_v25 = vadd.f32 %v3173_v40, %v3125_v30  ;;  %v3169_v21 = vadd.f32 %v3168_v47, %v3120_v15  ;;  %v3241_v34 = vmax.f32 %v6779_v50, 0.0 }
 0x416   : > { %v3126_v5 = vpop.f32.mrf.mxu1  ;;  %v3239_v47 = vmax.f32 %v6775_v62, 0.0  ;;  %v3238_v32 = vmax.f32 %v6773_v23, 0.0  ;;  %v4559_v50 = vmov 0  }
 0x417   : > { %v3127_v45 = vadd.f32 %v3126_v5, %v3078_v51  ;;  %4549 = vset.pattern.permute.xlu0 %v4559_v50 }
 0x418   : > { %v3255_v5 = vmin.f32 %v3239_v47, 1.0  ;;  %v3254_v16 = vmin.f32 %v3238_v32, 1.0 }
 0x41a   : > { %v3217_v52 = vpop.f32.mrf.mxu3 }
 0x41b   : > { %v3218_v54 = vadd.f32 %v3217_v52, %v3169_v21  ;;  %v3256_v52 = vmin.f32 %v3240_v48, 1.0 }
 0x41c   : > { %v3175_v29 = vpop.f32.mrf.mxu2  ;;  %v3080_v8 = vpop.f32.mrf.mxu0 }
 0x41d   : > { %v3081_v11 = vadd.f32 %v6749_v43, %v3080_v8  ;;  %v3176_v35 = vadd.f32 %v3175_v29, %v3127_v45  ;;  %v3337_v29 = vld [vmem:[#allocation2] sm:$0x1]  ;;  %v3236_v8 = vmax.f32 %v6767_v33, 0.0  ;;  %v3232_v33 = vmax.f32 %v6755_v61, 0.0 }
 0x41e   : > { %v3129_v0 = vpop.f32.mrf.mxu1  ;;  %3340 = vperm.xlu0 %4549, %v3337_v29  }
 0x41f   : > { %v3130_v10 = vadd.f32 %v3129_v0, %v3081_v11  ;;  %v3252_v23 = vmin.f32 %v3236_v8, 1.0  ;;  %v3234_v0 = vmax.f32 %v6761_v26, 0.0  ;;  %v3264_v26 = vld [vmem:[%s6830_s5] sm:$0xff] }
 0x422   : > { %v3219_v24 = vpop.f32.mrf.mxu3 }
 0x423   : > { %v3220_v28 = vadd.f32 %v3219_v24, %v3171_v17  ;;  %v3257_v24 = vmin.f32 %v3241_v34, 1.0 }
 0x424   : > { %v3178_v56 = vpop.f32.mrf.mxu2  ;;  %v3082_v58 = vpop.f32.mrf.mxu0 }
 0x425   : > { %v3083_v6 = vadd.f32 %v6749_v43, %v3082_v58  ;;  %v3179_v14 = vadd.f32 %v3178_v56, %v3130_v10  ;;  %v3243_v44 = vmax.f32 %v3220_v28, 0.0  ;;  %v3242_v43 = vmax.f32 %v3218_v54, 0.0 }
 0x426   : > { %v3131_v2 = vpop.f32.mrf.mxu1  ;;  %v3250_v58 = vmin.f32 %v3234_v0, 1.0 }
 0x427   : > { %v3132_v42 = vadd.f32 %v3131_v2, %v3083_v6  ;;  %v3259_v57 = vmin.f32 %v3243_v44, 1.0  ;;  %v3258_v59 = vmin.f32 %v3242_v43, 1.0 }
 0x42a   : > { %v3222_v22 = vpop.f32.mrf.mxu3 }
 0x42b   : > { %v3223_v60 = vadd.f32 %v3222_v22, %v3174_v25  ;;  %v3237_v22 = vmax.f32 %v6770_v4, 0.0  ;;  %v3233_v4 = vmax.f32 %v6758_v20, 0.0 }
 0x42c   : > { %v3180_v31 = vpop.f32.mrf.mxu2 }
 0x42d   : > { %v3181_v18 = vadd.f32 %v3180_v31, %v3132_v42  ;;  %v3244_v38 = vmax.f32 %v3223_v60, 0.0  ;;  %v3253_v62 = vmin.f32 %v3237_v22, 1.0 }
 0x42f   : > { %v3260_v40 = vmin.f32 %v3244_v38, 1.0 }
 0x432   : > { %v3224_v27 = vpop.f32.mrf.mxu3 }
 0x433   : > { %v3225_v41 = vadd.f32 %v3224_v27, %v3176_v35  ;;  %v3235_v27 = vmax.f32 %v6764_v55, 0.0  ;;  %v3248_v55 = vmin.f32 %v3232_v33, 1.0 }
 0x435   : > { %v3245_v9 = vmax.f32 %v3225_v41, 0.0  ;;  %v3251_v56 = vmin.f32 %v3235_v27, 1.0 }
 0x437   : > { %v3261_v19 = vmin.f32 %v3245_v9, 1.0 }
 0x43a   : > { %v3227_v3 = vpop.f32.mrf.mxu3 }
 0x43b   : > { %v3228_v13 = vadd.f32 %v3227_v3, %v3179_v14  ;;  %v3249_v3 = vmin.f32 %v3233_v4, 1.0 }
 0x43d   : > { %v3246_v63 = vmax.f32 %v3228_v13, 0.0 }
 0x43f   : > { %v3262_v7 = vmin.f32 %v3246_v63, 1.0 }
 0x442   : > { %v3229_v46 = vpop.f32.mrf.mxu3 }
 0x443   : > { %v3230_v12 = vadd.f32 %v3229_v46, %v3181_v18 }
 0x445   : > { %v3247_v39 = vmax.f32 %v3230_v12, 0.0 }
 0x447   : > { %v3263_v37 = vmin.f32 %v3247_v39, 1.0 }
 0x449   : > { %4296 = vmatpush.xpose.msk.msrb.mxu0 %vm3265_vm0, %v3263_v37 }
 0x44d   : > { %4297 = vmatpush.xpose.msk.msrb.mxu0 %vm3265_vm0, %v3262_v7 }
 0x451   : > { %4298 = vmatpush.xpose.msk.msrb.mxu0 %vm3265_vm0, %v3261_v19 }
 0x455   : > { %4299 = vmatpush.xpose.msk.msrb.mxu0 %vm3265_vm0, %v3260_v40 }
 0x459   : > { %4300 = vmatpush.xpose.msk.msrb.mxu0 %vm3265_vm0, %v3259_v57 }
 0x45d   : > { %4301 = vmatpush.xpose.msk.msrb.mxu0 %vm3265_vm0, %v3258_v59 }
 0x461   : > { %4302 = vmatpush.xpose.msk.msrb.mxu0 %vm3265_vm0, %v3257_v24 }
 0x465   : > { %4303 = vmatpush.xpose.msk.msrb.mxu0 %vm3265_vm0, %v3256_v52 }
 0x469   : > { %4304 = vmatpush.xpose.msk.msrb.mxu0 %vm3265_vm0, %v3255_v5 }
 0x46d   : > { %4305 = vmatpush.xpose.msk.msrb.mxu0 %vm3265_vm0, %v3254_v16 }
 0x471   : > { %4306 = vmatpush.xpose.msk.msrb.mxu0 %vm3265_vm0, %v3253_v62 }
 0x475   : > { %4307 = vmatpush.xpose.msk.msrb.mxu0 %vm3265_vm0, %v3252_v23 }
 0x479   : > { %4308 = vmatpush.xpose.msk.msrb.mxu0 %vm3265_vm0, %v3251_v56 }
 0x47d   : > { %4309 = vmatpush.xpose.msk.msrb.mxu0 %vm3265_vm0, %v3250_v58 }
 0x481   : > { %4310 = vmatpush.xpose.msk.msrb.mxu0 %vm3265_vm0, %v3249_v3 }
 0x485   : > { %4311 = vmatpush.xpose.msk.msrb.mxu0 %vm3265_vm0, %v3248_v55 }
 0x488   : > { %4312 = vmatmul.msk.f32.vlgmr.msrb.gmra.mxu0 %vm3265_vm0, %v3264_v26 }
 0x490   : > { %v3341_v11 = vpop.permute.xlu0 %3340 }
 0x491   : > { %v3343_v20 = vperm.slane %v3341_v11, 0 }
 0x505   : > { %v3334_v61 = vpop.f32.mrf.mxu0 }
 0x506   : > { %v3344_v6 = vadd.f32 %v3343_v20, %v3334_v61 }
 0x508   : > { %3345 = vst [vmem:[%s281_s14] sm:$0x1] %v3344_v6 }
 0x509 PF: > { %s19_s26 = sadd.s32 1, %s4557_s26  }
 0x50a   : > { %p16_p5 = scmp.ge.s32.totalorder %s19_s26, 5  }
 0x50c   :  { %18 = sbr.rel (!%p16_p5) target bundleno = 3 (0x3), region = 78 }

</bundles_post_ra>
